<compile_context>
chip_gen: v5e
topology: v5e:2x2
jax: 0.10.0
libtpu: 0.0.40
codegen_flags: <defaults>
</compile_context>

<pallas_src>
import functools

import jax
import jax.numpy as jnp
from jax import lax
from jax.experimental import pallas as pl
from jax.experimental.pallas import tpu as pltpu

H_IN, W_IN = 15, 25          # input spatial (implied by the module)
C_IN, C1, C2 = 3, 24, 64     # channels: input, conv1, conv2
P1H, P1W = 3, 5              # spatial after maxpool1 (5,5)
F1, F2 = 32, 2               # linear widths
F2_PAD = 128                 # lane-padded linear2 output (sliced to F2 outside)
BN_EPS = 1e-5

WP = W_IN + 2                # 27: zero-padded width
LX = WP * C_IN               # 81: input lanes, index = w*3 + c
L1 = P1W * C1                # 120: pooled conv1 lanes, index = pow*24 + c
N1 = 5 * L1                  # 600: conv1 output lanes, index = jw*120 + pow*24 + co
N2 = P1H * P1W * C2          # 960: conv2 output lanes, index = poh*320 + ow*64 + co


def simple_dnn_kernel(xs_ref, w1t_ref, s1_ref, b1_ref, w2t_ref, s2_ref, b2_ref,
                      wl1_ref, bl1_ref, wl2_ref, bl2_ref, out_ref):
    tb = out_ref.shape[0]
    f32 = jnp.float32

    # ---- conv1 (3x3, pad=1, 3->24) as 3 banded MXU matmuls.
    #      LHS rows = (jh, poh, tb) (one padded input row each), lanes = (w, c).
    #      Result lanes = (jw, pow, co) so both pool axes stay block-contiguous.
    r = jnp.dot(xs_ref[0, 0], w1t_ref[0], preferred_element_type=f32)
    r = r + jnp.dot(xs_ref[1, 0], w1t_ref[1], preferred_element_type=f32)
    r = r + jnp.dot(xs_ref[2, 0], w1t_ref[2], preferred_element_type=f32)
    # conv bias + eval-mode BatchNorm folded into per-channel scale/bias, + ReLU
    h = jnp.maximum(r * s1_ref[...] + b1_ref[...], 0.0)           # (15*tb, 600)

    # ---- maxpool1 (5,5): max over 5 jh row-blocks, then 5 jw lane-blocks.
    rows = P1H * tb
    p = h[0:rows, :]
    for jh in range(1, 5):
        p = jnp.maximum(p, h[jh * rows:(jh + 1) * rows, :])        # (3*tb, 600)
    q = p[:, 0:L1]
    for jw in range(1, 5):
        q = jnp.maximum(q, p[:, jw * L1:(jw + 1) * L1])            # (3*tb, 120)

    # ---- conv2 (3x3, pad=1, 24->64) as 3 banded matmuls (one per input row),
    #      fused with BN + ReLU.  rows = tb, lanes = (poh, ow, co).
    o = jnp.dot(q[0:tb, :], w2t_ref[0], preferred_element_type=f32)
    o = o + jnp.dot(q[tb:2 * tb, :], w2t_ref[1], preferred_element_type=f32)
    o = o + jnp.dot(q[2 * tb:3 * tb, :], w2t_ref[2], preferred_element_type=f32)
    o = jnp.maximum(o * s2_ref[...] + b2_ref[...], 0.0)            # (tb, 960)

    # ---- maxpool2 (3,5) == global max over the 15 (poh, ow) lane blocks.
    feat = o[:, 0:C2]
    for t in range(1, P1H * P1W):
        feat = jnp.maximum(feat, o[:, t * C2:(t + 1) * C2])        # (tb, 64)

    # ---- flatten (spatial is 1x1) + linear1/ReLU + linear2 (lane-padded)/ReLU
    z1 = jnp.maximum(
        jnp.dot(feat, wl1_ref[...], preferred_element_type=f32) + bl1_ref[...],
        0.0)                                                       # (tb, 32)
    z2 = jnp.maximum(
        jnp.dot(z1, wl2_ref[...], preferred_element_type=f32) + bl2_ref[...],
        0.0)                                                       # (tb, 128)
    out_ref[...] = z2


def _banded_conv1_weights(w1_hwio):
    """(3,3,3,24)[dy,dx,ci,co] -> (3, 81, 600):
       K = (w_in, ci), N = (jw, pow, co) with ow = 5*pow + jw."""
    w_in = jnp.arange(WP)[:, None]
    ow = jnp.arange(W_IN)[None, :]
    dx = w_in - ow                                   # (27, 25)
    valid = ((dx >= 0) & (dx < 3)).astype(w1_hwio.dtype)
    dxc = jnp.clip(dx, 0, 2)
    w = w1_hwio[:, dxc, :, :]                        # (3,27,25,3,24) [dy,w_in,ow,ci,co]
    w = w * valid[None, :, :, None, None]
    w = jnp.transpose(w, (0, 1, 3, 2, 4))            # [dy, w_in, ci, ow, co]
    w = w.reshape(3, WP, C_IN, P1W, 5, C1)           # ow -> (pow, jw)
    w = jnp.transpose(w, (0, 1, 2, 4, 3, 5))         # [dy, w_in, ci, jw, pow, co]
    return w.reshape(3, LX, N1)


def _banded_conv2_weights(w2_hwio):
    """(3,3,24,64)[dy,dx,ci,co] -> (3, 120, 960): leading axis = input row,
       K = (pow_in, ci), N = (poh, ow, co); padding=1 folded in as zeros."""
    poh_in = jnp.arange(P1H)[:, None]
    poh = jnp.arange(P1H)[None, :]
    dy = poh_in - poh + 1                            # (3, 3)
    pow_in = jnp.arange(P1W)[:, None]
    ow = jnp.arange(P1W)[None, :]
    dx = pow_in - ow + 1                             # (5, 5)
    vy = (dy >= 0) & (dy < 3)
    vx = (dx >= 0) & (dx < 3)
    dyc = jnp.clip(dy, 0, 2)
    dxc = jnp.clip(dx, 0, 2)
    w = w2_hwio[dyc[:, :, None, None], dxc[None, None, :, :], :, :]
    # (3,3,5,5,24,64) [poh_in, poh, pow_in, ow, ci, co]
    mask = (vy[:, :, None, None] & vx[None, None, :, :]).astype(w2_hwio.dtype)
    w = w * mask[..., None, None]
    w = jnp.transpose(w, (0, 2, 4, 1, 3, 5))         # [poh_in, pow_in, ci, poh, ow, co]
    return w.reshape(P1H, L1, N2)


def _prepare_inputs(x_nchw, tb):
    """NCHW -> (3, nt, 15*tb, 81) lane-dense row stack.
       xs[dy, bt, (jh*3+poh)*tb + i, w*3 + c] = x_pad[bt*tb+i, 5*poh+jh+dy, w, c]."""
    n = x_nchw.shape[0]
    n_pad = ((n + tb - 1) // tb) * tb
    nt = n_pad // tb
    x = jnp.transpose(x_nchw, (0, 2, 3, 1)).astype(jnp.float32)     # (N,15,25,3)
    x = jnp.pad(x, ((0, n_pad - n), (1, 1), (1, 1), (0, 0)))        # (Np,17,27,3)
    xw = x.reshape(n_pad, H_IN + 2, LX)                             # (Np,17,81)
    idx = (jnp.arange(3)[:, None, None] + jnp.arange(5)[None, :, None]
           + 5 * jnp.arange(P1H)[None, None, :])                    # (3,5,3): 5*poh+jh+dy
    xg = xw[:, idx, :]                                              # (Np,3,5,3,81)
    xg = jnp.transpose(xg, (1, 2, 3, 0, 4))                         # (3,5,3,Np,81)
    xg = xg.reshape(3, 5, P1H, nt, tb, LX)
    xg = jnp.transpose(xg, (0, 3, 1, 2, 4, 5))                      # (3,nt,5,3,tb,81)
    return xg.reshape(3, nt, 5 * P1H * tb, LX), n_pad, nt


@functools.partial(jax.jit, static_argnames=("tb",))
def simple_dnn_forward(x_nchw, params, tb=8):
    n = x_nchw.shape[0]
    xs, n_pad, nt = _prepare_inputs(x_nchw, tb)

    # Fold conv bias + inference-mode BatchNorm into per-channel scale/bias.
    # TODO(synk): BatchNorm2d is implemented in eval mode (running stats);
    # training-mode batch statistics are not computed.
    def fold(gamma, beta, mean, var, conv_bias):
        scale = gamma / jnp.sqrt(var + BN_EPS)
        bias = beta + (conv_bias - mean) * scale
        return scale, bias

    s1, b1 = fold(params["g1"], params["be1"], params["m1"], params["v1"], params["cb1"])
    s2, b2 = fold(params["g2"], params["be2"], params["m2"], params["v2"], params["cb2"])

    w1t = _banded_conv1_weights(jnp.transpose(params["w1"], (2, 3, 1, 0)))  # (3,81,600)
    w2t = _banded_conv2_weights(jnp.transpose(params["w2"], (2, 3, 1, 0)))  # (3,120,960)
    s1t = jnp.tile(s1, W_IN).reshape(1, N1)
    b1t = jnp.tile(b1, W_IN).reshape(1, N1)
    s2t = jnp.tile(s2, P1H * P1W).reshape(1, N2)
    b2t = jnp.tile(b2, P1H * P1W).reshape(1, N2)
    wl1 = params["lw1"].T                                            # (64, 32)
    bl1 = params["lb1"].reshape(1, F1)
    wl2 = jnp.zeros((F1, F2_PAD), jnp.float32).at[:, :F2].set(params["lw2"].T)
    bl2 = jnp.zeros((1, F2_PAD), jnp.float32).at[0, :F2].set(params["lb2"])

    args = (xs, w1t, s1t, b1t, w2t, s2t, b2t, wl1, bl1, wl2, bl2)

    def full_spec(shape):
        nd = len(shape)
        return pl.BlockSpec(shape, lambda b, _nd=nd: (0,) * _nd)

    in_specs = [pl.BlockSpec((3, 1, 5 * P1H * tb, LX), lambda b: (0, b, 0, 0))]
    in_specs += [full_spec(a.shape) for a in args[1:]]

    out = pl.pallas_call(
        simple_dnn_kernel,
        out_shape=jax.ShapeDtypeStruct((n_pad, F2_PAD), jnp.float32),
        grid_spec=pltpu.PrefetchScalarGridSpec(
            num_scalar_prefetch=0,
            grid=(nt,),
            in_specs=in_specs,
            out_specs=pl.BlockSpec((tb, F2_PAD), lambda b: (b, 0)),
        ),
        compiler_params=pltpu.CompilerParams(
            dimension_semantics=("parallel",),
            vmem_limit_bytes=32 * 1024 * 1024,
        ),
    )(*args)
    return out[:n, :F2]


def reference_forward(x, p):
    """Pure-JAX/XLA reference matching the PyTorch forward (eval-mode BN)."""
    dn = ("NCHW", "OIHW", "NCHW")

    def bn(y, g, be, m, v):
        return ((y - m[None, :, None, None])
                / jnp.sqrt(v[None, :, None, None] + BN_EPS)
                * g[None, :, None, None] + be[None, :, None, None])

    y = lax.conv_general_dilated(x, p["w1"], (1, 1), ((1, 1), (1, 1)),
                                 dimension_numbers=dn) + p["cb1"][None, :, None, None]
    y = jnp.maximum(bn(y, p["g1"], p["be1"], p["m1"], p["v1"]), 0.0)
    y = lax.reduce_window(y, -jnp.inf, lax.max, (1, 1, 5, 5), (1, 1, 5, 5), "VALID")
    y = lax.conv_general_dilated(y, p["w2"], (1, 1), ((1, 1), (1, 1)),
                                 dimension_numbers=dn) + p["cb2"][None, :, None, None]
    y = jnp.maximum(bn(y, p["g2"], p["be2"], p["m2"], p["v2"]), 0.0)
    y = lax.reduce_window(y, -jnp.inf, lax.max, (1, 1, 3, 5), (1, 1, 3, 5), "VALID")
    y = y.reshape(y.shape[0], -1)
    y = jnp.maximum(y @ p["lw1"].T + p["lb1"], 0.0)
    y = jnp.maximum(y @ p["lw2"].T + p["lb2"], 0.0)
    return y


def make_params(key):
    ks = jax.random.split(key, 16)
    nrm = lambda k, s, sc=0.2: sc * jax.random.normal(k, s, jnp.float32)
    return {
        "w1": nrm(ks[0], (C1, C_IN, 3, 3)), "cb1": nrm(ks[1], (C1,), 0.1),
        "g1": 1.0 + nrm(ks[2], (C1,), 0.1), "be1": nrm(ks[3], (C1,), 0.1),
        "m1": nrm(ks[4], (C1,), 0.1),
        "v1": jax.random.uniform(ks[5], (C1,), jnp.float32, 0.5, 1.5),
        "w2": nrm(ks[6], (C2, C1, 3, 3)), "cb2": nrm(ks[7], (C2,), 0.1),
        "g2": 1.0 + nrm(ks[8], (C2,), 0.1), "be2": nrm(ks[9], (C2,), 0.1),
        "m2": nrm(ks[10], (C2,), 0.1),
        "v2": jax.random.uniform(ks[11], (C2,), jnp.float32, 0.5, 1.5),
        "lw1": nrm(ks[12], (F1, C2)), "lb1": nrm(ks[13], (F1,), 0.1),
        "lw2": nrm(ks[14], (F2, F1)), "lb2": nrm(ks[15], (F2,), 0.1),
    }


if __name__ == "__main__":
    key = jax.random.PRNGKey(0)
    kx, kp = jax.random.split(key)
    n = 12
    x = jax.random.normal(kx, (n, C_IN, H_IN, W_IN), jnp.float32)  # NCHW like PyTorch
    params = make_params(kp)

    # tb=8 -> batch padded to 16, grid of 2 "parallel" steps of 8 samples each.
    out = simple_dnn_forward(x, params, tb=8)
    jax.block_until_ready(out)

    ref = reference_forward(x, params)
    assert out.shape == (n, F2), out.shape
    if not jnp.allclose(out, ref, rtol=2e-3, atol=2e-3):
        raise AssertionError(f"mismatch:\nkernel={out}\nref={ref}")
    print("KERNEL_OK")
</pallas_src>

<mosaic_0001>
module attributes {stable_mosaic.version = 11 : i64} {
  func.func @simple_dnn_kernel(%arg0: i32, %arg1: memref<3x1x120x81xf32, #tpu.memory_space<vmem>>, %arg2: memref<3x81x600xf32, #tpu.memory_space<vmem>>, %arg3: memref<1x600xf32, #tpu.memory_space<vmem>>, %arg4: memref<1x600xf32, #tpu.memory_space<vmem>>, %arg5: memref<3x120x960xf32, #tpu.memory_space<vmem>>, %arg6: memref<1x960xf32, #tpu.memory_space<vmem>>, %arg7: memref<1x960xf32, #tpu.memory_space<vmem>>, %arg8: memref<64x32xf32, #tpu.memory_space<vmem>>, %arg9: memref<1x32xf32, #tpu.memory_space<vmem>>, %arg10: memref<32x128xf32, #tpu.memory_space<vmem>>, %arg11: memref<1x128xf32, #tpu.memory_space<vmem>>, %arg12: memref<8x128xf32, #tpu.memory_space<vmem>>) attributes {dimension_semantics = [#tpu.dimension_semantics<parallel>], iteration_bounds = array<i64: 2>, scalar_prefetch = 0 : i64, scratch_operands = 0 : i64, tpu.core_type = #tpu.core_type<tc>, window_params = [{transform_indices = @transform_0, window_bounds = array<i64: 3, 1, 120, 81>}, {pipeline_mode = #tpu.pipeline_mode<synchronous>, transform_indices = @transform_1, window_bounds = array<i64: 3, 81, 600>}, {pipeline_mode = #tpu.pipeline_mode<synchronous>, transform_indices = @transform_2, window_bounds = array<i64: 1, 600>}, {pipeline_mode = #tpu.pipeline_mode<synchronous>, transform_indices = @transform_3, window_bounds = array<i64: 1, 600>}, {pipeline_mode = #tpu.pipeline_mode<synchronous>, transform_indices = @transform_4, window_bounds = array<i64: 3, 120, 960>}, {pipeline_mode = #tpu.pipeline_mode<synchronous>, transform_indices = @transform_5, window_bounds = array<i64: 1, 960>}, {pipeline_mode = #tpu.pipeline_mode<synchronous>, transform_indices = @transform_6, window_bounds = array<i64: 1, 960>}, {pipeline_mode = #tpu.pipeline_mode<synchronous>, transform_indices = @transform_7, window_bounds = array<i64: 64, 32>}, {pipeline_mode = #tpu.pipeline_mode<synchronous>, transform_indices = @transform_8, window_bounds = array<i64: 1, 32>}, {pipeline_mode = #tpu.pipeline_mode<synchronous>, transform_indices = @transform_9, window_bounds = array<i64: 32, 128>}, {pipeline_mode = #tpu.pipeline_mode<synchronous>, transform_indices = @transform_10, window_bounds = array<i64: 1, 128>}, {transform_indices = @transform_11, window_bounds = array<i64: 8, 128>}]} {
    %c0 = arith.constant 0 : index
    %c0_0 = arith.constant 0 : index
    %c0_1 = arith.constant 0 : index
    %c0_2 = arith.constant 0 : index
    %0 = vector.load %arg1[%c0, %c0_0, %c0_1, %c0_2] : memref<3x1x120x81xf32, #tpu.memory_space<vmem>>, vector<1x1x120x81xf32>
    %1 = vector.shape_cast %0 : vector<1x1x120x81xf32> to vector<120x81xf32>
    %c0_3 = arith.constant 0 : index
    %c0_4 = arith.constant 0 : index
    %c0_5 = arith.constant 0 : index
    %2 = vector.load %arg2[%c0_3, %c0_4, %c0_5] : memref<3x81x600xf32, #tpu.memory_space<vmem>>, vector<1x81x600xf32>
    %3 = vector.shape_cast %2 : vector<1x81x600xf32> to vector<81x600xf32>
    %cst = arith.constant dense<0.000000e+00> : vector<120x600xf32>
    %4 = tpu.matmul %1, %3, %cst {dimension_numbers = #tpu.dot_dimension_numbers<[1], [0], [0], [1], [0, 0, 1, 1], [], []>} : vector<120x81xf32>, vector<81x600xf32>, vector<120x600xf32> -> vector<120x600xf32>
    %c1 = arith.constant 1 : index
    %c0_6 = arith.constant 0 : index
    %c0_7 = arith.constant 0 : index
    %c0_8 = arith.constant 0 : index
    %5 = vector.load %arg1[%c1, %c0_6, %c0_7, %c0_8] : memref<3x1x120x81xf32, #tpu.memory_space<vmem>>, vector<1x1x120x81xf32>
    %6 = vector.shape_cast %5 : vector<1x1x120x81xf32> to vector<120x81xf32>
    %c1_9 = arith.constant 1 : index
    %c0_10 = arith.constant 0 : index
    %c0_11 = arith.constant 0 : index
    %7 = vector.load %arg2[%c1_9, %c0_10, %c0_11] : memref<3x81x600xf32, #tpu.memory_space<vmem>>, vector<1x81x600xf32>
    %8 = vector.shape_cast %7 : vector<1x81x600xf32> to vector<81x600xf32>
    %cst_12 = arith.constant dense<0.000000e+00> : vector<120x600xf32>
    %9 = tpu.matmul %6, %8, %cst_12 {dimension_numbers = #tpu.dot_dimension_numbers<[1], [0], [0], [1], [0, 0, 1, 1], [], []>} : vector<120x81xf32>, vector<81x600xf32>, vector<120x600xf32> -> vector<120x600xf32>
    %10 = arith.addf %4, %9 : vector<120x600xf32>
    %c2 = arith.constant 2 : index
    %c0_13 = arith.constant 0 : index
    %c0_14 = arith.constant 0 : index
    %c0_15 = arith.constant 0 : index
    %11 = vector.load %arg1[%c2, %c0_13, %c0_14, %c0_15] : memref<3x1x120x81xf32, #tpu.memory_space<vmem>>, vector<1x1x120x81xf32>
    %12 = vector.shape_cast %11 : vector<1x1x120x81xf32> to vector<120x81xf32>
    %c2_16 = arith.constant 2 : index
    %c0_17 = arith.constant 0 : index
    %c0_18 = arith.constant 0 : index
    %13 = vector.load %arg2[%c2_16, %c0_17, %c0_18] : memref<3x81x600xf32, #tpu.memory_space<vmem>>, vector<1x81x600xf32>
    %14 = vector.shape_cast %13 : vector<1x81x600xf32> to vector<81x600xf32>
    %cst_19 = arith.constant dense<0.000000e+00> : vector<120x600xf32>
    %15 = tpu.matmul %12, %14, %cst_19 {dimension_numbers = #tpu.dot_dimension_numbers<[1], [0], [0], [1], [0, 0, 1, 1], [], []>} : vector<120x81xf32>, vector<81x600xf32>, vector<120x600xf32> -> vector<120x600xf32>
    %16 = arith.addf %10, %15 : vector<120x600xf32>
    %c0_20 = arith.constant 0 : index
    %c0_21 = arith.constant 0 : index
    %17 = vector.load %arg3[%c0_20, %c0_21] : memref<1x600xf32, #tpu.memory_space<vmem>>, vector<1x600xf32>
    %18 = vector.broadcast %17 : vector<1x600xf32> to vector<120x600xf32>
    %19 = arith.mulf %16, %18 : vector<120x600xf32>
    %c0_22 = arith.constant 0 : index
    %c0_23 = arith.constant 0 : index
    %20 = vector.load %arg4[%c0_22, %c0_23] : memref<1x600xf32, #tpu.memory_space<vmem>>, vector<1x600xf32>
    %21 = vector.broadcast %20 : vector<1x600xf32> to vector<120x600xf32>
    %22 = arith.addf %19, %21 : vector<120x600xf32>
    %cst_24 = arith.constant 0.000000e+00 : f32
    %23 = vector.broadcast %cst_24 : f32 to vector<120x600xf32>
    %24 = arith.maximumf %22, %23 : vector<120x600xf32>
    %25 = vector.extract_strided_slice %24 {offsets = [0, 0], sizes = [24, 600], strides = [1, 1]} : vector<120x600xf32> to vector<24x600xf32>
    %26 = vector.extract_strided_slice %24 {offsets = [24, 0], sizes = [24, 600], strides = [1, 1]} : vector<120x600xf32> to vector<24x600xf32>
    %27 = arith.maximumf %25, %26 : vector<24x600xf32>
    %28 = vector.extract_strided_slice %24 {offsets = [48, 0], sizes = [24, 600], strides = [1, 1]} : vector<120x600xf32> to vector<24x600xf32>
    %29 = arith.maximumf %27, %28 : vector<24x600xf32>
    %30 = vector.extract_strided_slice %24 {offsets = [72, 0], sizes = [24, 600], strides = [1, 1]} : vector<120x600xf32> to vector<24x600xf32>
    %31 = arith.maximumf %29, %30 : vector<24x600xf32>
    %32 = vector.extract_strided_slice %24 {offsets = [96, 0], sizes = [24, 600], strides = [1, 1]} : vector<120x600xf32> to vector<24x600xf32>
    %33 = arith.maximumf %31, %32 : vector<24x600xf32>
    %34 = vector.extract_strided_slice %33 {offsets = [0, 0], sizes = [24, 120], strides = [1, 1]} : vector<24x600xf32> to vector<24x120xf32>
    %35 = vector.extract_strided_slice %33 {offsets = [0, 120], sizes = [24, 120], strides = [1, 1]} : vector<24x600xf32> to vector<24x120xf32>
    %36 = arith.maximumf %34, %35 : vector<24x120xf32>
    %37 = vector.extract_strided_slice %33 {offsets = [0, 240], sizes = [24, 120], strides = [1, 1]} : vector<24x600xf32> to vector<24x120xf32>
    %38 = arith.maximumf %36, %37 : vector<24x120xf32>
    %39 = vector.extract_strided_slice %33 {offsets = [0, 360], sizes = [24, 120], strides = [1, 1]} : vector<24x600xf32> to vector<24x120xf32>
    %40 = arith.maximumf %38, %39 : vector<24x120xf32>
    %41 = vector.extract_strided_slice %33 {offsets = [0, 480], sizes = [24, 120], strides = [1, 1]} : vector<24x600xf32> to vector<24x120xf32>
    %42 = arith.maximumf %40, %41 : vector<24x120xf32>
    %43 = vector.extract_strided_slice %42 {offsets = [0, 0], sizes = [8, 120], strides = [1, 1]} : vector<24x120xf32> to vector<8x120xf32>
    %c0_25 = arith.constant 0 : index
    %c0_26 = arith.constant 0 : index
    %c0_27 = arith.constant 0 : index
    %44 = vector.load %arg5[%c0_25, %c0_26, %c0_27] : memref<3x120x960xf32, #tpu.memory_space<vmem>>, vector<1x120x960xf32>
    %45 = vector.shape_cast %44 : vector<1x120x960xf32> to vector<120x960xf32>
    %cst_28 = arith.constant dense<0.000000e+00> : vector<8x960xf32>
    %46 = tpu.matmul %43, %45, %cst_28 {dimension_numbers = #tpu.dot_dimension_numbers<[1], [0], [0], [1], [0, 0, 1, 1], [], []>} : vector<8x120xf32>, vector<120x960xf32>, vector<8x960xf32> -> vector<8x960xf32>
    %47 = vector.extract_strided_slice %42 {offsets = [8, 0], sizes = [8, 120], strides = [1, 1]} : vector<24x120xf32> to vector<8x120xf32>
    %c1_29 = arith.constant 1 : index
    %c0_30 = arith.constant 0 : index
    %c0_31 = arith.constant 0 : index
    %48 = vector.load %arg5[%c1_29, %c0_30, %c0_31] : memref<3x120x960xf32, #tpu.memory_space<vmem>>, vector<1x120x960xf32>
    %49 = vector.shape_cast %48 : vector<1x120x960xf32> to vector<120x960xf32>
    %cst_32 = arith.constant dense<0.000000e+00> : vector<8x960xf32>
    %50 = tpu.matmul %47, %49, %cst_32 {dimension_numbers = #tpu.dot_dimension_numbers<[1], [0], [0], [1], [0, 0, 1, 1], [], []>} : vector<8x120xf32>, vector<120x960xf32>, vector<8x960xf32> -> vector<8x960xf32>
    %51 = arith.addf %46, %50 : vector<8x960xf32>
    %52 = vector.extract_strided_slice %42 {offsets = [16, 0], sizes = [8, 120], strides = [1, 1]} : vector<24x120xf32> to vector<8x120xf32>
    %c2_33 = arith.constant 2 : index
    %c0_34 = arith.constant 0 : index
    %c0_35 = arith.constant 0 : index
    %53 = vector.load %arg5[%c2_33, %c0_34, %c0_35] : memref<3x120x960xf32, #tpu.memory_space<vmem>>, vector<1x120x960xf32>
    %54 = vector.shape_cast %53 : vector<1x120x960xf32> to vector<120x960xf32>
    %cst_36 = arith.constant dense<0.000000e+00> : vector<8x960xf32>
    %55 = tpu.matmul %52, %54, %cst_36 {dimension_numbers = #tpu.dot_dimension_numbers<[1], [0], [0], [1], [0, 0, 1, 1], [], []>} : vector<8x120xf32>, vector<120x960xf32>, vector<8x960xf32> -> vector<8x960xf32>
    %56 = arith.addf %51, %55 : vector<8x960xf32>
    %c0_37 = arith.constant 0 : index
    %c0_38 = arith.constant 0 : index
    %57 = vector.load %arg6[%c0_37, %c0_38] : memref<1x960xf32, #tpu.memory_space<vmem>>, vector<1x960xf32>
    %58 = vector.broadcast %57 : vector<1x960xf32> to vector<8x960xf32>
    %59 = arith.mulf %56, %58 : vector<8x960xf32>
    %c0_39 = arith.constant 0 : index
    %c0_40 = arith.constant 0 : index
    %60 = vector.load %arg7[%c0_39, %c0_40] : memref<1x960xf32, #tpu.memory_space<vmem>>, vector<1x960xf32>
    %61 = vector.broadcast %60 : vector<1x960xf32> to vector<8x960xf32>
    %62 = arith.addf %59, %61 : vector<8x960xf32>
    %cst_41 = arith.constant 0.000000e+00 : f32
    %63 = vector.broadcast %cst_41 : f32 to vector<8x960xf32>
    %64 = arith.maximumf %62, %63 : vector<8x960xf32>
    %65 = vector.extract_strided_slice %64 {offsets = [0, 0], sizes = [8, 64], strides = [1, 1]} : vector<8x960xf32> to vector<8x64xf32>
    %66 = vector.extract_strided_slice %64 {offsets = [0, 64], sizes = [8, 64], strides = [1, 1]} : vector<8x960xf32> to vector<8x64xf32>
    %67 = arith.maximumf %65, %66 : vector<8x64xf32>
    %68 = vector.extract_strided_slice %64 {offsets = [0, 128], sizes = [8, 64], strides = [1, 1]} : vector<8x960xf32> to vector<8x64xf32>
    %69 = arith.maximumf %67, %68 : vector<8x64xf32>
    %70 = vector.extract_strided_slice %64 {offsets = [0, 192], sizes = [8, 64], strides = [1, 1]} : vector<8x960xf32> to vector<8x64xf32>
    %71 = arith.maximumf %69, %70 : vector<8x64xf32>
    %72 = vector.extract_strided_slice %64 {offsets = [0, 256], sizes = [8, 64], strides = [1, 1]} : vector<8x960xf32> to vector<8x64xf32>
    %73 = arith.maximumf %71, %72 : vector<8x64xf32>
    %74 = vector.extract_strided_slice %64 {offsets = [0, 320], sizes = [8, 64], strides = [1, 1]} : vector<8x960xf32> to vector<8x64xf32>
    %75 = arith.maximumf %73, %74 : vector<8x64xf32>
    %76 = vector.extract_strided_slice %64 {offsets = [0, 384], sizes = [8, 64], strides = [1, 1]} : vector<8x960xf32> to vector<8x64xf32>
    %77 = arith.maximumf %75, %76 : vector<8x64xf32>
    %78 = vector.extract_strided_slice %64 {offsets = [0, 448], sizes = [8, 64], strides = [1, 1]} : vector<8x960xf32> to vector<8x64xf32>
    %79 = arith.maximumf %77, %78 : vector<8x64xf32>
    %80 = vector.extract_strided_slice %64 {offsets = [0, 512], sizes = [8, 64], strides = [1, 1]} : vector<8x960xf32> to vector<8x64xf32>
    %81 = arith.maximumf %79, %80 : vector<8x64xf32>
    %82 = vector.extract_strided_slice %64 {offsets = [0, 576], sizes = [8, 64], strides = [1, 1]} : vector<8x960xf32> to vector<8x64xf32>
    %83 = arith.maximumf %81, %82 : vector<8x64xf32>
    %84 = vector.extract_strided_slice %64 {offsets = [0, 640], sizes = [8, 64], strides = [1, 1]} : vector<8x960xf32> to vector<8x64xf32>
    %85 = arith.maximumf %83, %84 : vector<8x64xf32>
    %86 = vector.extract_strided_slice %64 {offsets = [0, 704], sizes = [8, 64], strides = [1, 1]} : vector<8x960xf32> to vector<8x64xf32>
    %87 = arith.maximumf %85, %86 : vector<8x64xf32>
    %88 = vector.extract_strided_slice %64 {offsets = [0, 768], sizes = [8, 64], strides = [1, 1]} : vector<8x960xf32> to vector<8x64xf32>
    %89 = arith.maximumf %87, %88 : vector<8x64xf32>
    %90 = vector.extract_strided_slice %64 {offsets = [0, 832], sizes = [8, 64], strides = [1, 1]} : vector<8x960xf32> to vector<8x64xf32>
    %91 = arith.maximumf %89, %90 : vector<8x64xf32>
    %92 = vector.extract_strided_slice %64 {offsets = [0, 896], sizes = [8, 64], strides = [1, 1]} : vector<8x960xf32> to vector<8x64xf32>
    %93 = arith.maximumf %91, %92 : vector<8x64xf32>
    %c0_42 = arith.constant 0 : index
    %c0_43 = arith.constant 0 : index
    %94 = vector.load %arg8[%c0_42, %c0_43] : memref<64x32xf32, #tpu.memory_space<vmem>>, vector<64x32xf32>
    %cst_44 = arith.constant dense<0.000000e+00> : vector<8x32xf32>
    %95 = tpu.matmul %93, %94, %cst_44 {dimension_numbers = #tpu.dot_dimension_numbers<[1], [0], [0], [1], [0, 0, 1, 1], [], []>} : vector<8x64xf32>, vector<64x32xf32>, vector<8x32xf32> -> vector<8x32xf32>
    %c0_45 = arith.constant 0 : index
    %c0_46 = arith.constant 0 : index
    %96 = vector.load %arg9[%c0_45, %c0_46] : memref<1x32xf32, #tpu.memory_space<vmem>>, vector<1x32xf32>
    %97 = vector.broadcast %96 : vector<1x32xf32> to vector<8x32xf32>
    %98 = arith.addf %95, %97 : vector<8x32xf32>
    %cst_47 = arith.constant 0.000000e+00 : f32
    %99 = vector.broadcast %cst_47 : f32 to vector<8x32xf32>
    %100 = arith.maximumf %98, %99 : vector<8x32xf32>
    %c0_48 = arith.constant 0 : index
    %c0_49 = arith.constant 0 : index
    %101 = vector.load %arg10[%c0_48, %c0_49] : memref<32x128xf32, #tpu.memory_space<vmem>>, vector<32x128xf32>
    %cst_50 = arith.constant dense<0.000000e+00> : vector<8x128xf32>
    %102 = tpu.matmul %100, %101, %cst_50 {dimension_numbers = #tpu.dot_dimension_numbers<[1], [0], [0], [1], [0, 0, 1, 1], [], []>} : vector<8x32xf32>, vector<32x128xf32>, vector<8x128xf32> -> vector<8x128xf32>
    %c0_51 = arith.constant 0 : index
    %c0_52 = arith.constant 0 : index
    %103 = vector.load %arg11[%c0_51, %c0_52] : memref<1x128xf32, #tpu.memory_space<vmem>>, vector<1x128xf32>
    %104 = vector.broadcast %103 : vector<1x128xf32> to vector<8x128xf32>
    %105 = arith.addf %102, %104 : vector<8x128xf32>
    %cst_53 = arith.constant 0.000000e+00 : f32
    %106 = vector.broadcast %cst_53 : f32 to vector<8x128xf32>
    %107 = arith.maximumf %105, %106 : vector<8x128xf32>
    %c0_54 = arith.constant 0 : index
    %c0_55 = arith.constant 0 : index
    %108 = vector.load %arg12[%c0_54, %c0_55] : memref<8x128xf32, #tpu.memory_space<vmem>>, vector<8x128xf32>
    tpu.vector_store %arg12[%c0_54, %c0_55], %107 {strides = array<i32>} : memref<8x128xf32, #tpu.memory_space<vmem>>, vector<8x128xf32>,
    return
  }
  func.func @transform_0(%arg0: i32) -> (i32, i32, i32, i32) {
    %c0_i32 = arith.constant 0 : i32
    %c0_i32_0 = arith.constant 0 : i32
    %c0_i32_1 = arith.constant 0 : i32
    %c0_i32_2 = arith.constant 0 : i32
    return %c0_i32, %arg0, %c0_i32_0, %c0_i32_1 : i32, i32, i32, i32
  }
  func.func @transform_1(%arg0: i32) -> (i32, i32, i32) {
    %c0_i32 = arith.constant 0 : i32
    %c0_i32_0 = arith.constant 0 : i32
    %c0_i32_1 = arith.constant 0 : i32
    %c0_i32_2 = arith.constant 0 : i32
    return %c0_i32, %c0_i32_0, %c0_i32_1 : i32, i32, i32
  }
  func.func @transform_2(%arg0: i32) -> (i32, i32) {
    %c0_i32 = arith.constant 0 : i32
    %c0_i32_0 = arith.constant 0 : i32
    %c0_i32_1 = arith.constant 0 : i32
    return %c0_i32, %c0_i32_0 : i32, i32
  }
  func.func @transform_3(%arg0: i32) -> (i32, i32) {
    %c0_i32 = arith.constant 0 : i32
    %c0_i32_0 = arith.constant 0 : i32
    %c0_i32_1 = arith.constant 0 : i32
    return %c0_i32, %c0_i32_0 : i32, i32
  }
  func.func @transform_4(%arg0: i32) -> (i32, i32, i32) {
    %c0_i32 = arith.constant 0 : i32
    %c0_i32_0 = arith.constant 0 : i32
    %c0_i32_1 = arith.constant 0 : i32
    %c0_i32_2 = arith.constant 0 : i32
    return %c0_i32, %c0_i32_0, %c0_i32_1 : i32, i32, i32
  }
  func.func @transform_5(%arg0: i32) -> (i32, i32) {
    %c0_i32 = arith.constant 0 : i32
    %c0_i32_0 = arith.constant 0 : i32
    %c0_i32_1 = arith.constant 0 : i32
    return %c0_i32, %c0_i32_0 : i32, i32
  }
  func.func @transform_6(%arg0: i32) -> (i32, i32) {
    %c0_i32 = arith.constant 0 : i32
    %c0_i32_0 = arith.constant 0 : i32
    %c0_i32_1 = arith.constant 0 : i32
    return %c0_i32, %c0_i32_0 : i32, i32
  }
  func.func @transform_7(%arg0: i32) -> (i32, i32) {
    %c0_i32 = arith.constant 0 : i32
    %c0_i32_0 = arith.constant 0 : i32
    %c0_i32_1 = arith.constant 0 : i32
    return %c0_i32, %c0_i32_0 : i32, i32
  }
  func.func @transform_8(%arg0: i32) -> (i32, i32) {
    %c0_i32 = arith.constant 0 : i32
    %c0_i32_0 = arith.constant 0 : i32
    %c0_i32_1 = arith.constant 0 : i32
    return %c0_i32, %c0_i32_0 : i32, i32
  }
  func.func @transform_9(%arg0: i32) -> (i32, i32) {
    %c0_i32 = arith.constant 0 : i32
    %c0_i32_0 = arith.constant 0 : i32
    %c0_i32_1 = arith.constant 0 : i32
    return %c0_i32, %c0_i32_0 : i32, i32
  }
  func.func @transform_10(%arg0: i32) -> (i32, i32) {
    %c0_i32 = arith.constant 0 : i32
    %c0_i32_0 = arith.constant 0 : i32
    %c0_i32_1 = arith.constant 0 : i32
    return %c0_i32, %c0_i32_0 : i32, i32
  }
  func.func @transform_11(%arg0: i32) -> (i32, i32) {
    %c0_i32 = arith.constant 0 : i32
    %c0_i32_0 = arith.constant 0 : i32
    return %arg0, %c0_i32 : i32, i32
  }
}

</mosaic_0001>

<bundles_post_ra>
// kernel: tile.23
= control target key start
LH: loop header
LB: loop body
LE: loop exit
PB: predicated region body
PF: predicated region fallthrough
CT: control target
= control target key end

     0   :  { %s40_s0 = inlined_call_operand.vmem [shape: f32[24], index: 0, kind: input, shape index: {}]   ;;  %s41_s1 = inlined_call_operand.vmem [shape: f32[25,24], index: 1, kind: output, shape index: {}]  }
   0x1   :  { %v4_v0 = vld [vmem:[%s40_s0] ss:$0 sm:$0xff] }
   0x2   :  { %5 = vst [vmem:[%s41_s1] sm:$0xff] %v4_v0 }
   0x3   :  { %12 = vst [vmem:[%s41_s1 + $0x8] sm:$0xff] %v4_v0 }
   0x4   :  { %13 = vst [vmem:[%s41_s1 + $0x10] sm:$0xff] %v4_v0 }
   0x5   :  { %14 = vst [vmem:[%s41_s1 + $0x18] sm:$0xff] %v4_v0 }

// kernel: tile.24
= control target key start
LH: loop header
LB: loop body
LE: loop exit
PB: predicated region body
PF: predicated region fallthrough
CT: control target
= control target key end

     0   :  { %s7_s8 = smov 3  ;;  %vm12_vm0 = vcmask 64512   ;;  %s195_s9 = smov 104   ;;  %vm16_vm1 = vcmask 130048   ;;  %vm4_vm2 = vcmask 195584   ;;  %vm19_vm3 = vcmask 1048512   ;;  %s293_s0 = inlined_call_operand.vmem [shape: f32[25,24], index: 0, kind: input, shape index: {}]   ;;  %s294_s1 = inlined_call_operand.vmem [shape: f32[1,600], index: 1, kind: output, shape index: {}]  }
   0x1   :  { %v163_v0 = vld [vmem:[%s293_s0 + $0xf] sm:$0x1]   ;;  %v159_v1 = vld [vmem:[%s293_s0 + $0x15] ss:$-16 sm:%s7_s8]   ;;  %s10_s12 = smov 3  ;;  %s43_s15 = smov 3 }
   0x2   :  { %37 = vrot.lane.b32.xlu1 %v163_v0, %s195_s9  ;;  %v160_v2 = vld [vmem:[%s293_s0 + $0x5] ss:$16 sm:%s10_s12]   ;;  %v165_v4 = vld [vmem:[%s293_s0 + $0x9] sm:$0x1]   ;;  %s196_s18 = smov 120   ;;  %s197_s25 = smov 88  }
   0x3   :  { %v13_v3 = vsel %vm12_vm0, %v160_v2, %v159_v1  ;;  %v161_v5 = vld [vmem:[%s293_s0 + $0xa] sm:$0x1]   ;;  %v164_v6 = vld [vmem:[%s293_s0 + $0x4] ss:$16 sm:%s43_s15]   ;;  %51 = vrot.lane.b32.xlu2 %v165_v4, %s197_s25  ;;  %s198_s26 = smov 96   ;;  %s71_s27 = smov 3 }
   0x4   :  { %14 = vrot.lane.b32.xlu0 %v13_v3, %s196_s18  ;;  %v162_v7 = vld [vmem:[%s293_s0 + $0xa] sm:$0x1]   ;;  %v166_v9 = vld [vmem:[%s293_s0 + $0xe] sm:$0x1]   ;;  %s199_s30 = smov 112   ;;  %s64_s4 = smov 3 }
   0x5   :  { %v26_v8 = vsel %vm16_vm1, %v162_v7, %v161_v5  ;;  %v168_v10 = vld [vmem:[%s293_s0 + $0x18] ss:$-16 sm:%s71_s27]   ;;  %s200_s5 = smov 80   ;;  %s201_s6 = smov 64   ;;  %v167_v11 = vld [vmem:[%s293_s0 + $0x3] ss:$16 sm:%s64_s4]  }
   0x6   :  { %s93_s9 = smov 3  ;;  %v169_v12 = vld [vmem:[%s293_s0 + $0xd] sm:$0x1]   ;;  %s202_s12 = smov 72   ;;  %v172_v15 = vld [vmem:[%s293_s0 + $0xc] sm:$0x1]  }
   0x7   :  { %v171_v13 = vld [vmem:[%s293_s0 + $0x17] ss:$-16 sm:%s93_s9]   ;;  %s86_s15 = smov 3  ;;  %s203_s16 = smov 56   ;;  %v175_v18 = vld [vmem:[%s293_s0 + $0xb] sm:$0x1]  }
   0x8   :  { %s204_s17 = smov 40   ;;  %v170_v14 = vld [vmem:[%s293_s0 + $0x2] ss:$16 sm:%s86_s15]   ;;  %s115_s20 = smov 3  ;;  %vm47_vm4 = vcmask 982784   ;;  %vm32_vm5 = vcmask 1048448  }
   0x9   :  { %s205_s23 = smov 48   ;;  %v174_v16 = vld [vmem:[%s293_s0 + $0x16] ss:$-16 sm:%s115_s20]   ;;  %s206_s27 = smov 32   ;;  %vm39_vm6 = vcmask 1048384   ;;  %vm53_vm7 = vcmask 917184  }
   0xa   :  { %45 = vrot.lane.b32.xlu1 %v164_v6, %s198_s26  ;;  %s108_s26 = smov 3  ;;  %s207_s28 = smov 16   ;;  %vm60_vm8 = vcmask 851584   ;;  %vm82_vm9 = vcmask 654784   ;;  %vm75_vm10 = vcmask 720384   ;;  %vm104_vm11 = vcmask 457984  }
   0xb   :  { %58 = vrot.lane.b32.xlu2 %v166_v9, %s200_s5  ;;  %v173_v17 = vld [vmem:[%s293_s0 + $0x1] ss:$16 sm:%s108_s26]   ;;  %s208_s4 = smov 24   ;;  %s209_s5 = smov 8   ;;  %vm68_vm12 = vcmask 785984   ;;  %vm126_vm13 = vcmask 261184  }
   0xc   :  { %27 = vrot.lane.b32.xlu0 %v26_v8, %s199_s30  ;;  %vm97_vm14 = vcmask 523584   ;;  %vm90_vm15 = vcmask 589184  }
  0x12   :  { %73 = vrot.lane.b32.xlu1 %v168_v10, %s201_s6  ;;  %s2_s6 = smov 3 }
  0x13   :  { %80 = vrot.lane.b32.xlu2 %v169_v12, %s203_s16  ;;  %v3_v19 = vld [vmem:[%s293_s0] ss:$16 sm:%s2_s6]  }
  0x14   :  { %66 = vrot.lane.b32.xlu0 %v167_v11, %s202_s12  ;;  %5 = vst.msk [vmem:[#allocation0] ss:$24 sm:$0x3] %vm4_vm2, %v3_v19  }
  0x1a   :  { %95 = vrot.lane.b32.xlu1 %v171_v13, %s204_s17 }
  0x1b   :  { %102 = vrot.lane.b32.xlu2 %v172_v15, %s206_s27 }
  0x1c   :  { %88 = vrot.lane.b32.xlu0 %v170_v14, %s205_s23 }
  0x22   :  { %117 = vrot.lane.b32.xlu1 %v174_v16, %s207_s28 }
  0x23   :  { %124 = vrot.lane.b32.xlu2 %v175_v18, %s209_s5 }
  0x24   :  { %110 = vrot.lane.b32.xlu0 %v173_v17, %s208_s4 }
  0x5d   :  { %v52_v20 = vpop.permute.xlu2 %51  }
  0x65   :  { %v59_v21 = vpop.permute.xlu2 %58  }
  0x6d   :  { %v81_v22 = vpop.permute.xlu2 %80  }
  0x74   :  { %v38_v23 = vpop.permute.xlu1 %37  }
  0x75   :  { %v103_v25 = vpop.permute.xlu2 %102  }
  0x76   :  { %v15_v24 = vpop.permute.xlu0 %14  }
  0x77   :  { %18 = vst.msk [vmem:[#allocation0 + $0x20] ss:$-24 sm:$0x3] %vm16_vm1, %v15_v24   ;;  %vm112_vm1 = vcmask 392384  }
  0x78   :  { %20 = vst.msk [vmem:[#allocation0] ss:$24 sm:$0x3] %vm19_vm3, %v15_v24  }
  0x7c   :  { %v46_v26 = vpop.permute.xlu1 %45  }
  0x7d   :  { %48 = vst.msk [vmem:[#allocation0] ss:$24 sm:$0x3] %vm47_vm4, %v46_v26   ;;  %v125_v28 = vpop.permute.xlu2 %124  }
  0x7e   :  { %v28_v27 = vpop.permute.xlu0 %27  }
  0x7f   :  { %31 = vst.msk [vmem:[#allocation0 + $0x10] sm:$0x1] %vm12_vm0, %v28_v27   ;;  %vm119_vm0 = vcmask 326784  }
  0x80   :  { %34 = vst.msk [vmem:[#allocation0 + $0x8] sm:$0x1] %vm32_vm5, %v28_v27  }
  0x81   :  { %41 = vst.msk [vmem:[#allocation0 + $0x10] sm:$0x1] %vm39_vm6, %v38_v23  }
  0x82   :  { %55 = vst.msk [vmem:[#allocation0 + $0x8] sm:$0x1] %vm53_vm7, %v52_v20  }
  0x83   :  { %62 = vst.msk [vmem:[#allocation0 + $0x10] sm:$0x1] %vm60_vm8, %v59_v21  }
  0x84   :  { %v74_v29 = vpop.permute.xlu1 %73   ;;  %84 = vst.msk [vmem:[#allocation0 + $0x10] sm:$0x1] %vm82_vm9, %v81_v22  }
  0x85   :  { %77 = vst.msk [vmem:[#allocation0 + $0x20] ss:$-24 sm:$0x3] %vm75_vm10, %v74_v29  }
  0x86   :  { %v67_v30 = vpop.permute.xlu0 %66   ;;  %106 = vst.msk [vmem:[#allocation0 + $0x10] sm:$0x1] %vm104_vm11, %v103_v25  }
  0x87   :  { %69 = vst.msk [vmem:[#allocation0] ss:$24 sm:$0x3] %vm68_vm12, %v67_v30  }
  0x88   :  { %128 = vst.msk [vmem:[#allocation0 + $0x10] sm:$0x1] %vm126_vm13, %v125_v28  }
  0x8c   :  { %v96_v31 = vpop.permute.xlu1 %95  }
  0x8d   :  { %99 = vst.msk [vmem:[#allocation0 + $0x20] ss:$-24 sm:$0x3] %vm97_vm14, %v96_v31  }
  0x8e   :  { %v89_v32 = vpop.permute.xlu0 %88  }
  0x8f   :  { %91 = vst.msk [vmem:[#allocation0] ss:$24 sm:$0x3] %vm90_vm15, %v89_v32   ;;  %v142_v33 = vld [vmem:[#allocation0 + $0x10] sm:$0x1] }
  0x90   :  { %177 = vst [vmem:[%s294_s1 + $0x2] sm:$0x1] %v142_v33 }
  0x94   :  { %v118_v34 = vpop.permute.xlu1 %117  }
  0x95   :  { %121 = vst.msk [vmem:[#allocation0 + $0x20] ss:$-24 sm:$0x3] %vm119_vm0, %v118_v34  }
  0x96   :  { %v111_v35 = vpop.permute.xlu0 %110  }
  0x97   :  { %113 = vst.msk [vmem:[#allocation0] ss:$24 sm:$0x3] %vm112_vm1, %v111_v35  }
  0x9c   :  { %v136_v36 = vld [vmem:[#allocation0 + $0x8] sm:$0x1]  ;;  %v154_v37 = vld [vmem:[#allocation0 + $0x20] sm:$0x1] }
  0x9d   :  { %176 = vst [vmem:[%s294_s1 + $0x1] sm:$0x1] %v136_v36 }
  0x9e   :  { %179 = vst [vmem:[%s294_s1 + $0x4] sm:$0x1] %v154_v37  ;;  %v131_v38 = vld [vmem:[#allocation0] sm:$0x1]  ;;  %v148_v39 = vld [vmem:[#allocation0 + $0x18] sm:$0x1] }
  0x9f   :  { %134 = vst [vmem:[%s294_s1] sm:$0x1] %v131_v38 }
  0xa0   :  { %178 = vst [vmem:[%s294_s1 + $0x3] sm:$0x1] %v148_v39 }

// kernel: tile.33
= control target key start
LH: loop header
LB: loop body
LE: loop exit
PB: predicated region body
PF: predicated region fallthrough
CT: control target
= control target key end

     0   :  { %s28_s0 = inlined_call_operand.vmem [shape: f32[64], index: 0, kind: input, shape index: {}]   ;;  %s29_s1 = inlined_call_operand.vmem [shape: f32[15,64], index: 1, kind: output, shape index: {}]  }
   0x1   :  { %v4_v0 = vld [vmem:[%s28_s0] ss:$0 sm:$0xff] }
   0x2   :  { %5 = vst [vmem:[%s29_s1] sm:$0xff] %v4_v0 }
   0x3   :  { %8 = vst [vmem:[%s29_s1 + $0x8] sm:$0xff] %v4_v0 }

// kernel: tile.34
= control target key start
LH: loop header
LB: loop body
LE: loop exit
PB: predicated region body
PF: predicated region fallthrough
CT: control target
= control target key end

     0   :  { %vm3_vm0 = vcmask 523264   ;;  %vm10_vm1 = vcmask 1048064   ;;  %s111_s0 = inlined_call_operand.vmem [shape: f32[15,64], index: 0, kind: input, shape index: {}]   ;;  %s112_s1 = inlined_call_operand.vmem [shape: f32[1,960], index: 1, kind: output, shape index: {}]  }
   0x1   :  { %v61_v0 = vld [vmem:[%s111_s0 + $0x1] ss:$2 sm:$0x7f]   ;;  %v2_v1 = vld [vmem:[%s111_s0] ss:$2 sm:$0xff]   ;;  %s70_s0 = smov 64  }
   0x2   :  { %8 = vrot.lane.b32.xlu0 %v61_v0, %s70_s0  ;;  %4 = vst.msk [vmem:[#allocation0] ss:$8 sm:$0xf] %vm3_vm0, %v2_v1  }
   0x3   :  { %5 = vst.msk [vmem:[#allocation0] ss:$8 sm:$0xf0] %vm3_vm0, %v2_v1  }
   0xa   :  { %v56_v2 = vld [vmem:[#allocation0 + $0x38] sm:$0x1] }
   0xb   :  { %68 = vst [vmem:[%s112_s1 + $0x7] sm:$0x1] %v56_v2 }
  0x74   :  { %v9_v3 = vpop.permute.xlu0 %8  }
  0x75   :  { %11 = vst.msk [vmem:[#allocation0] ss:$8 sm:$0xf] %vm10_vm1, %v9_v3  }
  0x76   :  { %12 = vst.msk [vmem:[#allocation0] ss:$8 sm:$0x70] %vm10_vm1, %v9_v3  }
  0x7c   :  { %v15_v4 = vld [vmem:[#allocation0] sm:$0x1]  ;;  %v20_v5 = vld [vmem:[#allocation0 + $0x8] sm:$0x1]  ;;  %v26_v6 = vld [vmem:[#allocation0 + $0x10] sm:$0x1] }
  0x7d   :  { %18 = vst [vmem:[%s112_s1] sm:$0x1] %v15_v4  ;;  %v32_v7 = vld [vmem:[#allocation0 + $0x18] sm:$0x1]  ;;  %v38_v8 = vld [vmem:[#allocation0 + $0x20] sm:$0x1] }
  0x7e   :  { %62 = vst [vmem:[%s112_s1 + $0x1] sm:$0x1] %v20_v5  ;;  %v44_v9 = vld [vmem:[#allocation0 + $0x28] sm:$0x1]  ;;  %v50_v10 = vld [vmem:[#allocation0 + $0x30] sm:$0x1] }
  0x7f   :  { %63 = vst [vmem:[%s112_s1 + $0x2] sm:$0x1] %v26_v6 }
  0x80   :  { %64 = vst [vmem:[%s112_s1 + $0x3] sm:$0x1] %v32_v7 }
  0x81   :  { %65 = vst [vmem:[%s112_s1 + $0x4] sm:$0x1] %v38_v8 }
  0x82   :  { %66 = vst [vmem:[%s112_s1 + $0x5] sm:$0x1] %v44_v9 }
  0x83   :  { %67 = vst [vmem:[%s112_s1 + $0x6] sm:$0x1] %v50_v10 }

// kernel: simple_dnn_forward.1
= control target key start
LH: loop header
LB: loop body
LE: loop exit
PB: predicated region body
PF: predicated region fallthrough
CT: control target
= control target key end

     0   :  { %s4279_s17 = smov 0   ;;  %s4281_s18 = smov 0   ;;  %s7583_s0 = inlined_call_operand.vmem [shape: f32[3,2,120,81], index: 0, kind: input, shape index: {}]   ;;  %s7584_s1 = inlined_call_operand.vmem [shape: f32[3,81,600], index: 1, kind: input, shape index: {}]   ;;  %s7585_s2 = inlined_call_operand.vmem [shape: f32[1,600], index: 2, kind: input, shape index: {}]   ;;  %s7586_s3 = inlined_call_operand.vmem [shape: f32[1,600], index: 3, kind: input, shape index: {}]   ;;  %s7587_s4 = inlined_call_operand.vmem [shape: f32[3,120,960], index: 4, kind: input, shape index: {}]   ;;  %s7588_s5 = inlined_call_operand.vmem [shape: f32[1,960], index: 5, kind: input, shape index: {}]   ;;  %s7589_s6 = inlined_call_operand.vmem [shape: f32[1,960], index: 6, kind: input, shape index: {}]   ;;  %s7590_s7 = inlined_call_operand.vmem [shape: f32[64,32], index: 7, kind: input, shape index: {}]   ;;  %s7591_s8 = inlined_call_operand.vmem [shape: f32[1,32], index: 8, kind: input, shape index: {}]   ;;  %s7592_s9 = inlined_call_operand.vmem [shape: f32[32,128], index: 9, kind: input, shape index: {}]   ;;  %s7593_s10 = inlined_call_operand.vmem [shape: f32[1,128], index: 10, kind: input, shape index: {}]   ;;  %s7594_s11 = inlined_call_operand.vmem [shape: f32[16,128], index: 11, kind: output, shape index: {}]  }
   0x1   :  { %s4283_s19 = smov 0  }
   0x2 LB: > { %s3501_s20 = sadd.s32 4294967295, %s4212_s19   ;;  %s4296_s21 = sadd.s32 1, %s4212_s19   ;;  %s4212_s19 = sphi %s4283_s19, %s7781_s19   ;;  %s4208_s18 = sphi %s4281_s18, %s7780_s18   ;;  %s4204_s17 = sphi %s4279_s17, %s7779_s17  }
   0x3   : > { %s25_s22 = ssub.s32 %s4212_s19, %s4296_s21  ;;  %s28_s23 = sadd.s32 1, %s4208_s18 }
   0x4   : > { %p26_p0 = scmp.eq.s32.totalorder %s25_s22, 0  ;;  %p35_p1 = scmp.ne.s32.totalorder %s4208_s18, %s4204_s17 }
   0x5   : > { %p36_p2 = scmp.eq.s32.totalorder %s4212_s19, 0  ;;  %p3504_p4 = scmp.ge.s32.totalorder %s4212_s19, 2 }
   0x6   : > { %s4305_s24 = scalar_select %p26_p0, %s4208_s18, %s28_s23  }
   0x7   : > { %p37_p3 = por %p36_p2, %p35_p1  ;;  %327 = sbr.rel (%p3504_p4) target bundleno = 62 (0x3e), region = 56 }
   0xc   : > { %330 = sbr.rel (!%p37_p3) target bundleno = 62 (0x3e), region = 60  ;;  %s332_s25 = sand.u32 (%p37_p3), 1, %s4208_s18  }
   0xd   : > { %s4157_s26 = smul.u32 (%p37_p3), 120, %s4212_s19 }
   0xe   : > { %s4156_s27 = smul.u32 (%p37_p3), 360, %s332_s25 }
   0xf   : > { %s4313_s30 = scalar_lea.vmem (%p37_p3), %s7583_s0, %s4157_s26 }
  0x10   : > { %v454_v0 = vld [vmem:[%s4313_s30] sm:$0xff] (%p37_p3)  ;;  %v456_v1 = vld [vmem:[%s4313_s30 + $0x8] sm:$0xff] (%p37_p3)  ;;  %v458_v2 = vld [vmem:[%s4313_s30 + $0x10] sm:$0xff] (%p37_p3)  ;;  %s4318_s12 = scalar_lea.vmem (%p37_p3), [#allocation2], %s4156_s27 }
  0x11   : > { %455 = vst [vmem:[%s4318_s12] sm:$0xff] %v454_v0  ;;  %v460_v3 = vld [vmem:[%s4313_s30 + $0x18] sm:$0xff]  ;;  %v462_v4 = vld [vmem:[%s4313_s30 + $0x20] sm:$0xff]  ;;  %v464_v5 = vld [vmem:[%s4313_s30 + $0x28] sm:$0xff] }
  0x12   : > { %457 = vst [vmem:[%s4318_s12 + $0x8] sm:$0xff] %v456_v1  ;;  %v466_v6 = vld [vmem:[%s4313_s30 + $0x30] sm:$0xff]  ;;  %v468_v7 = vld [vmem:[%s4313_s30 + $0x38] sm:$0xff]  ;;  %v470_v8 = vld [vmem:[%s4313_s30 + $0x40] sm:$0xff] }
  0x13   : > { %459 = vst [vmem:[%s4318_s12 + $0x10] sm:$0xff] %v458_v2  ;;  %v472_v9 = vld [vmem:[%s4313_s30 + $0x48] sm:$0xff]  ;;  %v474_v10 = vld [vmem:[%s4313_s30 + $0x50] sm:$0xff]  ;;  %v476_v11 = vld [vmem:[%s4313_s30 + $0x58] sm:$0xff] }
  0x14   : > { %461 = vst [vmem:[%s4318_s12 + $0x18] sm:$0xff] %v460_v3  ;;  %v478_v12 = vld [vmem:[%s4313_s30 + $0x60] sm:$0xff]  ;;  %v480_v13 = vld [vmem:[%s4313_s30 + $0x68] sm:$0xff]  ;;  %v482_v14 = vld [vmem:[%s4313_s30 + $0x70] sm:$0xff] }
  0x15   : > { %463 = vst [vmem:[%s4318_s12 + $0x20] sm:$0xff] %v462_v4  ;;  %v484_v15 = vld [vmem:[%s4313_s30 + $0xf0] sm:$0xff]  ;;  %v486_v16 = vld [vmem:[%s4313_s30 + $0xf8] sm:$0xff]  ;;  %v488_v17 = vld [vmem:[%s4313_s30 + $0x100] sm:$0xff] }
  0x16   : > { %465 = vst [vmem:[%s4318_s12 + $0x28] sm:$0xff] %v464_v5  ;;  %v490_v18 = vld [vmem:[%s4313_s30 + $0x108] sm:$0xff]  ;;  %v492_v19 = vld [vmem:[%s4313_s30 + $0x110] sm:$0xff]  ;;  %v494_v20 = vld [vmem:[%s4313_s30 + $0x118] sm:$0xff] }
  0x17   : > { %467 = vst [vmem:[%s4318_s12 + $0x30] sm:$0xff] %v466_v6  ;;  %v496_v21 = vld [vmem:[%s4313_s30 + $0x120] sm:$0xff]  ;;  %v498_v22 = vld [vmem:[%s4313_s30 + $0x128] sm:$0xff]  ;;  %v500_v23 = vld [vmem:[%s4313_s30 + $0x130] sm:$0xff] }
  0x18   : > { %469 = vst [vmem:[%s4318_s12 + $0x38] sm:$0xff] %v468_v7  ;;  %v502_v24 = vld [vmem:[%s4313_s30 + $0x138] sm:$0xff]  ;;  %v504_v25 = vld [vmem:[%s4313_s30 + $0x140] sm:$0xff]  ;;  %v506_v26 = vld [vmem:[%s4313_s30 + $0x148] sm:$0xff] }
  0x19   : > { %471 = vst [vmem:[%s4318_s12 + $0x40] sm:$0xff] %v470_v8  ;;  %v508_v27 = vld [vmem:[%s4313_s30 + $0x150] sm:$0xff]  ;;  %v510_v28 = vld [vmem:[%s4313_s30 + $0x158] sm:$0xff]  ;;  %v512_v29 = vld [vmem:[%s4313_s30 + $0x160] sm:$0xff] }
  0x1a   : > { %473 = vst [vmem:[%s4318_s12 + $0x48] sm:$0xff] %v472_v9  ;;  %v514_v30 = vld [vmem:[%s4313_s30 + $0x1e0] sm:$0xff]  ;;  %v516_v31 = vld [vmem:[%s4313_s30 + $0x1e8] sm:$0xff]  ;;  %v518_v32 = vld [vmem:[%s4313_s30 + $0x1f0] sm:$0xff] }
  0x1b   : > { %475 = vst [vmem:[%s4318_s12 + $0x50] sm:$0xff] %v474_v10  ;;  %v520_v33 = vld [vmem:[%s4313_s30 + $0x1f8] sm:$0xff]  ;;  %v522_v34 = vld [vmem:[%s4313_s30 + $0x200] sm:$0xff]  ;;  %v524_v35 = vld [vmem:[%s4313_s30 + $0x208] sm:$0xff] }
  0x1c   : > { %477 = vst [vmem:[%s4318_s12 + $0x58] sm:$0xff] %v476_v11  ;;  %v526_v36 = vld [vmem:[%s4313_s30 + $0x210] sm:$0xff]  ;;  %v528_v37 = vld [vmem:[%s4313_s30 + $0x218] sm:$0xff]  ;;  %v530_v38 = vld [vmem:[%s4313_s30 + $0x220] sm:$0xff] }
  0x1d   : > { %479 = vst [vmem:[%s4318_s12 + $0x60] sm:$0xff] %v478_v12  ;;  %v532_v39 = vld [vmem:[%s4313_s30 + $0x228] sm:$0xff]  ;;  %v534_v40 = vld [vmem:[%s4313_s30 + $0x230] sm:$0xff]  ;;  %v536_v41 = vld [vmem:[%s4313_s30 + $0x238] sm:$0xff] }
  0x1e   : > { %481 = vst [vmem:[%s4318_s12 + $0x68] sm:$0xff] %v480_v13  ;;  %v538_v42 = vld [vmem:[%s4313_s30 + $0x240] sm:$0xff]  ;;  %v540_v43 = vld [vmem:[%s4313_s30 + $0x248] sm:$0xff]  ;;  %v542_v44 = vld [vmem:[%s4313_s30 + $0x250] sm:$0xff] }
  0x1f   : > { %483 = vst [vmem:[%s4318_s12 + $0x70] sm:$0xff] %v482_v14 }
  0x20   : > { %485 = vst [vmem:[%s4318_s12 + $0x78] sm:$0xff] %v484_v15 }
  0x21   : > { %487 = vst [vmem:[%s4318_s12 + $0x80] sm:$0xff] %v486_v16 }
  0x22   : > { %489 = vst [vmem:[%s4318_s12 + $0x88] sm:$0xff] %v488_v17 }
  0x23   : > { %491 = vst [vmem:[%s4318_s12 + $0x90] sm:$0xff] %v490_v18 }
  0x24   : > { %493 = vst [vmem:[%s4318_s12 + $0x98] sm:$0xff] %v492_v19 }
  0x25   : > { %495 = vst [vmem:[%s4318_s12 + $0xa0] sm:$0xff] %v494_v20 }
  0x26   : > { %497 = vst [vmem:[%s4318_s12 + $0xa8] sm:$0xff] %v496_v21 }
  0x27   : > { %499 = vst [vmem:[%s4318_s12 + $0xb0] sm:$0xff] %v498_v22 }
  0x28   : > { %501 = vst [vmem:[%s4318_s12 + $0xb8] sm:$0xff] %v500_v23 }
  0x29   : > { %503 = vst [vmem:[%s4318_s12 + $0xc0] sm:$0xff] %v502_v24 }
  0x2a   : > { %505 = vst [vmem:[%s4318_s12 + $0xc8] sm:$0xff] %v504_v25 }
  0x2b   : > { %507 = vst [vmem:[%s4318_s12 + $0xd0] sm:$0xff] %v506_v26 }
  0x2c   : > { %509 = vst [vmem:[%s4318_s12 + $0xd8] sm:$0xff] %v508_v27 }
  0x2d   : > { %511 = vst [vmem:[%s4318_s12 + $0xe0] sm:$0xff] %v510_v28 }
  0x2e   : > { %513 = vst [vmem:[%s4318_s12 + $0xe8] sm:$0xff] %v512_v29 }
  0x2f   : > { %515 = vst [vmem:[%s4318_s12 + $0xf0] sm:$0xff] %v514_v30 }
  0x30   : > { %517 = vst [vmem:[%s4318_s12 + $0xf8] sm:$0xff] %v516_v31 }
  0x31   : > { %519 = vst [vmem:[%s4318_s12 + $0x100] sm:$0xff] %v518_v32 }
  0x32   : > { %521 = vst [vmem:[%s4318_s12 + $0x108] sm:$0xff] %v520_v33 }
  0x33   : > { %523 = vst [vmem:[%s4318_s12 + $0x110] sm:$0xff] %v522_v34 }
  0x34   : > { %525 = vst [vmem:[%s4318_s12 + $0x118] sm:$0xff] %v524_v35 }
  0x35   : > { %527 = vst [vmem:[%s4318_s12 + $0x120] sm:$0xff] %v526_v36 }
  0x36   : > { %529 = vst [vmem:[%s4318_s12 + $0x128] sm:$0xff] %v528_v37 }
  0x37   : > { %531 = vst [vmem:[%s4318_s12 + $0x130] sm:$0xff] %v530_v38 }
  0x38   : > { %533 = vst [vmem:[%s4318_s12 + $0x138] sm:$0xff] %v532_v39 }
  0x39   : > { %535 = vst [vmem:[%s4318_s12 + $0x140] sm:$0xff] %v534_v40 }
  0x3a   : > { %537 = vst [vmem:[%s4318_s12 + $0x148] sm:$0xff] %v536_v41 }
  0x3b   : > { %539 = vst [vmem:[%s4318_s12 + $0x150] sm:$0xff] %v538_v42 }
  0x3c   : > { %541 = vst [vmem:[%s4318_s12 + $0x158] sm:$0xff] %v540_v43 }
  0x3d   : > { %543 = vst [vmem:[%s4318_s12 + $0x160] sm:$0xff] %v542_v44 }
  0x3e PF: > { %p3506_p5 = scmp.ge.s32.totalorder %s4212_s19, 1  ;;  %p548_p6 = scmp.lt.s32.totalorder %s4212_s19, 3 }
  0x40   : > { %p549_p7 = pnand %p3506_p5, %p548_p6 }
  0x42   : > { %552 = sbr.rel (%p549_p7) target bundleno = 1540 (0x604), region = 98 }
  0x47   : > { %v3573_v45 = vld [vmem:[%s7584_s1 + $0x348] sm:$0x1]  ;;  %vm785_vm0 = vcmask 1040384   ;;  %v3574_v46 = vld [vmem:[%s7584_s1 + $0x350] sm:$0x1]  ;;  %v3568_v47 = vld [vmem:[%s7584_s1 + $0x320] sm:$0xff] }
  0x48   : > { %3578 = vmatpush.msk.msra.mxu0 %vm785_vm0, %v3573_v45  ;;  %3594 = vmatpush.msk.msra.mxu1 %vm785_vm0, %v3574_v46  ;;  %v3575_v48 = vld [vmem:[%s7584_s1 + $0x358] sm:$0x1]  ;;  %v3576_v49 = vld [vmem:[%s7584_s1 + $0x360] sm:$0x1]  ;;  %v3569_v50 = vld [vmem:[%s7584_s1 + $0x328] sm:$0xff]  ;;  %s555_s13 = sand.u32 1, %s4204_s17  }
  0x49   : > { %3610 = vmatpush.msk.msra.mxu2 %vm785_vm0, %v3575_v48  ;;  %3626 = vmatpush.msk.msra.mxu3 %vm785_vm0, %v3576_v49  ;;  %v3570_v51 = vld [vmem:[%s7584_s1 + $0x330] sm:$0xff]  ;;  %v3571_v52 = vld [vmem:[%s7584_s1 + $0x338] sm:$0xff]  ;;  %v3564_v54 = vld [vmem:[%s7584_s1 + $0x300] sm:$0xff]  ;;  %s4158_s12 = smul.u32 360, %s555_s13  ;;  %vm739_vm1 = vcmask 662528   ;;  %s4214_s17 = smov 16  }
  0x4a   : > { %v3563_v53 = vld [vmem:[%s7584_s1 + $0x2f8] sm:$0xff]  ;;  %807 = vmatpush.msra.mxu0 %v3568_v47  ;;  %869 = vmatpush.msra.mxu1 %v3569_v50  ;;  %v3565_v55 = vld [vmem:[%s7584_s1 + $0x308] sm:$0xff]  ;;  %v3566_v56 = vld [vmem:[%s7584_s1 + $0x310] sm:$0xff]  ;;  %s4215_s28 = smov 8   ;;  %s4217_s30 = smov 32   ;;  %vm2325_vm2 = vcmask 64512  }
  0x4b   : > { %931 = vmatpush.msra.mxu2 %v3570_v51  ;;  %993 = vmatpush.msra.mxu3 %v3571_v52  ;;  %v3558_v57 = vld [vmem:[%s7584_s1 + $0x2d0] sm:$0xff]  ;;  %v3559_v58 = vld [vmem:[%s7584_s1 + $0x2d8] sm:$0xff]  ;;  %v3560_v59 = vld [vmem:[%s7584_s1 + $0x2e0] sm:$0xff]  ;;  %s4546_s29 = scalar_lea.vmem [#allocation2], %s4158_s12  ;;  %s4216_s12 = smov 24   ;;  %vm2350_vm3 = vcmask 130048  }
  0x4c   : > { %808 = vmatpush.msra.mxu0 %v3563_v53  ;;  %870 = vmatpush.msra.mxu1 %v3564_v54  ;;  %v3561_v60 = vld [vmem:[%s7584_s1 + $0x2e8] sm:$0xff]  ;;  %v3554_v62 = vld [vmem:[%s7584_s1 + $0x2b0] sm:$0xff]  ;;  %v3555_v63 = vld [vmem:[%s7584_s1 + $0x2b8] sm:$0xff]  ;;  %vm2375_vm4 = vcmask 195584   ;;  %vm2400_vm5 = vcmask 261120   ;;  %vm2651_vm6 = vcmask 982016  }
  0x4d   : > { %932 = vmatpush.msra.mxu2 %v3565_v55  ;;  %994 = vmatpush.msra.mxu3 %v3566_v56  ;;  %v3553_v61 = vld [vmem:[%s7584_s1 + $0x2a8] sm:$0xff]  ;;  %v3556_v0 = vld [vmem:[%s7584_s1 + $0x2c0] sm:$0xff]  ;;  %v3550_v3 = vld [vmem:[%s7584_s1 + $0x290] sm:$0xff]  ;;  %s4218_s26 = smov 64   ;;  %vm3384_vm7 = vcmask 523264   ;;  %p593_p8 = scmp.lt.s32.totalorder %s3501_s20, 1 }
  0x4e   : > { %809 = vmatpush.msra.mxu0 %v3558_v57  ;;  %871 = vmatpush.msra.mxu1 %v3559_v58  ;;  %v3548_v1 = vld [vmem:[%s7584_s1 + $0x280] sm:$0xff]  ;;  %v3549_v2 = vld [vmem:[%s7584_s1 + $0x288] sm:$0xff]  ;;  %v3551_v4 = vld [vmem:[%s7584_s1 + $0x298] sm:$0xff] }
  0x4f   : > { %933 = vmatpush.msra.mxu2 %v3560_v59  ;;  %995 = vmatpush.msra.mxu3 %v3561_v60  ;;  %v3543_v5 = vld [vmem:[%s7584_s1 + $0x258] sm:$0xff]  ;;  %v3544_v6 = vld [vmem:[%s7584_s1 + $0x260] sm:$0xff]  ;;  %v3545_v7 = vld [vmem:[%s7584_s1 + $0x268] sm:$0xff]  ;;  %s7783_s20 = smov (!%p593_p8, %s3501_s20), 1 }
  0x50   : > { %810 = vmatpush.msra.mxu0 %v3553_v61  ;;  %872 = vmatpush.msra.mxu1 %v3554_v62  ;;  %v3546_v8 = vld [vmem:[%s7584_s1 + $0x270] sm:$0xff]  ;;  %v3539_v10 = vld [vmem:[%s7584_s1 + $0x238] sm:$0xff]  ;;  %v3540_v11 = vld [vmem:[%s7584_s1 + $0x240] sm:$0xff]  ;;  %s3507_s13 = sshll.u32 %s7783_s20, 3 }
  0x51   : > { %934 = vmatpush.msra.mxu2 %v3555_v63  ;;  %996 = vmatpush.msra.mxu3 %v3556_v0  ;;  %v3538_v9 = vld [vmem:[%s7584_s1 + $0x230] sm:$0xff]  ;;  %v3541_v12 = vld [vmem:[%s7584_s1 + $0x248] sm:$0xff]  ;;  %v3535_v15 = vld [vmem:[%s7584_s1 + $0x218] sm:$0xff]  ;;  %s596_s16 = scalar_lea.vmem %s7594_s11, %s3507_s13 }
  0x52   : > { %811 = vmatpush.msra.mxu0 %v3548_v1  ;;  %873 = vmatpush.msra.mxu1 %v3549_v2  ;;  %v3533_v13 = vld [vmem:[%s7584_s1 + $0x208] sm:$0xff]  ;;  %v3534_v14 = vld [vmem:[%s7584_s1 + $0x210] sm:$0xff]  ;;  %v3536_v16 = vld [vmem:[%s7584_s1 + $0x220] sm:$0xff] }
  0x53   : > { %935 = vmatpush.msra.mxu2 %v3550_v3  ;;  %997 = vmatpush.msra.mxu3 %v3551_v4  ;;  %v3528_v17 = vld [vmem:[%s7584_s1 + $0x1e0] sm:$0xff]  ;;  %v3529_v18 = vld [vmem:[%s7584_s1 + $0x1e8] sm:$0xff]  ;;  %v3530_v19 = vld [vmem:[%s7584_s1 + $0x1f0] sm:$0xff] }
  0x54   : > { %812 = vmatpush.msra.mxu0 %v3543_v5  ;;  %874 = vmatpush.msra.mxu1 %v3544_v6  ;;  %v3531_v20 = vld [vmem:[%s7584_s1 + $0x1f8] sm:$0xff]  ;;  %v3524_v22 = vld [vmem:[%s7584_s1 + $0x1c0] sm:$0xff]  ;;  %v3525_v23 = vld [vmem:[%s7584_s1 + $0x1c8] sm:$0xff] }
  0x55   : > { %936 = vmatpush.msra.mxu2 %v3545_v7  ;;  %998 = vmatpush.msra.mxu3 %v3546_v8  ;;  %v3523_v21 = vld [vmem:[%s7584_s1 + $0x1b8] sm:$0xff]  ;;  %v3526_v24 = vld [vmem:[%s7584_s1 + $0x1d0] sm:$0xff]  ;;  %v4560_v26 = vld [vmem:[%s4546_s29 + $0x80] sm:$0xff] }
  0x56   : > { %813 = vmatpush.msra.mxu0 %v3538_v9  ;;  %875 = vmatpush.msra.mxu1 %v3539_v10  ;;  %v4549_v25 = vld [vmem:[%s4546_s29 + $0x78] sm:$0xff]  ;;  %v4571_v27 = vld [vmem:[%s4546_s29 + $0x88] sm:$0xff]  ;;  %v4582_v28 = vld [vmem:[%s4546_s29 + $0x90] sm:$0xff] }
  0x57   : > { %937 = vmatpush.msra.mxu2 %v3540_v11  ;;  %999 = vmatpush.msra.mxu3 %v3541_v12  ;;  %v4593_v29 = vld [vmem:[%s4546_s29 + $0x98] sm:$0xff]  ;;  %v4604_v30 = vld [vmem:[%s4546_s29 + $0xa0] sm:$0xff]  ;;  %v4623_v33 = vld [vmem:[%s4546_s29 + $0xa8] sm:$0xff] }
  0x58   : > { %814 = vmatpush.msra.mxu0 %v3533_v13  ;;  %876 = vmatpush.msra.mxu1 %v3534_v14  ;;  %v3577_v31 = vld [vmem:[%s7584_s1 + $0x368] sm:$0x1]  ;;  %v663_v32 = vld [vmem:[%s7584_s1 + $0x198] sm:$0x1]  ;;  %v662_v34 = vld [vmem:[%s7584_s1 + $0x190] sm:$0x1] }
  0x59   : > { %938 = vmatpush.msra.mxu2 %v3535_v15  ;;  %1000 = vmatpush.msra.mxu3 %v3536_v16  ;;  %v4638_v35 = vld [vmem:[%s4546_s29 + $0xb0] sm:$0xff]  ;;  %v3572_v36 = vld [vmem:[%s7584_s1 + $0x340] sm:$0xff]  ;;  %v657_v39 = vld [vmem:[%s7584_s1 + $0x168] sm:$0xff] }
  0x5a   : > { %815 = vmatpush.msra.mxu0 %v3528_v17  ;;  %877 = vmatpush.msra.mxu1 %v3529_v18  ;;  %v658_v37 = vld [vmem:[%s7584_s1 + $0x170] sm:$0xff]  ;;  %v4655_v38 = vld [vmem:[%s4546_s29 + $0xb8] sm:$0xff]  ;;  %v653_v42 = vld [vmem:[%s7584_s1 + $0x148] sm:$0xff] }
  0x5b   : > { %939 = vmatpush.msra.mxu2 %v3530_v19  ;;  %1001 = vmatpush.msra.mxu3 %v3531_v20  ;;  %v3567_v40 = vld [vmem:[%s7584_s1 + $0x318] sm:$0xff]  ;;  %v664_v41 = vld [vmem:[%s7584_s1 + $0x1a0] sm:$0x1]  ;;  %v654_v45 = vld [vmem:[%s7584_s1 + $0x150] sm:$0xff] }
  0x5c   : > { %816 = vmatpush.msra.mxu0 %v3523_v21  ;;  %878 = vmatpush.msra.mxu1 %v3524_v22  ;;  %v659_v43 = vld [vmem:[%s7584_s1 + $0x178] sm:$0xff]  ;;  %v652_v44 = vld [vmem:[%s7584_s1 + $0x140] sm:$0xff]  ;;  %v3562_v47 = vld [vmem:[%s7584_s1 + $0x2f0] sm:$0xff] }
  0x5d   : > { %940 = vmatpush.msra.mxu2 %v3525_v23  ;;  %1002 = vmatpush.msra.mxu3 %v3526_v24  ;;  %v4688_v46 = vld [vmem:[%s4546_s29 + $0xc0] sm:$0xff]  ;;  %v647_v48 = vld [vmem:[%s7584_s1 + $0x118] sm:$0xff]  ;;  %v642_v52 = vld [vmem:[%s7584_s1 + $0xf0] sm:$0xff] }
  0x5e   : > { %3579 = vmatmul.msk.f32.vlgmr.msra.gmra.mxu0 %vm739_vm1, %v4549_v25  ;;  %3595 = vmatmul.msk.f32.vlgmr.msra.gmra.mxu1 %vm739_vm1, %v4549_v25  ;;  %v648_v49 = vld [vmem:[%s7584_s1 + $0x120] sm:$0xff]  ;;  %v649_v50 = vld [vmem:[%s7584_s1 + $0x128] sm:$0xff]  ;;  %v643_v53 = vld [vmem:[%s7584_s1 + $0xf8] sm:$0xff] }
  0x5f   : > { %3611 = vmatmul.msk.f32.vlgmr.msra.gmra.mxu2 %vm739_vm1, %v4549_v25  ;;  %3627 = vmatmul.msk.f32.vlgmr.msra.gmra.mxu3 %vm739_vm1, %v4549_v25  ;;  %v3557_v51 = vld [vmem:[%s7584_s1 + $0x2c8] sm:$0xff]  ;;  %v644_v54 = vld [vmem:[%s7584_s1 + $0x100] sm:$0xff]  ;;  %v638_v57 = vld [vmem:[%s7584_s1 + $0xd0] sm:$0xff] }
  0x60   : > { %3642 = vmatpush.msk.msrb.mxu0 %vm785_vm0, %v3577_v31  ;;  %3674 = vmatpush.msk.msrb.mxu2 %vm785_vm0, %v663_v32  ;;  %v3552_v55 = vld [vmem:[%s7584_s1 + $0x2a0] sm:$0xff]  ;;  %v637_v56 = vld [vmem:[%s7584_s1 + $0xc8] sm:$0xff]  ;;  %v639_v58 = vld [vmem:[%s7584_s1 + $0xd8] sm:$0xff] }
  0x61   : > { %3658 = vmatpush.msk.msrb.mxu1 %vm785_vm0, %v662_v34  ;;  %3690 = vmatpush.msk.msrb.mxu3 %vm785_vm0, %v664_v41  ;;  %v4735_v59 = vld [vmem:[%s4546_s29 + $0xc8] sm:$0xff]  ;;  %v3547_v60 = vld [vmem:[%s7584_s1 + $0x278] sm:$0xff]  ;;  %v632_v61 = vld [vmem:[%s7584_s1 + $0xa0] sm:$0xff] }
  0x62   : > { %1055 = vmatpush.msrb.mxu0 %v3572_v36  ;;  %1239 = vmatpush.msrb.mxu2 %v658_v37  ;;  %v633_v62 = vld [vmem:[%s7584_s1 + $0xa8] sm:$0xff]  ;;  %v634_v63 = vld [vmem:[%s7584_s1 + $0xb0] sm:$0xff]  ;;  %v627_v1 = vld [vmem:[%s7584_s1 + $0x78] sm:$0xff] }
  0x63   : > { %1177 = vmatpush.msrb.mxu1 %v657_v39  ;;  %1301 = vmatpush.msrb.mxu3 %v659_v43  ;;  %v3542_v0 = vld [vmem:[%s7584_s1 + $0x250] sm:$0xff]  ;;  %v628_v2 = vld [vmem:[%s7584_s1 + $0x80] sm:$0xff]  ;;  %v629_v3 = vld [vmem:[%s7584_s1 + $0x88] sm:$0xff] }
  0x64   : > { %1056 = vmatpush.msrb.mxu0 %v3567_v40  ;;  %1240 = vmatpush.msrb.mxu2 %v653_v42  ;;  %v3537_v4 = vld [vmem:[%s7584_s1 + $0x228] sm:$0xff]  ;;  %v622_v5 = vld [vmem:[%s7584_s1 + $0x50] sm:$0xff]  ;;  %v623_v6 = vld [vmem:[%s7584_s1 + $0x58] sm:$0xff] }
  0x65   : > { %1178 = vmatpush.msrb.mxu1 %v652_v44  ;;  %1302 = vmatpush.msrb.mxu3 %v654_v45  ;;  %v624_v7 = vld [vmem:[%s7584_s1 + $0x60] sm:$0xff]  ;;  %v4782_v8 = vld [vmem:[%s4546_s29 + $0xd0] sm:$0xff]  ;;  %v617_v10 = vld [vmem:[%s7584_s1 + $0x28] sm:$0xff] }
  0x66   : > { %3580 = vmatmul.msk.f32.gmra.mxu0 %vm739_vm1, %v4560_v26  ;;  %3596 = vmatmul.msk.f32.gmra.mxu1 %vm739_vm1, %v4560_v26  ;;  %v3532_v9 = vld [vmem:[%s7584_s1 + $0x200] sm:$0xff]  ;;  %v618_v11 = vld [vmem:[%s7584_s1 + $0x30] sm:$0xff]  ;;  %v619_v12 = vld [vmem:[%s7584_s1 + $0x38] sm:$0xff] }
  0x67   : > { %3612 = vmatmul.msk.f32.gmra.mxu2 %vm739_vm1, %v4560_v26  ;;  %3628 = vmatmul.msk.f32.gmra.mxu3 %vm739_vm1, %v4560_v26  ;;  %v3527_v13 = vld [vmem:[%s7584_s1 + $0x1d8] sm:$0xff]  ;;  %v612_v14 = vld [vmem:[%s7584_s1] sm:$0xff]  ;;  %v613_v15 = vld [vmem:[%s7584_s1 + $0x8] sm:$0xff] }
  0x68   : > { %1057 = vmatpush.msrb.mxu0 %v3562_v47  ;;  %1179 = vmatpush.msrb.mxu1 %v647_v48  ;;  %v614_v16 = vld [vmem:[%s7584_s1 + $0x10] sm:$0xff]  ;;  %v4817_v17 = vld [vmem:[%s4546_s29 + $0xd8] sm:$0xff]  ;;  %v4828_v18 = vld [vmem:[%s4546_s29 + $0xe0] sm:$0xff] }
  0x69   : > { %1241 = vmatpush.msrb.mxu2 %v648_v49  ;;  %1303 = vmatpush.msrb.mxu3 %v649_v50  ;;  %v4839_v19 = vld [vmem:[%s4546_s29 + $0xe8] sm:$0xff]  ;;  %v4850_v20 = vld [vmem:[%s4546_s29] sm:$0xff]  ;;  %v4884_v34 = vld [vmem:[%s4546_s29 + $0x10] sm:$0xff] }
  0x6a   : > { %1058 = vmatpush.msrb.mxu0 %v3557_v51  ;;  %1180 = vmatpush.msrb.mxu1 %v642_v52  ;;  %v4865_v23 = vld [vmem:[%s4546_s29 + $0x8] sm:$0xff]  ;;  %v4903_v40 = vld [vmem:[%s4546_s29 + $0x18] sm:$0xff]  ;;  %v4922_v44 = vld [vmem:[%s4546_s29 + $0x20] sm:$0xff] }
  0x6b   : > { %1242 = vmatpush.msrb.mxu2 %v643_v53  ;;  %1304 = vmatpush.msrb.mxu3 %v644_v54  ;;  %v4941_v49 = vld [vmem:[%s4546_s29 + $0x28] sm:$0xff]  ;;  %v4960_v53 = vld [vmem:[%s4546_s29 + $0x30] sm:$0xff]  ;;  %v3803_v54 = vld [vmem:[%s7584_s1 + $0x500] sm:$0x1] }
  0x6c   : > { %1059 = vmatpush.msrb.mxu0 %v3552_v55  ;;  %1181 = vmatpush.msrb.mxu1 %v637_v56 }
  0x6d   : > { %1243 = vmatpush.msrb.mxu2 %v638_v57  ;;  %1305 = vmatpush.msrb.mxu3 %v639_v58 }
  0x6e   : > { %3581 = vmatmul.msk.f32.gmra.mxu0 %vm739_vm1, %v4571_v27  ;;  %3597 = vmatmul.msk.f32.gmra.mxu1 %vm739_vm1, %v4571_v27 }
  0x6f   : > { %3613 = vmatmul.msk.f32.gmra.mxu2 %vm739_vm1, %v4571_v27  ;;  %3629 = vmatmul.msk.f32.gmra.mxu3 %vm739_vm1, %v4571_v27 }
  0x70   : > { %1060 = vmatpush.msrb.mxu0 %v3547_v60  ;;  %1182 = vmatpush.msrb.mxu1 %v632_v61  ;;  %v4987_v60 = vld [vmem:[%s4546_s29 + $0x38] sm:$0xff] }
  0x71   : > { %1244 = vmatpush.msrb.mxu2 %v633_v62  ;;  %1306 = vmatpush.msrb.mxu3 %v634_v63  ;;  %v660_v61 = vld [vmem:[%s7584_s1 + $0x180] sm:$0xff]  ;;  %v3798_v62 = vld [vmem:[%s7584_s1 + $0x4d8] sm:$0xff] }
  0x72   : > { %1061 = vmatpush.msrb.mxu0 %v3542_v0  ;;  %1183 = vmatpush.msrb.mxu1 %v627_v1 }
  0x73   : > { %1245 = vmatpush.msrb.mxu2 %v628_v2  ;;  %1307 = vmatpush.msrb.mxu3 %v629_v3  ;;  %v5016_v2 = vld [vmem:[%s4546_s29 + $0x40] sm:$0xff] }
  0x74   : > { %1062 = vmatpush.msrb.mxu0 %v3537_v4  ;;  %1184 = vmatpush.msrb.mxu1 %v622_v5  ;;  %v661_v3 = vld [vmem:[%s7584_s1 + $0x188] sm:$0xff] }
  0x75   : > { %1246 = vmatpush.msrb.mxu2 %v623_v6  ;;  %1308 = vmatpush.msrb.mxu3 %v624_v7  ;;  %v3804_v4 = vld [vmem:[%s7584_s1 + $0x508] sm:$0x1]  ;;  %v655_v7 = vld [vmem:[%s7584_s1 + $0x158] sm:$0xff] }
  0x76   : > { %3582 = vmatmul.msk.f32.gmra.mxu0 %vm739_vm1, %v4582_v28  ;;  %3598 = vmatmul.msk.f32.gmra.mxu1 %vm739_vm1, %v4582_v28  ;;  %v5037_v6 = vld [vmem:[%s4546_s29 + $0x48] sm:$0xff] }
  0x77   : > { %3614 = vmatmul.msk.f32.gmra.mxu2 %vm739_vm1, %v4582_v28  ;;  %3630 = vmatmul.msk.f32.gmra.mxu3 %vm739_vm1, %v4582_v28 }
  0x78   : > { %1063 = vmatpush.msrb.mxu0 %v3532_v9  ;;  %1185 = vmatpush.msrb.mxu1 %v617_v10 }
  0x79   : > { %1247 = vmatpush.msrb.mxu2 %v618_v11  ;;  %1309 = vmatpush.msrb.mxu3 %v619_v12  ;;  %v3793_v11 = vld [vmem:[%s7584_s1 + $0x4b0] sm:$0xff]  ;;  %v3799_v12 = vld [vmem:[%s7584_s1 + $0x4e0] sm:$0xff] }
  0x7a   : > { %1064 = vmatpush.msrb.mxu0 %v3527_v13  ;;  %1186 = vmatpush.msrb.mxu1 %v612_v14  ;;  %v656_v13 = vld [vmem:[%s7584_s1 + $0x160] sm:$0xff]  ;;  %v3794_v14 = vld [vmem:[%s7584_s1 + $0x4b8] sm:$0xff] }
  0x7b   : > { %1248 = vmatpush.msrb.mxu2 %v613_v15  ;;  %1310 = vmatpush.msrb.mxu3 %v614_v16  ;;  %v650_v15 = vld [vmem:[%s7584_s1 + $0x130] sm:$0xff]  ;;  %v651_v16 = vld [vmem:[%s7584_s1 + $0x138] sm:$0xff] }
  0x7d   : > { %3808 = vmatpush.msk.msra.mxu2 %vm785_vm0, %v3803_v54  ;;  %3824 = vmatpush.msk.msra.mxu3 %vm785_vm0, %v3804_v4  ;;  %v645_v54 = vld [vmem:[%s7584_s1 + $0x108] sm:$0xff]  ;;  %v5093_v4 = vld [vmem:[%s4546_s29 + $0x50] sm:$0xff] }
  0x7e   : > { %3583 = vmatmul.msk.f32.gmra.mxu0 %vm739_vm1, %v4593_v29  ;;  %3599 = vmatmul.msk.f32.gmra.mxu1 %vm739_vm1, %v4593_v29 }
  0x7f   : > { %3615 = vmatmul.msk.f32.gmra.mxu2 %vm739_vm1, %v4593_v29  ;;  %3631 = vmatmul.msk.f32.gmra.mxu3 %vm739_vm1, %v4593_v29 }
  0x80   : > { %1619 = vmatpush.msra.mxu2 %v3798_v62  ;;  %1681 = vmatpush.msra.mxu3 %v3799_v12 }
  0x82   : > { %1620 = vmatpush.msra.mxu2 %v3793_v11  ;;  %1682 = vmatpush.msra.mxu3 %v3794_v14  ;;  %v641_v14 = vld [vmem:[%s7584_s1 + $0xe8] sm:$0xff] }
  0x86   : > { %3584 = vmatmul.msk.f32.gmra.mxu0 %vm739_vm1, %v4604_v30  ;;  %3600 = vmatmul.msk.f32.gmra.mxu1 %vm739_vm1, %v4604_v30 }
  0x87   : > { %3616 = vmatmul.msk.f32.gmra.mxu2 %vm739_vm1, %v4604_v30  ;;  %3632 = vmatmul.msk.f32.gmra.mxu3 %vm739_vm1, %v4604_v30 }
  0x8e   : > { %3585 = vmatmul.msk.f32.gmra.mxu0 %vm739_vm1, %v4623_v33  ;;  %3601 = vmatmul.msk.f32.gmra.mxu1 %vm739_vm1, %v4623_v33 }
  0x8f   : > { %3617 = vmatmul.msk.f32.gmra.mxu2 %vm739_vm1, %v4623_v33  ;;  %3633 = vmatmul.msk.f32.gmra.mxu3 %vm739_vm1, %v4623_v33 }
  0x96   : > { %3586 = vmatmul.msk.f32.gmra.mxu0 %vm739_vm1, %v4638_v35  ;;  %3602 = vmatmul.msk.f32.gmra.mxu1 %vm739_vm1, %v4638_v35 }
  0x97   : > { %3618 = vmatmul.msk.f32.gmra.mxu2 %vm739_vm1, %v4638_v35  ;;  %3634 = vmatmul.msk.f32.gmra.mxu3 %vm739_vm1, %v4638_v35 }
  0x9e   : > { %3587 = vmatmul.msk.f32.gmra.mxu0 %vm739_vm1, %v4655_v38  ;;  %3603 = vmatmul.msk.f32.gmra.mxu1 %vm739_vm1, %v4655_v38 }
  0x9f   : > { %3619 = vmatmul.msk.f32.gmra.mxu2 %vm739_vm1, %v4655_v38  ;;  %3635 = vmatmul.msk.f32.gmra.mxu3 %vm739_vm1, %v4655_v38 }
  0xa6   : > { %3588 = vmatmul.msk.f32.gmra.mxu0 %vm739_vm1, %v4688_v46  ;;  %3604 = vmatmul.msk.f32.gmra.mxu1 %vm739_vm1, %v4688_v46 }
  0xa7   : > { %3620 = vmatmul.msk.f32.gmra.mxu2 %vm739_vm1, %v4688_v46  ;;  %3636 = vmatmul.msk.f32.gmra.mxu3 %vm739_vm1, %v4688_v46 }
  0xae   : > { %3589 = vmatmul.msk.f32.gmra.mxu0 %vm739_vm1, %v4735_v59  ;;  %3605 = vmatmul.msk.f32.gmra.mxu1 %vm739_vm1, %v4735_v59 }
  0xaf   : > { %3621 = vmatmul.msk.f32.gmra.mxu2 %vm739_vm1, %v4735_v59  ;;  %3637 = vmatmul.msk.f32.gmra.mxu3 %vm739_vm1, %v4735_v59 }
  0xb6   : > { %3590 = vmatmul.msk.f32.gmra.mxu0 %vm739_vm1, %v4782_v8  ;;  %3606 = vmatmul.msk.f32.gmra.mxu1 %vm739_vm1, %v4782_v8 }
  0xb7   : > { %3622 = vmatmul.msk.f32.gmra.mxu2 %vm739_vm1, %v4782_v8  ;;  %3638 = vmatmul.msk.f32.gmra.mxu3 %vm739_vm1, %v4782_v8 }
  0xbe   : > { %3591 = vmatmul.msk.f32.gmra.mxu0 %vm739_vm1, %v4817_v17  ;;  %3607 = vmatmul.msk.f32.gmra.mxu1 %vm739_vm1, %v4817_v17 }
  0xbf   : > { %3623 = vmatmul.msk.f32.gmra.mxu2 %vm739_vm1, %v4817_v17  ;;  %3639 = vmatmul.msk.f32.gmra.mxu3 %vm739_vm1, %v4817_v17 }
  0xc6   : > { %3592 = vmatmul.msk.f32.gmra.mxu0 %vm739_vm1, %v4828_v18  ;;  %3608 = vmatmul.msk.f32.gmra.mxu1 %vm739_vm1, %v4828_v18 }
  0xc7   : > { %3624 = vmatmul.msk.f32.gmra.mxu2 %vm739_vm1, %v4828_v18  ;;  %3640 = vmatmul.msk.f32.gmra.mxu3 %vm739_vm1, %v4828_v18 }
  0xce   : > { %3593 = vmatmul.msk.f32.gmra.mxu0 %vm739_vm1, %v4839_v19  ;;  %3609 = vmatmul.msk.f32.gmra.mxu1 %vm739_vm1, %v4839_v19 }
  0xcf   : > { %3625 = vmatmul.msk.f32.gmra.mxu2 %vm739_vm1, %v4839_v19  ;;  %3641 = vmatmul.msk.f32.gmra.mxu3 %vm739_vm1, %v4839_v19 }
  0xd6   : > { %3643 = vmatmul.msk.f32.vlgmr.msrb.gmra.mxu0 %vm739_vm1, %v4549_v25  ;;  %3659 = vmatmul.msk.f32.vlgmr.msrb.gmra.mxu1 %vm739_vm1, %v4850_v20 }
  0xd7   : > { %3675 = vmatmul.msk.f32.vlgmr.msrb.gmra.mxu2 %vm739_vm1, %v4850_v20  ;;  %3691 = vmatmul.msk.f32.vlgmr.msrb.gmra.mxu3 %vm739_vm1, %v4850_v20 }
  0xdb   : > { %v4860_v21 = vpop.f32.mrf.mxu0  ;;  %v4862_v22 = vpop.f32.mrf.mxu1 }
  0xde   : > { %3644 = vmatmul.msk.f32.gmra.mxu0 %vm739_vm1, %v4560_v26  ;;  %3660 = vmatmul.msk.f32.gmra.mxu1 %vm739_vm1, %v4865_v23 }
  0xdf   : > { %3676 = vmatmul.msk.f32.gmra.mxu2 %vm739_vm1, %v4865_v23  ;;  %3692 = vmatmul.msk.f32.gmra.mxu3 %vm739_vm1, %v4865_v23 }
  0xe2   : > { %v4875_v24 = vpop.f32.mrf.mxu2  ;;  %v4877_v25 = vpop.f32.mrf.mxu3 }
  0xe3   : > { %7601 = vst [vmem:[#allocation3_spill] sm:$0xff] %v4875_v24  ;;  %v4879_v31 = vpop.f32.mrf.mxu0  ;;  %v4881_v32 = vpop.f32.mrf.mxu1 }
  0xe4   : > { %7602 = vst [vmem:[#allocation4_spill] sm:$0xff] %v4877_v25  ;;  %v5362_v25 = vld [vmem:[%s4546_s29 + $0x118] sm:$0xff] }
  0xe6   : > { %3645 = vmatmul.msk.f32.gmra.mxu0 %vm739_vm1, %v4571_v27  ;;  %3661 = vmatmul.msk.f32.gmra.mxu1 %vm739_vm1, %v4884_v34 }
  0xe7   : > { %3677 = vmatmul.msk.f32.gmra.mxu2 %vm739_vm1, %v4884_v34  ;;  %3693 = vmatmul.msk.f32.gmra.mxu3 %vm739_vm1, %v4884_v34 }
  0xea   : > { %v4894_v26 = vpop.f32.mrf.mxu2  ;;  %v4896_v36 = vpop.f32.mrf.mxu3 }
  0xeb   : > { %7603 = vst [vmem:[#allocation5_spill] sm:$0xff] %v4894_v26  ;;  %v4898_v37 = vpop.f32.mrf.mxu0  ;;  %v4900_v39 = vpop.f32.mrf.mxu1 }
  0xec   : > { %7604 = vst [vmem:[#allocation6_spill] sm:$0xff] %v4896_v36 }
  0xee   : > { %3646 = vmatmul.msk.f32.gmra.mxu0 %vm739_vm1, %v4582_v28  ;;  %3662 = vmatmul.msk.f32.gmra.mxu1 %vm739_vm1, %v4903_v40 }
  0xef   : > { %3678 = vmatmul.msk.f32.gmra.mxu2 %vm739_vm1, %v4903_v40  ;;  %3694 = vmatmul.msk.f32.gmra.mxu3 %vm739_vm1, %v4903_v40 }
  0xf2   : > { %v4913_v27 = vpop.f32.mrf.mxu2  ;;  %v4915_v41 = vpop.f32.mrf.mxu3 }
  0xf3   : > { %7605 = vst [vmem:[#allocation7_spill] sm:$0xff] %v4913_v27  ;;  %v4917_v42 = vpop.f32.mrf.mxu0  ;;  %v4919_v43 = vpop.f32.mrf.mxu1  ;;  %v5381_v27 = vld [vmem:[%s4546_s29 + $0x120] sm:$0xff] }
  0xf4   : > { %7606 = vst [vmem:[#allocation8_spill] sm:$0xff] %v4915_v41 }
  0xf6   : > { %3647 = vmatmul.msk.f32.gmra.mxu0 %vm739_vm1, %v4593_v29  ;;  %3663 = vmatmul.msk.f32.gmra.mxu1 %vm739_vm1, %v4922_v44 }
  0xf7   : > { %3679 = vmatmul.msk.f32.gmra.mxu2 %vm739_vm1, %v4922_v44  ;;  %3695 = vmatmul.msk.f32.gmra.mxu3 %vm739_vm1, %v4922_v44 }
  0xfa   : > { %v4932_v28 = vpop.f32.mrf.mxu2  ;;  %v4934_v45 = vpop.f32.mrf.mxu3 }
  0xfb   : > { %7607 = vst [vmem:[#allocation9_spill] sm:$0xff] %v4932_v28  ;;  %v4936_v47 = vpop.f32.mrf.mxu0  ;;  %v4938_v48 = vpop.f32.mrf.mxu1 }
  0xfc   : > { %7608 = vst [vmem:[#allocation10_spill] sm:$0xff] %v4934_v45  ;;  %v5343_v45 = vld [vmem:[%s4546_s29 + $0x110] sm:$0xff] }
  0xfe   : > { %3648 = vmatmul.msk.f32.gmra.mxu0 %vm739_vm1, %v4604_v30  ;;  %3664 = vmatmul.msk.f32.gmra.mxu1 %vm739_vm1, %v4941_v49  ;;  %v665_v30 = vld [vmem:[%s7584_s1 + $0x1a8] sm:$0x1] }
  0xff   : > { %3680 = vmatmul.msk.f32.gmra.mxu2 %vm739_vm1, %v4941_v49  ;;  %3696 = vmatmul.msk.f32.gmra.mxu3 %vm739_vm1, %v4941_v49 }
 0x100   : > { %3706 = vmatpush.msk.msra.mxu0 %vm785_vm0, %v665_v30  ;;  %v3789_v30 = vld [vmem:[%s7584_s1 + $0x490] sm:$0xff] }
 0x101   : > { %1683 = vmatpush.msra.mxu3 %v3789_v30  ;;  %v636_v30 = vld [vmem:[%s7584_s1 + $0xc0] sm:$0xff] }
 0x102   : > { %v4951_v29 = vpop.f32.mrf.mxu2  ;;  %v4953_v50 = vpop.f32.mrf.mxu3  ;;  %1363 = vmatpush.msra.mxu0 %v660_v61  ;;  %v3783_v61 = vld [vmem:[%s7584_s1 + $0x460] sm:$0xff] }
 0x103   : > { %7609 = vst [vmem:[#allocation11_spill] sm:$0xff] %v4951_v29  ;;  %v4955_v51 = vpop.f32.mrf.mxu0  ;;  %v4957_v52 = vpop.f32.mrf.mxu1 }
 0x104   : > { %7610 = vst [vmem:[#allocation12_spill] sm:$0xff] %v4953_v50  ;;  %1364 = vmatpush.msra.mxu0 %v655_v7  ;;  %v3784_v7 = vld [vmem:[%s7584_s1 + $0x468] sm:$0xff] }
 0x105   : > { %1684 = vmatpush.msra.mxu3 %v3784_v7  ;;  %v3768_v7 = vld [vmem:[%s7584_s1 + $0x3e8] sm:$0xff] }
 0x106   : > { %3649 = vmatmul.msk.f32.gmra.mxu0 %vm739_vm1, %v4623_v33  ;;  %3665 = vmatmul.msk.f32.gmra.mxu1 %vm739_vm1, %v4960_v53  ;;  %v666_v33 = vld [vmem:[%s7584_s1 + $0x1b0] sm:$0x1] }
 0x107   : > { %3681 = vmatmul.msk.f32.gmra.mxu2 %vm739_vm1, %v4960_v53  ;;  %3697 = vmatmul.msk.f32.gmra.mxu3 %vm739_vm1, %v4960_v53  ;;  %v5324_v50 = vld [vmem:[%s4546_s29 + $0x108] sm:$0xff] }
 0x108   : > { %3722 = vmatpush.msk.msra.mxu1 %vm785_vm0, %v666_v33  ;;  %1365 = vmatpush.msra.mxu0 %v650_v15  ;;  %v646_v33 = vld [vmem:[%s7584_s1 + $0x110] sm:$0xff]  ;;  %v3778_v15 = vld [vmem:[%s7584_s1 + $0x438] sm:$0xff] }
 0x10a   : > { %v4978_v55 = vpop.f32.mrf.mxu2  ;;  %v4980_v56 = vpop.f32.mrf.mxu3  ;;  %1425 = vmatpush.msra.mxu1 %v661_v3  ;;  %1366 = vmatpush.msra.mxu0 %v645_v54  ;;  %v3773_v54 = vld [vmem:[%s7584_s1 + $0x410] sm:$0xff] }
 0x10b   : > { %7611 = vst [vmem:[#allocation13_spill] sm:$0xff] %v4978_v55  ;;  %v4982_v57 = vpop.f32.mrf.mxu0  ;;  %v4984_v58 = vpop.f32.mrf.mxu1 }
 0x10c   : > { %7612 = vst [vmem:[#allocation14_spill] sm:$0xff] %v4980_v56  ;;  %1426 = vmatpush.msra.mxu1 %v656_v13  ;;  %v640_v13 = vld [vmem:[%s7584_s1 + $0xe0] sm:$0xff] }
 0x10d   : > { %1367 = vmatpush.msra.mxu0 %v640_v13  ;;  %v3769_v13 = vld [vmem:[%s7584_s1 + $0x3f0] sm:$0xff]  ;;  %v5305_v56 = vld [vmem:[%s4546_s29 + $0x100] sm:$0xff] }
 0x10e   : > { %3650 = vmatmul.msk.f32.gmra.mxu0 %vm739_vm1, %v4638_v35  ;;  %3666 = vmatmul.msk.f32.gmra.mxu1 %vm739_vm1, %v4987_v60 }
 0x10f   : > { %3682 = vmatmul.msk.f32.gmra.mxu2 %vm739_vm1, %v4987_v60  ;;  %3698 = vmatmul.msk.f32.gmra.mxu3 %vm739_vm1, %v4987_v60 }
 0x110   : > { %1427 = vmatpush.msra.mxu1 %v651_v16  ;;  %v3779_v16 = vld [vmem:[%s7584_s1 + $0x440] sm:$0xff] }
 0x111   : > { %1685 = vmatpush.msra.mxu3 %v3779_v16 }
 0x112   : > { %v5007_v35 = vpop.f32.mrf.mxu2  ;;  %v5009_v63 = vpop.f32.mrf.mxu3  ;;  %1428 = vmatpush.msra.mxu1 %v646_v33  ;;  %v630_v33 = vld [vmem:[%s7584_s1 + $0x90] sm:$0xff] }
 0x113   : > { %7613 = vst [vmem:[#allocation15_spill] sm:$0xff] %v5007_v35  ;;  %v5011_v0 = vpop.f32.mrf.mxu0  ;;  %v5013_v1 = vpop.f32.mrf.mxu1 }
 0x114   : > { %7614 = vst [vmem:[#allocation16_spill] sm:$0xff] %v5009_v63  ;;  %1429 = vmatpush.msra.mxu1 %v641_v14  ;;  %v625_v14 = vld [vmem:[%s7584_s1 + $0x68] sm:$0xff]  ;;  %v5286_v63 = vld [vmem:[%s4546_s29 + $0xf8] sm:$0xff] }
 0x115   : > { %7615 = vst [vmem:[#allocation17_spill] sm:$0xff] %v5011_v0 }
 0x116   : > { %3651 = vmatmul.msk.f32.gmra.mxu0 %vm739_vm1, %v4655_v38  ;;  %3667 = vmatmul.msk.f32.gmra.mxu1 %vm739_vm1, %v5016_v2 }
 0x117   : > { %3683 = vmatmul.msk.f32.gmra.mxu2 %vm739_vm1, %v5016_v2  ;;  %3699 = vmatmul.msk.f32.gmra.mxu3 %vm739_vm1, %v5016_v2 }
 0x118   : > { %1430 = vmatpush.msra.mxu1 %v636_v30  ;;  %v3763_v30 = vld [vmem:[%s7584_s1 + $0x3c0] sm:$0xff] }
 0x11a   : > { %v5032_v5 = vpop.f32.mrf.mxu2  ;;  %v5034_v38 = vpop.f32.mrf.mxu3 }
 0x11b   : > { %7616 = vst [vmem:[#allocation18_spill] sm:$0xff] %v5032_v5  ;;  %v5043_v9 = vpop.f32.mrf.mxu0  ;;  %v5045_v10 = vpop.f32.mrf.mxu1  ;;  %v5164_v5 = vld [vmem:[%s4546_s29 + $0x58] sm:$0xff] }
 0x11c   : > { %7617 = vst [vmem:[#allocation19_spill] sm:$0xff] %v5034_v38 }
 0x11e   : > { %3652 = vmatmul.msk.f32.gmra.mxu0 %vm739_vm1, %v4688_v46  ;;  %3668 = vmatmul.msk.f32.gmra.mxu1 %vm739_vm1, %v5037_v6  ;;  %v3788_v46 = vld [vmem:[%s7584_s1 + $0x488] sm:$0xff] }
 0x11f   : > { %3684 = vmatmul.msk.f32.gmra.mxu2 %vm739_vm1, %v5037_v6  ;;  %3700 = vmatmul.msk.f32.gmra.mxu3 %vm739_vm1, %v5037_v6 }
 0x120   : > { %1621 = vmatpush.msra.mxu2 %v3788_v46  ;;  %v635_v46 = vld [vmem:[%s7584_s1 + $0xb8] sm:$0xff] }
 0x121   : > { %1368 = vmatpush.msra.mxu0 %v635_v46  ;;  %v626_v46 = vld [vmem:[%s7584_s1 + $0x70] sm:$0xff] }
 0x122   : > { %v5088_v62 = vpop.f32.mrf.mxu2  ;;  %v5090_v3 = vpop.f32.mrf.mxu3  ;;  %1622 = vmatpush.msra.mxu2 %v3783_v61  ;;  %v631_v61 = vld [vmem:[%s7584_s1 + $0x98] sm:$0xff] }
 0x123   : > { %7618 = vst [vmem:[#allocation20_spill] sm:$0xff] %v5088_v62  ;;  %v5098_v11 = vpop.f32.mrf.mxu0  ;;  %v5100_v12 = vpop.f32.mrf.mxu1  ;;  %1369 = vmatpush.msra.mxu0 %v630_v33  ;;  %1431 = vmatpush.msra.mxu1 %v631_v61  ;;  %v620_v33 = vld [vmem:[%s7584_s1 + $0x40] sm:$0xff]  ;;  %v621_v61 = vld [vmem:[%s7584_s1 + $0x48] sm:$0xff] }
 0x124   : > { %7619 = vst [vmem:[#allocation21_spill] sm:$0xff] %v5090_v3  ;;  %1623 = vmatpush.msra.mxu2 %v3778_v15  ;;  %v5210_v3 = vld [vmem:[%s4546_s29 + $0x60] sm:$0xff] }
 0x125   : > { %1370 = vmatpush.msra.mxu0 %v625_v14  ;;  %1432 = vmatpush.msra.mxu1 %v626_v46  ;;  %v616_v14 = vld [vmem:[%s7584_s1 + $0x20] sm:$0xff]  ;;  %v3753_v46 = vld [vmem:[%s7584_s1 + $0x370] sm:$0xff] }
 0x126   : > { %3653 = vmatmul.msk.f32.gmra.mxu0 %vm739_vm1, %v4735_v59  ;;  %3669 = vmatmul.msk.f32.gmra.mxu1 %vm739_vm1, %v5093_v4  ;;  %v3774_v59 = vld [vmem:[%s7584_s1 + $0x418] sm:$0xff] }
 0x127   : > { %3685 = vmatmul.msk.f32.gmra.mxu2 %vm739_vm1, %v5093_v4  ;;  %3701 = vmatmul.msk.f32.gmra.mxu3 %vm739_vm1, %v5093_v4 }
 0x128   : > { %1624 = vmatpush.msra.mxu2 %v3773_v54  ;;  %1686 = vmatpush.msra.mxu3 %v3774_v59  ;;  %v3764_v59 = vld [vmem:[%s7584_s1 + $0x3c8] sm:$0xff] }
 0x129   : > { %1371 = vmatpush.msra.mxu0 %v620_v33  ;;  %1433 = vmatpush.msra.mxu1 %v621_v61 }
 0x12a   : > { %v5149_v15 = vpop.f32.mrf.mxu2  ;;  %v5151_v16 = vpop.f32.mrf.mxu3  ;;  %1625 = vmatpush.msra.mxu2 %v3768_v7  ;;  %1687 = vmatpush.msra.mxu3 %v3769_v13  ;;  %v3758_v7 = vld [vmem:[%s7584_s1 + $0x398] sm:$0xff] }
 0x12b   : > { %7620 = vst [vmem:[#allocation22_spill] sm:$0xff] %v5149_v15  ;;  %v5159_v54 = vpop.f32.mrf.mxu0  ;;  %v5161_v38 = vpop.f32.mrf.mxu1  ;;  %v615_v13 = vld [vmem:[%s7584_s1 + $0x18] sm:$0xff]  ;;  %1434 = vmatpush.msra.mxu1 %v616_v14  ;;  %v5229_v14 = vld [vmem:[%s4546_s29 + $0x68] sm:$0xff] }
 0x12c   : > { %7621 = vst [vmem:[#allocation23_spill] sm:$0xff] %v5151_v16  ;;  %1626 = vmatpush.msra.mxu2 %v3763_v30  ;;  %1688 = vmatpush.msra.mxu3 %v3764_v59  ;;  %v3754_v30 = vld [vmem:[%s7584_s1 + $0x378] sm:$0xff] }
 0x12d   : > { %7622 = vst [vmem:[#allocation24_spill] sm:$0xff] %v5159_v54  ;;  %1372 = vmatpush.msra.mxu0 %v615_v13  ;;  %v3781_v54 = vld [vmem:[%s7584_s1 + $0x450] sm:$0xff] }
 0x12e   : > { %3654 = vmatmul.msk.f32.gmra.mxu0 %vm739_vm1, %v4782_v8  ;;  %3670 = vmatmul.msk.f32.gmra.mxu1 %vm739_vm1, %v5164_v5  ;;  %v3759_v8 = vld [vmem:[%s7584_s1 + $0x3a0] sm:$0xff] }
 0x12f   : > { %3686 = vmatmul.msk.f32.gmra.mxu2 %vm739_vm1, %v5164_v5  ;;  %3702 = vmatmul.msk.f32.gmra.mxu3 %vm739_vm1, %v5164_v5 }
 0x130   : > { %1627 = vmatpush.msra.mxu2 %v3758_v7  ;;  %1689 = vmatpush.msra.mxu3 %v3759_v8 }
 0x132   : > { %v5201_v15 = vpop.f32.mrf.mxu2  ;;  %v5203_v16 = vpop.f32.mrf.mxu3  ;;  %1628 = vmatpush.msra.mxu2 %v3753_v46  ;;  %1690 = vmatpush.msra.mxu3 %v3754_v30 }
 0x133   : > { %7623 = vst [vmem:[#allocation25_spill] sm:$0xff] %v5201_v15  ;;  %v5205_v59 = vpop.f32.mrf.mxu0  ;;  %v5207_v33 = vpop.f32.mrf.mxu1  ;;  %v5267_v15 = vld [vmem:[%s4546_s29 + $0xf0] sm:$0xff] }
 0x134   : > { %7624 = vst [vmem:[#allocation26_spill] sm:$0xff] %v5203_v16 }
 0x135   : > { %7625 = vst [vmem:[#allocation27_spill] sm:$0xff] %v5205_v59  ;;  %v5560_v59 = vld [vmem:[%s4546_s29 + $0x148] sm:$0xff] }
 0x136   : > { %7626 = vst [vmem:[#allocation28_spill] sm:$0xff] %v5207_v33  ;;  %3655 = vmatmul.msk.f32.gmra.mxu0 %vm739_vm1, %v4817_v17  ;;  %3671 = vmatmul.msk.f32.gmra.mxu1 %vm739_vm1, %v5210_v3 }
 0x137   : > { %3687 = vmatmul.msk.f32.gmra.mxu2 %vm739_vm1, %v5210_v3  ;;  %3703 = vmatmul.msk.f32.gmra.mxu3 %vm739_vm1, %v5210_v3 }
 0x13a   : > { %v5220_v61 = vpop.f32.mrf.mxu2  ;;  %v5222_v7 = vpop.f32.mrf.mxu3 }
 0x13b   : > { %7627 = vst [vmem:[#allocation29_spill] sm:$0xff] %v5220_v61  ;;  %v5224_v8 = vpop.f32.mrf.mxu0  ;;  %v5226_v13 = vpop.f32.mrf.mxu1 }
 0x13c   : > { %7628 = vst [vmem:[#allocation30_spill] sm:$0xff] %v5222_v7  ;;  %v5248_v7 = vld [vmem:[%s4546_s29 + $0x70] sm:$0xff] }
 0x13d   : > { %7629 = vst [vmem:[#allocation31_spill] sm:$0xff] %v5224_v8 }
 0x13e   : > { %7630 = vst [vmem:[#allocation32_spill] sm:$0xff] %v5226_v13  ;;  %3656 = vmatmul.msk.f32.gmra.mxu0 %vm739_vm1, %v4828_v18  ;;  %3672 = vmatmul.msk.f32.gmra.mxu1 %vm739_vm1, %v5229_v14 }
 0x13f   : > { %3688 = vmatmul.msk.f32.gmra.mxu2 %vm739_vm1, %v5229_v14  ;;  %3704 = vmatmul.msk.f32.gmra.mxu3 %vm739_vm1, %v5229_v14 }
 0x142   : > { %v5239_v17 = vpop.f32.mrf.mxu2  ;;  %v5241_v46 = vpop.f32.mrf.mxu3 }
 0x143   : > { %7631 = vst [vmem:[#allocation33_spill] sm:$0xff] %v5239_v17  ;;  %v5243_v30 = vpop.f32.mrf.mxu0  ;;  %v5245_v61 = vpop.f32.mrf.mxu1 }
 0x144   : > { %7632 = vst [vmem:[#allocation34_spill] sm:$0xff] %v5241_v46 }
 0x145   : > { %7633 = vst [vmem:[#allocation35_spill] sm:$0xff] %v5243_v30  ;;  %v3797_v30 = vld [vmem:[%s7584_s1 + $0x4d0] sm:$0xff] }
 0x146   : > { %7634 = vst [vmem:[#allocation36_spill] sm:$0xff] %v5245_v61  ;;  %3657 = vmatmul.msk.f32.gmra.mxu0 %vm739_vm1, %v4839_v19  ;;  %3673 = vmatmul.msk.f32.gmra.mxu1 %vm739_vm1, %v5248_v7  ;;  %v5462_v61 = vld [vmem:[%s4546_s29 + $0x138] sm:$0xff] }
 0x147   : > { %3689 = vmatmul.msk.f32.gmra.mxu2 %vm739_vm1, %v5248_v7  ;;  %3705 = vmatmul.msk.f32.gmra.mxu3 %vm739_vm1, %v5248_v7 }
 0x14a   : > { %v5258_v18 = vpop.f32.mrf.mxu2  ;;  %v5260_v17 = vpop.f32.mrf.mxu3 }
 0x14b   : > { %7635 = vst [vmem:[#allocation37_spill] sm:$0xff] %v5258_v18  ;;  %v5262_v46 = vpop.f32.mrf.mxu0  ;;  %v5264_v16 = vpop.f32.mrf.mxu1 }
 0x14c   : > { %7636 = vst [vmem:[#allocation38_spill] sm:$0xff] %v5260_v17 }
 0x14d   : > { %7637 = vst [vmem:[#allocation39_spill] sm:$0xff] %v5262_v46 }
 0x14e   : > { %7638 = vst [vmem:[#allocation40_spill] sm:$0xff] %v5264_v16  ;;  %3707 = vmatmul.msk.f32.vlgmr.msra.gmra.mxu0 %vm739_vm1, %v4850_v20  ;;  %3723 = vmatmul.msk.f32.vlgmr.msra.gmra.mxu1 %vm739_vm1, %v4850_v20  ;;  %v5437_v16 = vld [vmem:[%s4546_s29 + $0x130] sm:$0xff] }
 0x14f   : > { %3809 = vmatmul.msk.f32.vlgmr.msra.gmra.mxu2 %vm739_vm1, %v5267_v15  ;;  %3825 = vmatmul.msk.f32.vlgmr.msra.gmra.mxu3 %vm739_vm1, %v5267_v15 }
 0x152   : > { %v5277_v19 = vpop.f32.mrf.mxu2  ;;  %v5279_v17 = vpop.f32.mrf.mxu3 }
 0x153   : > { %7639 = vst [vmem:[#allocation41_spill] sm:$0xff] %v5277_v19  ;;  %v5281_v18 = vpop.f32.mrf.mxu0  ;;  %v5283_v62 = vpop.f32.mrf.mxu1 }
 0x154   : > { %7640 = vst [vmem:[#allocation42_spill] sm:$0xff] %v5279_v17 }
 0x155   : > { %7641 = vst [vmem:[#allocation43_spill] sm:$0xff] %v5281_v18 }
 0x156   : > { %3708 = vmatmul.msk.f32.gmra.mxu0 %vm739_vm1, %v4865_v23  ;;  %3724 = vmatmul.msk.f32.gmra.mxu1 %vm739_vm1, %v4865_v23 }
 0x157   : > { %3810 = vmatmul.msk.f32.gmra.mxu2 %vm739_vm1, %v5286_v63  ;;  %3826 = vmatmul.msk.f32.gmra.mxu3 %vm739_vm1, %v5286_v63 }
 0x15a   : > { %v5296_v20 = vpop.f32.mrf.mxu2  ;;  %v5298_v19 = vpop.f32.mrf.mxu3 }
 0x15b   : > { %7642 = vst [vmem:[#allocation44_spill] sm:$0xff] %v5298_v19  ;;  %v5300_v17 = vpop.f32.mrf.mxu0  ;;  %v5302_v35 = vpop.f32.mrf.mxu1 }
 0x15c   : > { %7643 = vst [vmem:[#allocation45_spill] sm:$0xff] %v5300_v17 }
 0x15e   : > { %3709 = vmatmul.msk.f32.gmra.mxu0 %vm739_vm1, %v4884_v34  ;;  %3725 = vmatmul.msk.f32.gmra.mxu1 %vm739_vm1, %v4884_v34 }
 0x15f   : > { %3811 = vmatmul.msk.f32.gmra.mxu2 %vm739_vm1, %v5305_v56  ;;  %3827 = vmatmul.msk.f32.gmra.mxu3 %vm739_vm1, %v5305_v56 }
 0x162   : > { %v5315_v23 = vpop.f32.mrf.mxu2  ;;  %v5317_v55 = vpop.f32.mrf.mxu3 }
 0x163   : > { %7644 = vst [vmem:[#allocation46_spill] sm:$0xff] %v5317_v55  ;;  %v5319_v41 = vpop.f32.mrf.mxu0  ;;  %v5321_v17 = vpop.f32.mrf.mxu1  ;;  %v3807_v55 = vld [vmem:[%s7584_s1 + $0x520] sm:$0x1] }
 0x164   : > { %7645 = vst [vmem:[#allocation47_spill] sm:$0xff] %v5319_v41  ;;  %3872 = vmatpush.msk.msrb.mxu2 %vm785_vm0, %v3807_v55  ;;  %v5408_v55 = vld [vmem:[%s4546_s29 + $0x128] sm:$0xff] }
 0x166   : > { %3710 = vmatmul.msk.f32.gmra.mxu0 %vm739_vm1, %v4903_v40  ;;  %3726 = vmatmul.msk.f32.gmra.mxu1 %vm739_vm1, %v4903_v40 }
 0x167   : > { %3812 = vmatmul.msk.f32.gmra.mxu2 %vm739_vm1, %v5324_v50  ;;  %3828 = vmatmul.msk.f32.gmra.mxu3 %vm739_vm1, %v5324_v50 }
 0x16a   : > { %v5334_v34 = vpop.f32.mrf.mxu2  ;;  %v5336_v41 = vpop.f32.mrf.mxu3 }
 0x16b   : > { %7646 = vst [vmem:[#allocation48_spill] sm:$0xff] %v5336_v41  ;;  %v5338_v29 = vpop.f32.mrf.mxu0  ;;  %v5340_v36 = vpop.f32.mrf.mxu1 }
 0x16c   : > { %7647 = vst [vmem:[#allocation49_spill] sm:$0xff] %v5338_v29 }
 0x16e   : > { %3711 = vmatmul.msk.f32.gmra.mxu0 %vm739_vm1, %v4922_v44  ;;  %3727 = vmatmul.msk.f32.gmra.mxu1 %vm739_vm1, %v4922_v44 }
 0x16f   : > { %3813 = vmatmul.msk.f32.gmra.mxu2 %vm739_vm1, %v5343_v45  ;;  %3829 = vmatmul.msk.f32.gmra.mxu3 %vm739_vm1, %v5343_v45 }
 0x172   : > { %v5353_v40 = vpop.f32.mrf.mxu2  ;;  %v5355_v29 = vpop.f32.mrf.mxu3 }
 0x173   : > { %7648 = vst [vmem:[#allocation50_spill] sm:$0xff] %v5355_v29  ;;  %v5357_v18 = vpop.f32.mrf.mxu0  ;;  %v5359_v28 = vpop.f32.mrf.mxu1 }
 0x174   : > { %7649 = vst [vmem:[#allocation51_spill] sm:$0xff] %v5357_v18 }
 0x176   : > { %3712 = vmatmul.msk.f32.gmra.mxu0 %vm739_vm1, %v4941_v49  ;;  %3728 = vmatmul.msk.f32.gmra.mxu1 %vm739_vm1, %v4941_v49  ;;  %v3805_v49 = vld [vmem:[%s7584_s1 + $0x510] sm:$0x1] }
 0x177   : > { %3814 = vmatmul.msk.f32.gmra.mxu2 %vm739_vm1, %v5362_v25  ;;  %3830 = vmatmul.msk.f32.gmra.mxu3 %vm739_vm1, %v5362_v25 }
 0x178   : > { %3840 = vmatpush.msk.msrb.mxu0 %vm785_vm0, %v3805_v49 }
 0x17a   : > { %v5372_v44 = vpop.f32.mrf.mxu2  ;;  %v5374_v29 = vpop.f32.mrf.mxu3 }
 0x17b   : > { %7650 = vst [vmem:[#allocation52_spill] sm:$0xff] %v5374_v29  ;;  %v5376_v18 = vpop.f32.mrf.mxu0  ;;  %v5378_v41 = vpop.f32.mrf.mxu1 }
 0x17c   : > { %7651 = vst [vmem:[#allocation53_spill] sm:$0xff] %v5376_v18 }
 0x17e   : > { %3713 = vmatmul.msk.f32.gmra.mxu0 %vm739_vm1, %v4960_v53  ;;  %3729 = vmatmul.msk.f32.gmra.mxu1 %vm739_vm1, %v4960_v53  ;;  %v3806_v53 = vld [vmem:[%s7584_s1 + $0x518] sm:$0x1] }
 0x17f   : > { %3815 = vmatmul.msk.f32.gmra.mxu2 %vm739_vm1, %v5381_v27  ;;  %3831 = vmatmul.msk.f32.gmra.mxu3 %vm739_vm1, %v5381_v27 }
 0x180   : > { %3856 = vmatpush.msk.msrb.mxu1 %vm785_vm0, %v3806_v53  ;;  %v3802_v53 = vld [vmem:[%s7584_s1 + $0x4f8] sm:$0xff] }
 0x181   : > { %1867 = vmatpush.msrb.mxu2 %v3802_v53 }
 0x182   : > { %v5399_v18 = vpop.f32.mrf.mxu2  ;;  %v5401_v29 = vpop.f32.mrf.mxu3 }
 0x183   : > { %7652 = vst [vmem:[#allocation54_spill] sm:$0xff] %v5401_v29  ;;  %v5403_v26 = vpop.f32.mrf.mxu0  ;;  %v5405_v49 = vpop.f32.mrf.mxu1  ;;  %1868 = vmatpush.msrb.mxu2 %v3797_v30  ;;  %v3791_v30 = vld [vmem:[%s7584_s1 + $0x4a0] sm:$0xff] }
 0x184   : > { %7653 = vst [vmem:[#allocation55_spill] sm:$0xff] %v5403_v26  ;;  %v3800_v26 = vld [vmem:[%s7584_s1 + $0x4e8] sm:$0xff] }
 0x185   : > { %1743 = vmatpush.msrb.mxu0 %v3800_v26  ;;  %v3801_v26 = vld [vmem:[%s7584_s1 + $0x4f0] sm:$0xff] }
 0x186   : > { %3714 = vmatmul.msk.f32.gmra.mxu0 %vm739_vm1, %v4987_v60  ;;  %3730 = vmatmul.msk.f32.gmra.mxu1 %vm739_vm1, %v4987_v60 }
 0x187   : > { %3816 = vmatmul.msk.f32.gmra.mxu2 %vm739_vm1, %v5408_v55  ;;  %3832 = vmatmul.msk.f32.gmra.mxu3 %vm739_vm1, %v5408_v55 }
 0x188   : > { %1805 = vmatpush.msrb.mxu1 %v3801_v26  ;;  %v3796_v26 = vld [vmem:[%s7584_s1 + $0x4c8] sm:$0xff] }
 0x18a   : > { %v5428_v29 = vpop.f32.mrf.mxu2  ;;  %v5430_v60 = vpop.f32.mrf.mxu3  ;;  %1806 = vmatpush.msrb.mxu1 %v3796_v26  ;;  %v3792_v26 = vld [vmem:[%s7584_s1 + $0x4a8] sm:$0xff] }
 0x18b   : > { %7654 = vst [vmem:[#allocation56_spill] sm:$0xff] %v5430_v60  ;;  %v5432_v19 = vpop.f32.mrf.mxu0  ;;  %v5434_v24 = vpop.f32.mrf.mxu1  ;;  %1869 = vmatpush.msrb.mxu2 %v3792_v26  ;;  %v3780_v26 = vld [vmem:[%s7584_s1 + $0x448] sm:$0xff] }
 0x18c   : > { %7655 = vst [vmem:[#allocation57_spill] sm:$0xff] %v5432_v19  ;;  %1807 = vmatpush.msrb.mxu1 %v3791_v30 }
 0x18d   : > { %7656 = vst [vmem:[#allocation58_spill] sm:$0xff] %v5434_v24  ;;  %v3782_v24 = vld [vmem:[%s7584_s1 + $0x458] sm:$0xff] }
 0x18e   : > { %3715 = vmatmul.msk.f32.gmra.mxu0 %vm739_vm1, %v5016_v2  ;;  %3731 = vmatmul.msk.f32.gmra.mxu1 %vm739_vm1, %v5016_v2  ;;  %v3795_v2 = vld [vmem:[%s7584_s1 + $0x4c0] sm:$0xff] }
 0x18f   : > { %3817 = vmatmul.msk.f32.gmra.mxu2 %vm739_vm1, %v5437_v16  ;;  %3833 = vmatmul.msk.f32.gmra.mxu3 %vm739_vm1, %v5437_v16 }
 0x190   : > { %1744 = vmatpush.msrb.mxu0 %v3795_v2  ;;  %v3790_v2 = vld [vmem:[%s7584_s1 + $0x498] sm:$0xff] }
 0x192   : > { %v5450_v53 = vpop.f32.mrf.mxu2  ;;  %v5452_v19 = vpop.f32.mrf.mxu3  ;;  %1745 = vmatpush.msrb.mxu0 %v3790_v2 }
 0x193   : > { %7657 = vst [vmem:[#allocation59_spill] sm:$0xff] %v5452_v19  ;;  %v5454_v60 = vpop.f32.mrf.mxu0  ;;  %v5456_v46 = vpop.f32.mrf.mxu1  ;;  %v3786_v19 = vld [vmem:[%s7584_s1 + $0x478] sm:$0xff] }
 0x194   : > { %7658 = vst [vmem:[#allocation60_spill] sm:$0xff] %v5454_v60  ;;  %v3787_v60 = vld [vmem:[%s7584_s1 + $0x480] sm:$0xff]  ;;  %1808 = vmatpush.msrb.mxu1 %v3786_v19 }
 0x195   : > { %1870 = vmatpush.msrb.mxu2 %v3787_v60  ;;  %v3775_v19 = vld [vmem:[%s7584_s1 + $0x420] sm:$0xff]  ;;  %v3776_v60 = vld [vmem:[%s7584_s1 + $0x428] sm:$0xff] }
 0x196   : > { %3716 = vmatmul.msk.f32.gmra.mxu0 %vm739_vm1, %v5037_v6  ;;  %3732 = vmatmul.msk.f32.gmra.mxu1 %vm739_vm1, %v5037_v6  ;;  %v3785_v6 = vld [vmem:[%s7584_s1 + $0x470] sm:$0xff] }
 0x197   : > { %3818 = vmatmul.msk.f32.gmra.mxu2 %vm739_vm1, %v5462_v61  ;;  %3834 = vmatmul.msk.f32.gmra.mxu3 %vm739_vm1, %v5462_v61 }
 0x198   : > { %1746 = vmatpush.msrb.mxu0 %v3785_v6  ;;  %1809 = vmatpush.msrb.mxu1 %v3781_v54  ;;  %v3777_v6 = vld [vmem:[%s7584_s1 + $0x430] sm:$0xff]  ;;  %v3771_v54 = vld [vmem:[%s7584_s1 + $0x400] sm:$0xff] }
 0x199   : > { %1871 = vmatpush.msrb.mxu2 %v3782_v24  ;;  %v3770_v24 = vld [vmem:[%s7584_s1 + $0x3f8] sm:$0xff] }
 0x19a   : > { %v5496_v13 = vpop.f32.mrf.mxu2  ;;  %v5498_v8 = vpop.f32.mrf.mxu3  ;;  %1747 = vmatpush.msrb.mxu0 %v3780_v26  ;;  %1810 = vmatpush.msrb.mxu1 %v3776_v60  ;;  %v3765_v26 = vld [vmem:[%s7584_s1 + $0x3d0] sm:$0xff] }
 0x19b   : > { %7659 = vst [vmem:[#allocation61_spill] sm:$0xff] %v5498_v8  ;;  %v5500_v2 = vpop.f32.mrf.mxu0  ;;  %v5502_v30 = vpop.f32.mrf.mxu1  ;;  %v5514_v8 = vld [vmem:[%s4546_s29 + $0x140] sm:$0xff]  ;;  %1872 = vmatpush.msrb.mxu2 %v3777_v6 }
 0x19c   : > { %7660 = vst [vmem:[#allocation62_spill] sm:$0xff] %v5500_v2  ;;  %1748 = vmatpush.msrb.mxu0 %v3775_v19  ;;  %v3766_v2 = vld [vmem:[%s7584_s1 + $0x3d8] sm:$0xff]  ;;  %1811 = vmatpush.msrb.mxu1 %v3771_v54  ;;  %v3767_v19 = vld [vmem:[%s7584_s1 + $0x3e0] sm:$0xff] }
 0x19d   : > { %7661 = vst [vmem:[#allocation63_spill] sm:$0xff] %v5502_v30  ;;  %v3762_v54 = vld [vmem:[%s7584_s1 + $0x3b8] sm:$0xff] }
 0x19e   : > { %3717 = vmatmul.msk.f32.gmra.mxu0 %vm739_vm1, %v5093_v4  ;;  %3733 = vmatmul.msk.f32.gmra.mxu1 %vm739_vm1, %v5093_v4  ;;  %v3772_v4 = vld [vmem:[%s7584_s1 + $0x408] sm:$0xff]  ;;  %v5597_v30 = vld [vmem:[%s4546_s29 + $0x150] sm:$0xff] }
 0x19f   : > { %3819 = vmatmul.msk.f32.gmra.mxu2 %vm739_vm1, %v5514_v8  ;;  %3835 = vmatmul.msk.f32.gmra.mxu3 %vm739_vm1, %v5514_v8 }
 0x1a0   : > { %1749 = vmatpush.msrb.mxu0 %v3770_v24  ;;  %1873 = vmatpush.msrb.mxu2 %v3772_v4  ;;  %v3761_v24 = vld [vmem:[%s7584_s1 + $0x3b0] sm:$0xff]  ;;  %v3756_v4 = vld [vmem:[%s7584_s1 + $0x388] sm:$0xff] }
 0x1a1   : > { %1812 = vmatpush.msrb.mxu1 %v3766_v2  ;;  %v3755_v2 = vld [vmem:[%s7584_s1 + $0x380] sm:$0xff] }
 0x1a2   : > { %v5548_v0 = vpop.f32.mrf.mxu2  ;;  %v5550_v33 = vpop.f32.mrf.mxu3  ;;  %1750 = vmatpush.msrb.mxu0 %v3765_v26  ;;  %1874 = vmatpush.msrb.mxu2 %v3767_v19 }
 0x1a3   : > { %7662 = vst [vmem:[#allocation64_spill] sm:$0xff] %v5550_v33  ;;  %v5555_v60 = vpop.f32.mrf.mxu0  ;;  %v5557_v6 = vpop.f32.mrf.mxu1  ;;  %v3760_v33 = vld [vmem:[%s7584_s1 + $0x3a8] sm:$0xff]  ;;  %1813 = vmatpush.msrb.mxu1 %v3761_v24 }
 0x1a4   : > { %7663 = vst [vmem:[#allocation65_spill] sm:$0xff] %v5555_v60  ;;  %1751 = vmatpush.msrb.mxu0 %v3760_v33  ;;  %1875 = vmatpush.msrb.mxu2 %v3762_v54 }
 0x1a5   : > { %7664 = vst [vmem:[#allocation66_spill] sm:$0xff] %v5557_v6  ;;  %1814 = vmatpush.msrb.mxu1 %v3756_v4  ;;  %v5616_v4 = vld [vmem:[%s4546_s29 + $0x158] sm:$0xff] }
 0x1a6   : > { %3718 = vmatmul.msk.f32.gmra.mxu0 %vm739_vm1, %v5164_v5  ;;  %3734 = vmatmul.msk.f32.gmra.mxu1 %vm739_vm1, %v5164_v5  ;;  %v3757_v5 = vld [vmem:[%s7584_s1 + $0x390] sm:$0xff] }
 0x1a7   : > { %3820 = vmatmul.msk.f32.gmra.mxu2 %vm739_vm1, %v5560_v59  ;;  %3836 = vmatmul.msk.f32.gmra.mxu3 %vm739_vm1, %v5560_v59 }
 0x1a8   : > { %1752 = vmatpush.msrb.mxu0 %v3755_v2  ;;  %1876 = vmatpush.msrb.mxu2 %v3757_v5 }
 0x1aa   : > { %v5588_v26 = vpop.f32.mrf.mxu2  ;;  %v5590_v19 = vpop.f32.mrf.mxu3 }
 0x1ab   : > { %7665 = vst [vmem:[#allocation67_spill] sm:$0xff] %v5590_v19  ;;  %v5592_v60 = vpop.f32.mrf.mxu0  ;;  %v5594_v6 = vpop.f32.mrf.mxu1 }
 0x1ac   : > { %7666 = vst [vmem:[#allocation68_spill] sm:$0xff] %v5592_v60  ;;  %v5635_v60 = vld [vmem:[%s4546_s29 + $0x160] sm:$0xff] }
 0x1ad   : > { %7672 = vst [vmem:[#allocation74_spill] sm:$0xff] %v5635_v60 }
 0x1ae   : > { %3719 = vmatmul.msk.f32.gmra.mxu0 %vm739_vm1, %v5210_v3  ;;  %3735 = vmatmul.msk.f32.gmra.mxu1 %vm739_vm1, %v5210_v3 }
 0x1af   : > { %3821 = vmatmul.msk.f32.gmra.mxu2 %vm739_vm1, %v5597_v30  ;;  %3837 = vmatmul.msk.f32.gmra.mxu3 %vm739_vm1, %v5597_v30 }
 0x1b2   : > { %v5607_v33 = vpop.f32.mrf.mxu2  ;;  %v5609_v24 = vpop.f32.mrf.mxu3 }
 0x1b3   : > { %7667 = vst [vmem:[#allocation69_spill] sm:$0xff] %v5609_v24  ;;  %v5611_v54 = vpop.f32.mrf.mxu0  ;;  %v5613_v2 = vpop.f32.mrf.mxu1 }
 0x1b4   : > { %7668 = vst [vmem:[#allocation70_spill] sm:$0xff] %v5611_v54 }
 0x1b6   : > { %3720 = vmatmul.msk.f32.gmra.mxu0 %vm739_vm1, %v5229_v14  ;;  %3736 = vmatmul.msk.f32.gmra.mxu1 %vm739_vm1, %v5229_v14 }
 0x1b7   : > { %3822 = vmatmul.msk.f32.gmra.mxu2 %vm739_vm1, %v5616_v4  ;;  %3838 = vmatmul.msk.f32.gmra.mxu3 %vm739_vm1, %v5616_v4 }
 0x1ba   : > { %v5626_v3 = vpop.f32.mrf.mxu2  ;;  %v5628_v5 = vpop.f32.mrf.mxu3 }
 0x1bb   : > { %7669 = vst [vmem:[#allocation71_spill] sm:$0xff] %v5628_v5  ;;  %v5630_v24 = vpop.f32.mrf.mxu0  ;;  %v5632_v54 = vpop.f32.mrf.mxu1 }
 0x1bc   : > { %7670 = vst [vmem:[#allocation72_spill] sm:$0xff] %v5630_v24 }
 0x1bd   : > { %7671 = vst [vmem:[#allocation73_spill] sm:$0xff] %v5632_v54 }
 0x1be   : > { %3721 = vmatmul.msk.f32.gmra.mxu0 %vm739_vm1, %v5248_v7  ;;  %3737 = vmatmul.msk.f32.gmra.mxu1 %vm739_vm1, %v5248_v7 }
 0x1bf   : > { %3823 = vmatmul.msk.f32.gmra.mxu2 %vm739_vm1, %v5635_v60  ;;  %3839 = vmatmul.msk.f32.gmra.mxu3 %vm739_vm1, %v5635_v60 }
 0x1c2   : > { %v5645_v14 = vpop.f32.mrf.mxu2  ;;  %v5647_v5 = vpop.f32.mrf.mxu3 }
 0x1c3   : > { %7673 = vst [vmem:[#allocation75_spill] sm:$0xff] %v5645_v14  ;;  %v5649_v24 = vpop.f32.mrf.mxu0  ;;  %v5651_v19 = vpop.f32.mrf.mxu1 }
 0x1c4   : > { %7674 = vst [vmem:[#allocation76_spill] sm:$0xff] %v5647_v5 }
 0x1c5   : > { %7675 = vst [vmem:[#allocation77_spill] sm:$0xff] %v5649_v24 }
 0x1c6   : > { %7676 = vst [vmem:[#allocation78_spill] sm:$0xff] %v5651_v19  ;;  %3841 = vmatmul.msk.f32.vlgmr.msrb.gmra.mxu0 %vm739_vm1, %v5267_v15  ;;  %3857 = vmatmul.msk.f32.vlgmr.msrb.gmra.mxu1 %vm739_vm1, %v5267_v15 }
 0x1c7   : > { %3873 = vmatmul.msk.f32.vlgmr.msrb.gmra.mxu2 %vm739_vm1, %v5267_v15  ;;  %v1251_v15 = vadd.f32 %v5296_v20, %v4862_v22 }
 0x1ca   : > { %v5659_v7 = vpop.f32.mrf.mxu2  ;;  %v5661_v54 = vpop.f32.mrf.mxu3 }
 0x1cb   : > { %7677 = vst [vmem:[#allocation79_spill] sm:$0xff] %v5659_v7  ;;  %v5663_v14 = vpop.f32.mrf.mxu0  ;;  %v5665_v5 = vpop.f32.mrf.mxu1 }
 0x1cc   : > { %7678 = vst [vmem:[#allocation80_spill] sm:$0xff] %v5661_v54 }
 0x1cd   : > { %7679 = vst [vmem:[#allocation81_spill] sm:$0xff] %v5663_v14 }
 0x1ce   : > { %7680 = vst [vmem:[#allocation82_spill] sm:$0xff] %v5665_v5  ;;  %3842 = vmatmul.msk.f32.gmra.mxu0 %vm739_vm1, %v5286_v63  ;;  %3858 = vmatmul.msk.f32.gmra.mxu1 %vm739_vm1, %v5286_v63 }
 0x1cf   : > { %3874 = vmatmul.msk.f32.gmra.mxu2 %vm739_vm1, %v5286_v63  ;;  %v1254_v63 = vadd.f32 %v5315_v23, %v4881_v32  ;;  %v5702_v32 = vld [vmem:[%s7585_s2] sm:$0x1f] }
 0x1d0   : > { %7685 = vst [vmem:[#allocation87_spill] sm:$0xff] %v5702_v32 }
 0x1d2   : > { %v1630_v24 = vpop.f32.mrf.mxu2  ;;  %v1692_v7 = vpop.f32.mrf.mxu3 }
 0x1d3   : > { %v1924_v19 = vadd.f32 %v1692_v7, %v1251_v15  ;;  %v5675_v54 = vpop.f32.mrf.mxu0  ;;  %v5677_v14 = vpop.f32.mrf.mxu1 }
 0x1d4   : > { %7681 = vst [vmem:[#allocation83_spill] sm:$0xff] %v5675_v54  ;;  %v5713_v54 = vperm.slane %v5702_v32, 0 }
 0x1d5   : > { %7682 = vst [vmem:[#allocation84_spill] sm:$0xff] %v5677_v14 }
 0x1d6   : > { %3843 = vmatmul.msk.f32.gmra.mxu0 %vm739_vm1, %v5305_v56  ;;  %3859 = vmatmul.msk.f32.gmra.mxu1 %vm739_vm1, %v5305_v56 }
 0x1d7   : > { %3875 = vmatmul.msk.f32.gmra.mxu2 %vm739_vm1, %v5305_v56  ;;  %v1257_v56 = vadd.f32 %v5334_v34, %v4900_v39  ;;  %v5716_v39 = vperm.slane %v5702_v32, 1  ;;  %v5721_v34 = vld [vmem:[%s7586_s3] sm:$0x1f] }
 0x1d8   : > { %7688 = vst [vmem:[#allocation90_spill] sm:$0xff] %v5721_v34 }
 0x1da   : > { %v1633_v22 = vpop.f32.mrf.mxu2  ;;  %v1695_v20 = vpop.f32.mrf.mxu3 }
 0x1db   : > { %v1929_v5 = vadd.f32 %v1695_v20, %v1254_v63  ;;  %v5687_v7 = vpop.f32.mrf.mxu0  ;;  %v5689_v15 = vpop.f32.mrf.mxu1  ;;  %v1189_v20 = vadd.f32 %v5283_v62, %v4860_v21  ;;  %v1198_v21 = vadd.f32 %v5340_v36, %v4917_v42  ;;  %v1260_v62 = vadd.f32 %v5353_v40, %v4919_v43 }
 0x1dc   : > { %7683 = vst [vmem:[#allocation85_spill] sm:$0xff] %v5687_v7 }
 0x1dd   : > { %7684 = vst [vmem:[#allocation86_spill] sm:$0xff] %v5689_v15 }
 0x1de   : > { %3844 = vmatmul.msk.f32.gmra.mxu0 %vm739_vm1, %v5324_v50  ;;  %3860 = vmatmul.msk.f32.gmra.mxu1 %vm739_vm1, %v5324_v50 }
 0x1df   : > { %3876 = vmatmul.msk.f32.gmra.mxu2 %vm739_vm1, %v5324_v50  ;;  %v1923_v50 = vadd.f32 %v1630_v24, %v1189_v20  ;;  %v5739_v20 = vperm.slane %v5721_v34, 1 }
 0x1e1   : > { %v2010_v24 = vmul.f32 %v5713_v54, %v1923_v50 }
 0x1e2   : > { %v1636_v23 = vpop.f32.mrf.mxu2  ;;  %v1698_v63 = vpop.f32.mrf.mxu3 }
 0x1e3   : > { %v5706_v15 = vadd.f32 %v1698_v63, %v1257_v56  ;;  %v5708_v7 = vpop.f32.mrf.mxu0  ;;  %v5710_v14 = vpop.f32.mrf.mxu1  ;;  %v5735_v56 = vperm.slane %v5721_v34, 0  ;;  %v2011_v63 = vmul.f32 %v5716_v39, %v1924_v19 }
 0x1e4   : > { %7686 = vst [vmem:[#allocation88_spill] sm:$0xff] %v5708_v7 }
 0x1e5   : > { %7687 = vst [vmem:[#allocation89_spill] sm:$0xff] %v5710_v14  ;;  %v1192_v14 = vadd.f32 %v5302_v35, %v4879_v31  ;;  %v2097_v50 = vadd.f32 %v5735_v56, %v2010_v24  ;;  %v2098_v60 = vadd.f32 %v5739_v20, %v2011_v63 }
 0x1e6   : > { %3845 = vmatmul.msk.f32.gmra.mxu0 %vm739_vm1, %v5343_v45  ;;  %3861 = vmatmul.msk.f32.gmra.mxu1 %vm739_vm1, %v5343_v45 }
 0x1e7   : > { %3877 = vmatmul.msk.f32.gmra.mxu2 %vm739_vm1, %v5343_v45  ;;  %v1928_v40 = vadd.f32 %v1633_v22, %v1192_v14  ;;  %v1201_v14 = vadd.f32 %v5359_v28, %v4936_v47  ;;  %v1263_v22 = vadd.f32 %v5372_v44, %v4938_v48 }
 0x1ea   : > { %v1639_v45 = vpop.f32.mrf.mxu2  ;;  %v1701_v7 = vpop.f32.mrf.mxu3 }
 0x1eb   : > { %v1938_v32 = vadd.f32 %v1639_v45, %v1198_v21  ;;  %v1939_v36 = vadd.f32 %v1701_v7, %v1260_v62  ;;  %v5743_v42 = vpop.f32.mrf.mxu0  ;;  %v5745_v43 = vpop.f32.mrf.mxu1  ;;  %v2015_v7 = vmul.f32 %v5713_v54, %v1928_v40  ;;  %v2172_v21 = vmax.f32 %v2097_v50, 0.0 }
 0x1ec   : > { %7689 = vst [vmem:[#allocation91_spill] sm:$0xff] %v5745_v43  ;;  %v2173_v62 = vmax.f32 %v2098_v60, 0.0 }
 0x1ed   : > { %v2025_v19 = vmul.f32 %v5713_v54, %v1938_v32  ;;  %v2026_v34 = vmul.f32 %v5716_v39, %v1939_v36  ;;  %v2016_v32 = vmul.f32 %v5716_v39, %v1929_v5  ;;  %v2102_v44 = vadd.f32 %v5735_v56, %v2015_v7 }
 0x1ee   : > { %3846 = vmatmul.msk.f32.gmra.mxu0 %vm739_vm1, %v5362_v25  ;;  %3862 = vmatmul.msk.f32.gmra.mxu1 %vm739_vm1, %v5362_v25  ;;  %v2021_v7 = vmul.f32 %v5716_v39, %v5706_v15 }
 0x1ef   : > { %v2112_v31 = vadd.f32 %v5735_v56, %v2025_v19  ;;  %v2113_v35 = vadd.f32 %v5739_v20, %v2026_v34  ;;  %3878 = vmatmul.msk.f32.gmra.mxu2 %vm739_vm1, %v5362_v25  ;;  %v1195_v34 = vadd.f32 %v5321_v17, %v4898_v37  ;;  %v2103_v60 = vadd.f32 %v5739_v20, %v2016_v32 }
 0x1f1   : > { %v2187_v24 = vmax.f32 %v2112_v31, 0.0  ;;  %v2188_v63 = vmax.f32 %v2113_v35, 0.0  ;;  %v1933_v5 = vadd.f32 %v1636_v23, %v1195_v34  ;;  %v1204_v23 = vadd.f32 %v5378_v41, %v4955_v51 }
 0x1f2   : > { %v1642_v45 = vpop.f32.mrf.mxu2  ;;  %v1704_v36 = vpop.f32.mrf.mxu3  ;;  %v1266_v31 = vadd.f32 %v5399_v18, %v4957_v52  ;;  %v2177_v35 = vmax.f32 %v2102_v44, 0.0  ;;  %v2108_v18 = vadd.f32 %v5739_v20, %v2021_v7  ;;  %v1269_v44 = vadd.f32 %v5428_v29, %v4984_v58 }
 0x1f3   : > { %v5767_v25 = vmax.f32 %v2172_v21, %v2187_v24  ;;  %v2248_v19 = vmax.f32 %v2173_v62, %v2188_v63  ;;  %v1943_v28 = vadd.f32 %v1642_v45, %v1201_v14  ;;  %v1944_v47 = vadd.f32 %v1704_v36, %v1263_v22  ;;  %v5769_v43 = vpop.f32.mrf.mxu0  ;;  %v5771_v48 = vpop.f32.mrf.mxu1 }
 0x1f4   : > { %v2178_v14 = vmax.f32 %v2103_v60, 0.0  ;;  %v2020_v22 = vmul.f32 %v5713_v54, %v1933_v5  ;;  %v2183_v5 = vmax.f32 %v2108_v18, 0.0  ;;  %v1272_v58 = vadd.f32 %v5450_v53, %v5013_v1 }
 0x1f5   : > { %v2030_v40 = vmul.f32 %v5713_v54, %v1943_v28  ;;  %v2031_v37 = vmul.f32 %v5716_v39, %v1944_v47 }
 0x1f6   : > { %3847 = vmatmul.msk.f32.gmra.mxu0 %vm739_vm1, %v5381_v27  ;;  %3863 = vmatmul.msk.f32.gmra.mxu1 %vm739_vm1, %v5381_v27  ;;  %v2107_v52 = vadd.f32 %v5735_v56, %v2020_v22 }
 0x1f7   : > { %v2117_v17 = vadd.f32 %v5735_v56, %v2030_v40  ;;  %v2118_v50 = vadd.f32 %v5739_v20, %v2031_v37  ;;  %3879 = vmatmul.msk.f32.gmra.mxu2 %vm739_vm1, %v5381_v27 }
 0x1f8   : > { %v2182_v60 = vmax.f32 %v2107_v52, 0.0 }
 0x1f9   : > { %v2192_v32 = vmax.f32 %v2117_v17, 0.0  ;;  %v2193_v21 = vmax.f32 %v2118_v50, 0.0 }
 0x1fa   : > { %v1645_v62 = vpop.f32.mrf.mxu2  ;;  %v1707_v24 = vpop.f32.mrf.mxu3 }
 0x1fb   : > { %v2253_v63 = vmax.f32 %v2178_v14, %v2193_v21  ;;  %v1948_v34 = vadd.f32 %v1645_v62, %v1204_v23  ;;  %v1949_v27 = vadd.f32 %v1707_v24, %v1266_v31  ;;  %v5792_v45 = vpop.f32.mrf.mxu0  ;;  %v5794_v41 = vpop.f32.mrf.mxu1  ;;  %v5796_v51 = vmax.f32 %v2177_v35, %v2192_v32 }
 0x1fd   : > { %v2035_v36 = vmul.f32 %v5713_v54, %v1948_v34  ;;  %v2036_v15 = vmul.f32 %v5716_v39, %v1949_v27 }
 0x1fe   : > { %3848 = vmatmul.msk.f32.gmra.mxu0 %vm739_vm1, %v5408_v55  ;;  %3864 = vmatmul.msk.f32.gmra.mxu1 %vm739_vm1, %v5408_v55 }
 0x1ff   : > { %v2122_v28 = vadd.f32 %v5735_v56, %v2035_v36  ;;  %v2123_v47 = vadd.f32 %v5739_v20, %v2036_v15  ;;  %3880 = vmatmul.msk.f32.gmra.mxu2 %vm739_vm1, %v5408_v55 }
 0x201   : > { %v2197_v40 = vmax.f32 %v2122_v28, 0.0  ;;  %v2198_v37 = vmax.f32 %v2123_v47, 0.0 }
 0x202   : > { %v5812_v17 = vpop.f32.mrf.mxu2  ;;  %v1710_v50 = vpop.f32.mrf.mxu3 }
 0x203   : > { %v5814_v23 = vmax.f32 %v2182_v60, %v2197_v40  ;;  %v2258_v31 = vmax.f32 %v2183_v5, %v2198_v37  ;;  %v1954_v35 = vadd.f32 %v1710_v50, %v1269_v44  ;;  %v5816_v14 = vpop.f32.mrf.mxu0  ;;  %v5818_v22 = vpop.f32.mrf.mxu1 }
 0x205   : > { %v2041_v55 = vmul.f32 %v5716_v39, %v1954_v35 }
 0x206   : > { %3849 = vmatmul.msk.f32.gmra.mxu0 %vm739_vm1, %v5437_v16  ;;  %3865 = vmatmul.msk.f32.gmra.mxu1 %vm739_vm1, %v5437_v16 }
 0x207   : > { %v2128_v29 = vadd.f32 %v5739_v20, %v2041_v55  ;;  %3881 = vmatmul.msk.f32.gmra.mxu2 %vm739_vm1, %v5437_v16  ;;  %v1275_v16 = vadd.f32 %v5496_v13, %v5045_v10  ;;  %v1278_v10 = vadd.f32 %v5548_v0, %v5100_v12  ;;  %v1213_v55 = vadd.f32 %v5456_v46, %v5043_v9 }
 0x209   : > { %v2203_v7 = vmax.f32 %v2128_v29, 0.0 }
 0x20a   : > { %v5830_v32 = vpop.f32.mrf.mxu2  ;;  %v1713_v21 = vpop.f32.mrf.mxu3 }
 0x20b   : > { %v2263_v62 = vmax.f32 %v2248_v19, %v2203_v7  ;;  %v1959_v24 = vadd.f32 %v1713_v21, %v1272_v58  ;;  %v5832_v34 = vpop.f32.mrf.mxu0  ;;  %v5834_v27 = vpop.f32.mrf.mxu1 }
 0x20d   : > { %v2046_v52 = vmul.f32 %v5716_v39, %v1959_v24  ;;  %v1207_v24 = vadd.f32 %v5405_v49, %v4982_v57  ;;  %v7691_v49 = vld [vmem:[#allocation27_spill] sm:$0xff] }
 0x20e   : > { %3850 = vmatmul.msk.f32.gmra.mxu0 %vm739_vm1, %v5462_v61  ;;  %3866 = vmatmul.msk.f32.gmra.mxu1 %vm739_vm1, %v5462_v61 }
 0x20f   : > { %v2133_v1 = vadd.f32 %v5739_v20, %v2046_v52  ;;  %3882 = vmatmul.msk.f32.gmra.mxu2 %vm739_vm1, %v5462_v61 }
 0x211   : > { %v2208_v53 = vmax.f32 %v2133_v1, 0.0  ;;  %v1953_v1 = vadd.f32 %v5812_v17, %v1207_v24  ;;  %v7692_v17 = vld [vmem:[#allocation28_spill] sm:$0xff] }
 0x212   : > { %v1654_v19 = vpop.f32.mrf.mxu2  ;;  %v1716_v18 = vpop.f32.mrf.mxu3 }
 0x213   : > { %v1964_v36 = vadd.f32 %v1716_v18, %v1275_v16  ;;  %v5846_v15 = vpop.f32.mrf.mxu0  ;;  %v5848_v28 = vpop.f32.mrf.mxu1  ;;  %v2268_v47 = vmax.f32 %v2253_v63, %v2208_v53  ;;  %v1963_v12 = vadd.f32 %v1654_v19, %v1213_v55  ;;  %v1222_v16 = vadd.f32 %v5594_v6, %v7691_v49 }
 0x214   : > { %v1284_v53 = vadd.f32 %v5607_v33, %v7692_v17 }
 0x215   : > { %v2051_v44 = vmul.f32 %v5716_v39, %v1964_v36  ;;  %v2050_v52 = vmul.f32 %v5713_v54, %v1963_v12  ;;  %v2040_v36 = vmul.f32 %v5713_v54, %v1953_v1 }
 0x216   : > { %3851 = vmatmul.msk.f32.gmra.mxu0 %vm739_vm1, %v5514_v8  ;;  %3867 = vmatmul.msk.f32.gmra.mxu1 %vm739_vm1, %v5514_v8 }
 0x217   : > { %v2138_v61 = vadd.f32 %v5739_v20, %v2051_v44  ;;  %3883 = vmatmul.msk.f32.gmra.mxu2 %vm739_vm1, %v5514_v8  ;;  %v1281_v8 = vadd.f32 %v5588_v26, %v5161_v38  ;;  %v7690_v38 = vld [vmem:[#allocation63_spill] sm:$0xff]  ;;  %v2137_v57 = vadd.f32 %v5735_v56, %v2050_v52  ;;  %v2127_v12 = vadd.f32 %v5735_v56, %v2040_v36 }
 0x218   : > { %v1216_v26 = vadd.f32 %v7690_v38, %v5098_v11  ;;  %v7697_v52 = vld [vmem:[#allocation31_spill] sm:$0xff] }
 0x219   : > { %v2213_v13 = vmax.f32 %v2138_v61, 0.0  ;;  %v2212_v55 = vmax.f32 %v2137_v57, 0.0 }
 0x21a   : > { %v1657_v60 = vpop.f32.mrf.mxu2  ;;  %v1719_v5 = vpop.f32.mrf.mxu3 }
 0x21b   : > { %v5860_v63 = vmax.f32 %v2258_v31, %v2213_v13  ;;  %v1969_v40 = vadd.f32 %v1719_v5, %v1278_v10  ;;  %v5862_v37 = vpop.f32.mrf.mxu0  ;;  %v5864_v50 = vpop.f32.mrf.mxu1  ;;  %v1968_v19 = vadd.f32 %v1657_v60, %v1216_v26  ;;  %v2272_v38 = vmax.f32 %v5814_v23, %v2212_v55  ;;  %v7700_v55 = vld [vmem:[#allocation35_spill] sm:$0xff] }
 0x21d   : > { %v2056_v35 = vmul.f32 %v5716_v39, %v1969_v40  ;;  %v7693_v40 = vld [vmem:[#allocation17_spill] sm:$0xff]  ;;  %v2055_v33 = vmul.f32 %v5713_v54, %v1968_v19 }
 0x21e   : > { %3852 = vmatmul.msk.f32.gmra.mxu0 %vm739_vm1, %v5560_v59  ;;  %3868 = vmatmul.msk.f32.gmra.mxu1 %vm739_vm1, %v5560_v59 }
 0x21f   : > { %v2143_v0 = vadd.f32 %v5739_v20, %v2056_v35  ;;  %3884 = vmatmul.msk.f32.gmra.mxu2 %vm739_vm1, %v5560_v59  ;;  %v7694_v35 = vld [vmem:[#allocation58_spill] sm:$0xff]  ;;  %v2142_v26 = vadd.f32 %v5735_v56, %v2055_v33  ;;  %v7701_v33 = vld [vmem:[#allocation73_spill] sm:$0xff] }
 0x220   : > { %v1210_v6 = vadd.f32 %v7694_v35, %v7693_v40  ;;  %v7699_v40 = vld [vmem:[#allocation74_spill] sm:$0xff] }
 0x221   : > { %v2218_v31 = vmax.f32 %v2143_v0, 0.0  ;;  %v2217_v23 = vmax.f32 %v2142_v26, 0.0 }
 0x222   : > { %v1660_v29 = vpop.f32.mrf.mxu2  ;;  %v1722_v58 = vpop.f32.mrf.mxu3 }
 0x223   : > { %v1974_v7 = vadd.f32 %v1722_v58, %v1281_v8  ;;  %v5878_v9 = vpop.f32.mrf.mxu0  ;;  %v5880_v46 = vpop.f32.mrf.mxu1  ;;  %v5882_v21 = vmax.f32 %v2263_v62, %v2218_v31  ;;  %v1958_v8 = vadd.f32 %v5830_v32, %v1210_v6  ;;  %v7696_v31 = vld [vmem:[#allocation66_spill] sm:$0xff]  ;;  %v7698_v32 = vld [vmem:[#allocation32_spill] sm:$0xff] }
 0x224   : > { %v1287_v1 = vadd.f32 %v5626_v3, %v7698_v32 }
 0x225   : > { %v2061_v59 = vmul.f32 %v5716_v39, %v1974_v7  ;;  %v2045_v17 = vmul.f32 %v5713_v54, %v1958_v8 }
 0x226   : > { %3853 = vmatmul.msk.f32.gmra.mxu0 %vm739_vm1, %v5597_v30  ;;  %3869 = vmatmul.msk.f32.gmra.mxu1 %vm739_vm1, %v5597_v30 }
 0x227   : > { %v2148_v62 = vadd.f32 %v5739_v20, %v2061_v59  ;;  %3885 = vmatmul.msk.f32.gmra.mxu2 %vm739_vm1, %v5597_v30  ;;  %v1225_v59 = vadd.f32 %v5613_v2, %v7697_v52 }
 0x229   : > { %v2223_v18 = vmax.f32 %v2148_v62, 0.0 }
 0x22a   : > { %v1663_v44 = vpop.f32.mrf.mxu2  ;;  %v1725_v61 = vpop.f32.mrf.mxu3 }
 0x22b   : > { %v1978_v11 = vadd.f32 %v1663_v44, %v1222_v16  ;;  %v1979_v10 = vadd.f32 %v1725_v61, %v1284_v53  ;;  %v5904_v13 = vpop.f32.mrf.mxu0  ;;  %v5906_v5 = vpop.f32.mrf.mxu1  ;;  %v5908_v30 = vmax.f32 %v2268_v47, %v2223_v18  ;;  %v7695_v47 = vld [vmem:[#allocation24_spill] sm:$0xff]  ;;  %v2202_v16 = vmax.f32 %v2127_v12, 0.0  ;;  %v7703_v12 = vld [vmem:[#allocation75_spill] sm:$0xff] }
 0x22c   : > { %v1219_v58 = vadd.f32 %v7696_v31, %v7695_v47 }
 0x22d   : > { %v2065_v60 = vmul.f32 %v5713_v54, %v1978_v11  ;;  %v2066_v0 = vmul.f32 %v5716_v39, %v1979_v10  ;;  %v2132_v10 = vadd.f32 %v5735_v56, %v2045_v17  ;;  %v2262_v6 = vmax.f32 %v5767_v25, %v2202_v16 }
 0x22e   : > { %3854 = vmatmul.msk.f32.gmra.mxu0 %vm739_vm1, %v5616_v4  ;;  %3870 = vmatmul.msk.f32.gmra.mxu1 %vm739_vm1, %v5616_v4  ;;  %v1973_v62 = vadd.f32 %v1660_v29, %v1219_v58 }
 0x22f   : > { %v2152_v7 = vadd.f32 %v5735_v56, %v2065_v60  ;;  %v2153_v24 = vadd.f32 %v5739_v20, %v2066_v0  ;;  %3886 = vmatmul.msk.f32.gmra.mxu2 %vm739_vm1, %v5616_v4  ;;  %v1228_v60 = vadd.f32 %v7701_v33, %v7700_v55  ;;  %v7702_v0 = vld [vmem:[#allocation36_spill] sm:$0xff] }
 0x230   : > { %v2060_v29 = vmul.f32 %v5713_v54, %v1973_v62  ;;  %v1290_v8 = vadd.f32 %v7703_v12, %v7702_v0 }
 0x231   : > { %v2227_v57 = vmax.f32 %v2152_v7, 0.0  ;;  %v2228_v49 = vmax.f32 %v2153_v24, 0.0  ;;  %v2277_v7 = vmax.f32 %v2262_v6, %v2217_v23  ;;  %v2207_v24 = vmax.f32 %v2132_v10, 0.0 }
 0x232   : > { %v1666_v53 = vpop.f32.mrf.mxu2  ;;  %v1728_v19 = vpop.f32.mrf.mxu3  ;;  %v2147_v47 = vadd.f32 %v5735_v56, %v2060_v29  ;;  %v7706_v29 = vld [vmem:[#allocation40_spill] sm:$0xff] }
 0x233   : > { %v1983_v18 = vadd.f32 %v1666_v53, %v1225_v59  ;;  %v1984_v4 = vadd.f32 %v1728_v19, %v1287_v1  ;;  %v5934_v36 = vpop.f32.mrf.mxu0  ;;  %v5936_v2 = vpop.f32.mrf.mxu1  ;;  %v5938_v44 = vmax.f32 %v2272_v38, %v2227_v57  ;;  %v5941_v3 = vmax.f32 %v5860_v63, %v2228_v49 }
 0x234   : > { %v2222_v16 = vmax.f32 %v2147_v47, 0.0  ;;  %v2267_v19 = vmax.f32 %v5796_v51, %v2207_v24 }
 0x235   : > { %v2070_v61 = vmul.f32 %v5713_v54, %v1983_v18  ;;  %v2071_v11 = vmul.f32 %v5716_v39, %v1984_v4  ;;  %v7704_v18 = vld [vmem:[#allocation39_spill] sm:$0xff]  ;;  %v7705_v4 = vld [vmem:[#allocation78_spill] sm:$0xff] }
 0x236   : > { %3855 = vmatmul.msk.f32.gmra.mxu0 %vm739_vm1, %v7699_v40  ;;  %3871 = vmatmul.msk.f32.gmra.mxu1 %vm739_vm1, %v7699_v40  ;;  %v1231_v23 = vadd.f32 %v7705_v4, %v7704_v18 }
 0x237   : > { %v2157_v35 = vadd.f32 %v5735_v56, %v2070_v61  ;;  %v2158_v63 = vadd.f32 %v5739_v20, %v2071_v11  ;;  %3887 = vmatmul.msk.f32.gmra.mxu2 %vm739_vm1, %v7699_v40  ;;  %v7707_v61 = vld [vmem:[#allocation79_spill] sm:$0xff]  ;;  %v2282_v40 = vmax.f32 %v2267_v19, %v2222_v16  ;;  %v7713_v19 = vld [vmem:[#allocation48_spill] sm:$0xff] }
 0x239   : > { %v2232_v31 = vmax.f32 %v2157_v35, 0.0  ;;  %v2233_v58 = vmax.f32 %v2158_v63, 0.0  ;;  %v7708_v35 = vld [vmem:[#allocation3_spill] sm:$0xff]  ;;  %v7709_v63 = vld [vmem:[#allocation44_spill] sm:$0xff] }
 0x23a   : > { %v1669_v52 = vpop.f32.mrf.mxu2  ;;  %v1731_v59 = vpop.f32.mrf.mxu3  ;;  %v1313_v6 = vadd.f32 %v7709_v63, %v7708_v35  ;;  %v7717_v35 = vld [vmem:[#allocation9_spill] sm:$0xff]  ;;  %v7718_v63 = vld [vmem:[#allocation50_spill] sm:$0xff] }
 0x23b   : > { %v1988_v32 = vadd.f32 %v1669_v52, %v1228_v60  ;;  %v1989_v1 = vadd.f32 %v1731_v59, %v1290_v8  ;;  %v5961_v38 = vpop.f32.mrf.mxu0  ;;  %v5963_v26 = vpop.f32.mrf.mxu1  ;;  %v5966_v25 = vmax.f32 %v5882_v21, %v2233_v58  ;;  %v5968_v62 = vmax.f32 %v2277_v7, %v2232_v31 }
 0x23c   : > { %v1293_v21 = vadd.f32 %v7707_v61, %v7706_v29  ;;  %v7714_v29 = vld [vmem:[#allocation4_spill] sm:$0xff]  ;;  %v7715_v61 = vld [vmem:[#allocation81_spill] sm:$0xff] }
 0x23d   : > { %v2075_v57 = vmul.f32 %v5713_v54, %v1988_v32  ;;  %v2076_v49 = vmul.f32 %v5716_v39, %v1989_v1  ;;  %v7710_v32 = vld [vmem:[#allocation5_spill] sm:$0xff]  ;;  %v7711_v1 = vld [vmem:[#allocation46_spill] sm:$0xff] }
 0x23f   : > { %v2163_v17 = vadd.f32 %v5739_v20, %v2076_v49  ;;  %v2162_v53 = vadd.f32 %v5735_v56, %v2075_v57  ;;  %v1316_v57 = vadd.f32 %v7711_v1, %v7710_v32  ;;  %v7725_v32 = vld [vmem:[#allocation83_spill] sm:$0xff] }
 0x241   : > { %v2238_v11 = vmax.f32 %v2163_v17, 0.0  ;;  %v2237_v10 = vmax.f32 %v2162_v53, 0.0 }
 0x242   : > { %v1672_v55 = vpop.f32.mrf.mxu2  ;;  %v1734_v33 = vpop.f32.mrf.mxu3 }
 0x243   : > { %v1993_v60 = vadd.f32 %v1672_v55, %v1231_v23  ;;  %v1994_v0 = vadd.f32 %v1734_v33, %v1293_v21  ;;  %v1754_v12 = vpop.f32.mrf.mxu0  ;;  %v1816_v8 = vpop.f32.mrf.mxu1  ;;  %v2298_v51 = vmax.f32 %v5908_v30, %v2238_v11  ;;  %v5982_v47 = vmax.f32 %v2282_v40, %v2237_v10  ;;  %v7716_v10 = vld [vmem:[#allocation87_spill] sm:$0xff]  ;;  %v7720_v33 = vld [vmem:[#allocation82_spill] sm:$0xff] }
 0x244   : > { %v1925_v31 = vadd.f32 %v1754_v12, %v1313_v6  ;;  %v1375_v21 = vadd.f32 %v7715_v61, %v7714_v29  ;;  %v1322_v6 = vadd.f32 %v7718_v63, %v7717_v35  ;;  %v7719_v55 = vld [vmem:[#allocation43_spill] sm:$0xff]  ;;  %v7722_v12 = vld [vmem:[#allocation88_spill] sm:$0xff] }
 0x245   : > { %v2080_v58 = vmul.f32 %v5713_v54, %v1993_v60  ;;  %v2081_v7 = vmul.f32 %v5716_v39, %v1994_v0  ;;  %2342 = vrot.lane.b32.xlu1 %v2298_v51, %s4214_s17  ;;  %2317 = vrot.lane.b32.xlu0 %v5982_v47, %s4215_s28  ;;  %v1437_v60 = vadd.f32 %v7720_v33, %v7719_v55  ;;  %v7721_v0 = vld [vmem:[#allocation10_spill] sm:$0xff]  ;;  %v7727_v63 = vld [vmem:[#allocation52_spill] sm:$0xff]  ;;  %v7728_v33 = vld [vmem:[#allocation49_spill] sm:$0xff] }
 0x246   : > { %v1926_v40 = vadd.f32 %v1816_v8, %v1375_v21 }
 0x247   : > { %v2167_v24 = vadd.f32 %v5735_v56, %v2080_v58  ;;  %v2168_v52 = vadd.f32 %v5739_v20, %v2081_v7  ;;  %v7712_v56 = vld [vmem:[#allocation7_spill] sm:$0xff]  ;;  %v7723_v7 = vld [vmem:[#allocation90_spill] sm:$0xff] }
 0x248   : > { %v1319_v20 = vadd.f32 %v7713_v19, %v7712_v56  ;;  %v6024_v8 = vperm.slane %v7723_v7, 3 }
 0x249   : > { %v2242_v59 = vmax.f32 %v2167_v24, 0.0  ;;  %v2243_v30 = vmax.f32 %v2168_v52, 0.0  ;;  %v6020_v24 = vperm.slane %v7723_v7, 2 }
 0x24a   : > { %v1878_v49 = vpop.f32.mrf.mxu2 }
 0x24b   : > { %v1757_v54 = vpop.f32.mrf.mxu0  ;;  %v1819_v16 = vpop.f32.mrf.mxu1  ;;  %v5994_v39 = vmax.f32 %v5938_v44, %v2242_v59  ;;  %v5997_v17 = vmax.f32 %v5941_v3, %v2243_v30  ;;  %v6007_v44 = vperm.slane %v7716_v10, 2  ;;  %v6010_v3 = vperm.slane %v7716_v10, 3  ;;  %v7724_v30 = vld [vmem:[#allocation6_spill] sm:$0xff] }
 0x24c   : > { %v1930_v53 = vadd.f32 %v1757_v54, %v1316_v57  ;;  %v1378_v1 = vadd.f32 %v7725_v32, %v7724_v30  ;;  %v1927_v57 = vadd.f32 %v1878_v49, %v1437_v60  ;;  %v6031_v54 = vperm.slane %v7716_v10, 4  ;;  %v7726_v10 = vld [vmem:[#allocation11_spill] sm:$0xff]  ;;  %v7729_v60 = vld [vmem:[#allocation89_spill] sm:$0xff] }
 0x24d   : > { %2319 = vrot.lane.b32.xlu0 %v2298_v51, %s4215_s28  ;;  %v1384_v51 = vadd.f32 %v7722_v12, %v7721_v0  ;;  %v2012_v58 = vmul.f32 %v6007_v44, %v1925_v31  ;;  %v2013_v52 = vmul.f32 %v6010_v3, %v1926_v40  ;;  %v6039_v49 = vperm.slane %v7723_v7, 4  ;;  %v7730_v12 = vld [vmem:[#allocation12_spill] sm:$0xff] }
 0x24e   : > { %v2014_v35 = vmul.f32 %v6031_v54, %v1927_v57  ;;  %v1325_v55 = vadd.f32 %v7727_v63, %v7726_v10  ;;  %v1446_v0 = vadd.f32 %v7729_v60, %v7728_v33 }
 0x24f   : > { %v2099_v29 = vadd.f32 %v6020_v24, %v2012_v58  ;;  %v2100_v61 = vadd.f32 %v6024_v8, %v2013_v52  ;;  %v2017_v58 = vmul.f32 %v6007_v44, %v1930_v53 }
 0x250   : > { %v2101_v10 = vadd.f32 %v6039_v49, %v2014_v35 }
 0x251   : > { %v2174_v30 = vmax.f32 %v2099_v29, 0.0  ;;  %v2175_v7 = vmax.f32 %v2100_v61, 0.0  ;;  %v2104_v61 = vadd.f32 %v6020_v24, %v2017_v58 }
 0x252   : > { %v1881_v18 = vpop.f32.mrf.mxu2 }
 0x253   : > { %v1760_v4 = vpop.f32.mrf.mxu0  ;;  %v1822_v23 = vpop.f32.mrf.mxu1 }
 0x254   : > { %v6004_v11 = vadd.f32 %v1760_v4, %v1319_v20  ;;  %v1931_v4 = vadd.f32 %v1819_v16, %v1378_v1 }
 0x256   : > { %v2018_v52 = vmul.f32 %v6010_v3, %v1931_v4 }
 0x25a   : > { %v6026_v59 = vpop.f32.mrf.mxu2 }
 0x25b   : > { %v1763_v56 = vpop.f32.mrf.mxu0  ;;  %v1825_v19 = vpop.f32.mrf.mxu1 }
 0x25c   : > { %v1940_v31 = vadd.f32 %v1763_v56, %v1322_v6  ;;  %v1941_v20 = vadd.f32 %v1825_v19, %v1384_v51  ;;  %v1387_v51 = vadd.f32 %v5743_v42, %v7730_v12  ;;  %v7731_v56 = vld [vmem:[#allocation45_spill] sm:$0xff]  ;;  %v7732_v19 = vld [vmem:[#allocation84_spill] sm:$0xff] }
 0x25e   : > { %v2027_v21 = vmul.f32 %v6007_v44, %v1940_v31  ;;  %v2028_v40 = vmul.f32 %v6010_v3, %v1941_v20  ;;  %v1440_v31 = vadd.f32 %v7732_v19, %v7731_v56  ;;  %v7733_v20 = vld [vmem:[#allocation8_spill] sm:$0xff] }
 0x260   : > { %v2114_v6 = vadd.f32 %v6020_v24, %v2027_v21  ;;  %v2115_v16 = vadd.f32 %v6024_v8, %v2028_v40  ;;  %v7734_v21 = vld [vmem:[#allocation85_spill] sm:$0xff] }
 0x261   : > { %v1381_v40 = vadd.f32 %v7734_v21, %v7733_v20 }
 0x262   : > { %v2189_v32 = vmax.f32 %v2114_v6, 0.0  ;;  %v2190_v1 = vmax.f32 %v2115_v16, 0.0  ;;  %v1887_v57 = vpop.f32.mrf.mxu2  ;;  %v2105_v6 = vadd.f32 %v6024_v8, %v2018_v52  ;;  %v1932_v16 = vadd.f32 %v1881_v18, %v1440_v31 }
 0x263   : > { %v1942_v63 = vadd.f32 %v1887_v57, %v1446_v0  ;;  %v1766_v33 = vpop.f32.mrf.mxu0  ;;  %v1828_v42 = vpop.f32.mrf.mxu1  ;;  %v1936_v56 = vadd.f32 %v1822_v23, %v1381_v40  ;;  %v7735_v0 = vld [vmem:[#allocation13_spill] sm:$0xff]  ;;  %v7736_v57 = vld [vmem:[#allocation54_spill] sm:$0xff]  ;;  %v2176_v52 = vmax.f32 %v2101_v10, 0.0  ;;  %v2179_v31 = vmax.f32 %v2104_v61, 0.0 }
 0x264   : > { %v6056_v60 = vmax.f32 %v2174_v30, %v2189_v32  ;;  %v6058_v53 = vmax.f32 %v2175_v7, %v2190_v1  ;;  %v1945_v4 = vadd.f32 %v1766_v33, %v1325_v55  ;;  %v1946_v29 = vadd.f32 %v1828_v42, %v1387_v51  ;;  %v7737_v32 = vld [vmem:[#allocation51_spill] sm:$0xff]  ;;  %v7739_v51 = vld [vmem:[#allocation14_spill] sm:$0xff] }
 0x265   : > { %v2029_v12 = vmul.f32 %v6031_v54, %v1942_v63  ;;  %v1328_v30 = vadd.f32 %v7736_v57, %v7735_v0  ;;  %v7738_v7 = vld [vmem:[#allocation91_spill] sm:$0xff]  ;;  %v1390_v58 = vadd.f32 %v5769_v43, %v7739_v51  ;;  %v2180_v20 = vmax.f32 %v2105_v6, 0.0  ;;  %v7741_v43 = vld [vmem:[#allocation86_spill] sm:$0xff] }
 0x266   : > { %v2032_v19 = vmul.f32 %v6007_v44, %v1945_v4  ;;  %v2033_v35 = vmul.f32 %v6010_v3, %v1946_v29  ;;  %v1449_v1 = vadd.f32 %v7738_v7, %v7737_v32  ;;  %v2019_v21 = vmul.f32 %v6031_v54, %v1932_v16 }
 0x267   : > { %v2116_v55 = vadd.f32 %v6039_v49, %v2029_v12  ;;  %v2022_v63 = vmul.f32 %v6007_v44, %v6004_v11  ;;  %v2023_v33 = vmul.f32 %v6010_v3, %v1936_v56  ;;  %v7740_v12 = vld [vmem:[#allocation47_spill] sm:$0xff] }
 0x268   : > { %v2119_v18 = vadd.f32 %v6020_v24, %v2032_v19  ;;  %v2120_v23 = vadd.f32 %v6024_v8, %v2033_v35  ;;  %v1443_v10 = vadd.f32 %v7741_v43, %v7740_v12  ;;  %v2106_v11 = vadd.f32 %v6039_v49, %v2019_v21 }
 0x269   : > { %v2191_v40 = vmax.f32 %v2116_v55, 0.0  ;;  %v2109_v55 = vadd.f32 %v6020_v24, %v2022_v63  ;;  %v2110_v51 = vadd.f32 %v6024_v8, %v2023_v33 }
 0x26a   : > { %v2194_v42 = vmax.f32 %v2119_v18, 0.0  ;;  %v2195_v4 = vmax.f32 %v2120_v23, 0.0  ;;  %v1890_v29 = vpop.f32.mrf.mxu2  ;;  %v1937_v56 = vadd.f32 %v6026_v59, %v1443_v10  ;;  %v7742_v23 = vld [vmem:[#allocation15_spill] sm:$0xff]  ;;  %v2181_v33 = vmax.f32 %v2106_v11, 0.0 }
 0x26b   : > { %v2251_v0 = vmax.f32 %v2176_v52, %v2191_v40  ;;  %v1947_v19 = vadd.f32 %v1890_v29, %v1449_v1  ;;  %v1769_v57 = vpop.f32.mrf.mxu0  ;;  %v1831_v35 = vpop.f32.mrf.mxu1  ;;  %v7745_v40 = vld [vmem:[#allocation16_spill] sm:$0xff]  ;;  %v2184_v29 = vmax.f32 %v2109_v55, 0.0  ;;  %v2185_v12 = vmax.f32 %v2110_v51, 0.0 }
 0x26c   : > { %v6080_v61 = vmax.f32 %v2179_v31, %v2194_v42  ;;  %v6082_v6 = vmax.f32 %v2180_v20, %v2195_v4  ;;  %v1950_v16 = vadd.f32 %v1769_v57, %v1328_v30  ;;  %v1951_v32 = vadd.f32 %v1831_v35, %v1390_v58  ;;  %v7743_v31 = vld [vmem:[#allocation56_spill] sm:$0xff]  ;;  %v7744_v58 = vld [vmem:[#allocation53_spill] sm:$0xff] }
 0x26d   : > { %v2034_v7 = vmul.f32 %v6031_v54, %v1947_v19  ;;  %v1331_v30 = vadd.f32 %v7743_v31, %v7742_v23  ;;  %v1452_v20 = vadd.f32 %v5771_v48, %v7744_v58  ;;  %v1393_v63 = vadd.f32 %v5792_v45, %v7745_v40  ;;  %v7746_v31 = vld [vmem:[#allocation55_spill] sm:$0xff] }
 0x26e   : > { %v2037_v1 = vmul.f32 %v6007_v44, %v1950_v16  ;;  %v2038_v52 = vmul.f32 %v6010_v3, %v1951_v32  ;;  %v2024_v42 = vmul.f32 %v6031_v54, %v1937_v56  ;;  %v1455_v58 = vadd.f32 %v5794_v41, %v7746_v31  ;;  %v7750_v31 = vld [vmem:[#allocation60_spill] sm:$0xff] }
 0x26f   : > { %v2121_v18 = vadd.f32 %v6039_v49, %v2034_v7 }
 0x270   : > { %v2124_v59 = vadd.f32 %v6020_v24, %v2037_v1  ;;  %v2125_v21 = vadd.f32 %v6024_v8, %v2038_v52  ;;  %v2111_v45 = vadd.f32 %v6039_v49, %v2024_v42 }
 0x271   : > { %v2196_v4 = vmax.f32 %v2121_v18, 0.0 }
 0x272   : > { %v2199_v43 = vmax.f32 %v2124_v59, 0.0  ;;  %v2200_v10 = vmax.f32 %v2125_v21, 0.0  ;;  %v1893_v19 = vpop.f32.mrf.mxu2 }
 0x273   : > { %v6101_v57 = vmax.f32 %v2181_v33, %v2196_v4  ;;  %v1952_v35 = vadd.f32 %v1893_v19, %v1452_v20  ;;  %v1772_v48 = vpop.f32.mrf.mxu0  ;;  %v1834_v16 = vpop.f32.mrf.mxu1  ;;  %v2186_v20 = vmax.f32 %v2111_v45, 0.0  ;;  %v7747_v19 = vld [vmem:[#allocation20_spill] sm:$0xff] }
 0x274   : > { %v2259_v32 = vmax.f32 %v2184_v29, %v2199_v43  ;;  %v2260_v7 = vmax.f32 %v2185_v12, %v2200_v10  ;;  %v1955_v1 = vadd.f32 %v1772_v48, %v1331_v30  ;;  %v1956_v52 = vadd.f32 %v1834_v16, %v1393_v63  ;;  %v7749_v16 = vld [vmem:[#allocation21_spill] sm:$0xff] }
 0x275   : > { %v2039_v11 = vmul.f32 %v6031_v54, %v1952_v35  ;;  %v7748_v35 = vld [vmem:[#allocation61_spill] sm:$0xff] }
 0x276   : > { %v2042_v56 = vmul.f32 %v6007_v44, %v1955_v1  ;;  %v2043_v55 = vmul.f32 %v6010_v3, %v1956_v52  ;;  %v1337_v48 = vadd.f32 %v7748_v35, %v7747_v19  ;;  %v1399_v1 = vadd.f32 %v5832_v34, %v7749_v16  ;;  %v7751_v16 = vld [vmem:[#allocation23_spill] sm:$0xff] }
 0x277   : > { %v2126_v51 = vadd.f32 %v6039_v49, %v2039_v11 }
 0x278   : > { %v2129_v18 = vadd.f32 %v6020_v24, %v2042_v56  ;;  %v2130_v23 = vadd.f32 %v6024_v8, %v2043_v55 }
 0x279   : > { %v2201_v30 = vmax.f32 %v2126_v51, 0.0 }
 0x27a   : > { %v2204_v59 = vmax.f32 %v2129_v18, 0.0  ;;  %v2205_v21 = vmax.f32 %v2130_v23, 0.0  ;;  %v1896_v40 = vpop.f32.mrf.mxu2 }
 0x27b   : > { %v2261_v63 = vmax.f32 %v2186_v20, %v2201_v30  ;;  %v1957_v33 = vadd.f32 %v1896_v40, %v1455_v58  ;;  %v1775_v42 = vpop.f32.mrf.mxu0  ;;  %v1837_v4 = vpop.f32.mrf.mxu1  ;;  %v1461_v58 = vadd.f32 %v5834_v27, %v7750_v31 }
 0x27c   : > { %v6113_v29 = vmax.f32 %v6056_v60, %v2204_v59  ;;  %v6116_v12 = vmax.f32 %v6058_v53, %v2205_v21 }
 0x27d   : > { %v2044_v43 = vmul.f32 %v6031_v54, %v1957_v33 }
 0x27f   : > { %v2131_v10 = vadd.f32 %v6039_v49, %v2044_v43 }
 0x281   : > { %v2206_v41 = vmax.f32 %v2131_v10, 0.0 }
 0x282   : > { %v1899_v52 = vpop.f32.mrf.mxu2 }
 0x283   : > { %v6124_v45 = vmax.f32 %v2251_v0, %v2206_v41  ;;  %v1778_v11 = vpop.f32.mrf.mxu0  ;;  %v1840_v60 = vpop.f32.mrf.mxu1 }
 0x284   : > { %v1965_v56 = vadd.f32 %v1778_v11, %v1337_v48  ;;  %v1966_v55 = vadd.f32 %v1840_v60, %v1399_v1  ;;  %v1402_v1 = vadd.f32 %v5846_v15, %v7751_v16 }
 0x286   : > { %v2052_v53 = vmul.f32 %v6007_v44, %v1965_v56  ;;  %v2053_v51 = vmul.f32 %v6010_v3, %v1966_v55  ;;  %v7753_v55 = vld [vmem:[#allocation59_spill] sm:$0xff] }
 0x288   : > { %v2139_v18 = vadd.f32 %v6020_v24, %v2052_v53  ;;  %v2140_v23 = vadd.f32 %v6024_v8, %v2053_v51  ;;  %v7754_v51 = vld [vmem:[#allocation19_spill] sm:$0xff] }
 0x28a   : > { %v2214_v20 = vmax.f32 %v2139_v18, 0.0  ;;  %v2215_v34 = vmax.f32 %v2140_v23, 0.0  ;;  %v1902_v30 = vpop.f32.mrf.mxu2  ;;  %v1396_v18 = vadd.f32 %v5816_v14, %v7754_v51  ;;  %v7755_v23 = vld [vmem:[#allocation62_spill] sm:$0xff]  ;;  %v7762_v51 = vld [vmem:[#allocation33_spill] sm:$0xff] }
 0x28b   : > { %v1967_v0 = vadd.f32 %v1902_v30, %v1461_v58  ;;  %v6132_v59 = vpop.f32.mrf.mxu0  ;;  %v1843_v21 = vpop.f32.mrf.mxu1  ;;  %v7756_v58 = vld [vmem:[#allocation25_spill] sm:$0xff] }
 0x28c   : > { %v6134_v40 = vmax.f32 %v2259_v32, %v2214_v20  ;;  %v6136_v33 = vmax.f32 %v2260_v7, %v2215_v34  ;;  %v1971_v11 = vadd.f32 %v1843_v21, %v1402_v1  ;;  %v7752_v7 = vld [vmem:[#allocation18_spill] sm:$0xff]  ;;  %v7757_v20 = vld [vmem:[#allocation67_spill] sm:$0xff]  ;;  %v1961_v30 = vadd.f32 %v1837_v4, %v1396_v18 }
 0x28d   : > { %v2054_v43 = vmul.f32 %v6031_v54, %v1967_v0  ;;  %v1334_v53 = vadd.f32 %v7753_v55, %v7752_v7  ;;  %v1343_v34 = vadd.f32 %v7757_v20, %v7756_v58  ;;  %v7758_v0 = vld [vmem:[#allocation26_spill] sm:$0xff]  ;;  %v7763_v18 = vld [vmem:[#allocation71_spill] sm:$0xff]  ;;  %v7766_v58 = vld [vmem:[#allocation76_spill] sm:$0xff] }
 0x28e   : > { %v2058_v31 = vmul.f32 %v6010_v3, %v1971_v11  ;;  %v1405_v21 = vadd.f32 %v5862_v37, %v7758_v0  ;;  %v2048_v11 = vmul.f32 %v6010_v3, %v1961_v30  ;;  %v7760_v37 = vld [vmem:[#allocation22_spill] sm:$0xff]  ;;  %v7767_v0 = vld [vmem:[#allocation65_spill] sm:$0xff] }
 0x28f   : > { %v2141_v10 = vadd.f32 %v6039_v49, %v2054_v43  ;;  %v1960_v15 = vadd.f32 %v1775_v42, %v1334_v53 }
 0x290   : > { %v2145_v14 = vadd.f32 %v6024_v8, %v2058_v31  ;;  %v7765_v31 = vld [vmem:[#allocation37_spill] sm:$0xff] }
 0x291   : > { %v2216_v41 = vmax.f32 %v2141_v10, 0.0  ;;  %v1352_v20 = vadd.f32 %v7766_v58, %v7765_v31 }
 0x292   : > { %v1905_v19 = vpop.f32.mrf.mxu2 }
 0x293   : > { %v6140_v35 = vmax.f32 %v2261_v63, %v2216_v41  ;;  %v1784_v27 = vpop.f32.mrf.mxu0  ;;  %v1846_v48 = vpop.f32.mrf.mxu1  ;;  %v1464_v63 = vadd.f32 %v5848_v28, %v7755_v23  ;;  %v7759_v41 = vld [vmem:[#allocation34_spill] sm:$0xff]  ;;  %v2047_v28 = vmul.f32 %v6007_v44, %v1960_v15  ;;  %v7764_v23 = vld [vmem:[#allocation57_spill] sm:$0xff] }
 0x294   : > { %v1975_v10 = vadd.f32 %v1784_v27, %v1343_v34  ;;  %v1411_v16 = vadd.f32 %v5904_v13, %v7759_v41  ;;  %v1976_v1 = vadd.f32 %v1846_v48, %v1405_v21  ;;  %v6169_v13 = vadd.f32 %v7763_v18, %v7762_v51  ;;  %v7771_v51 = vld [vmem:[#allocation38_spill] sm:$0xff] }
 0x295   : > { %v1972_v43 = vadd.f32 %v1905_v19, %v1464_v63  ;;  %v7761_v19 = vld [vmem:[#allocation64_spill] sm:$0xff]  ;;  %v1458_v48 = vadd.f32 %v5818_v22, %v7764_v23  ;;  %v2220_v34 = vmax.f32 %v2145_v14, 0.0  ;;  %v1467_v21 = vadd.f32 %v5864_v50, %v7767_v0 }
 0x296   : > { %v1340_v27 = vadd.f32 %v7761_v19, %v7760_v37  ;;  %v2062_v63 = vmul.f32 %v6007_v44, %v1975_v10  ;;  %v2063_v15 = vmul.f32 %v6010_v3, %v1976_v1  ;;  %v2135_v41 = vadd.f32 %v6024_v8, %v2048_v11  ;;  %v7769_v10 = vld [vmem:[#allocation68_spill] sm:$0xff]  ;;  %v7770_v19 = vld [vmem:[#allocation70_spill] sm:$0xff] }
 0x297   : > { %v2059_v4 = vmul.f32 %v6031_v54, %v1972_v43  ;;  %v2134_v43 = vadd.f32 %v6020_v24, %v2047_v28  ;;  %v1470_v37 = vadd.f32 %v5880_v46, %v7769_v10  ;;  %v1414_v50 = vadd.f32 %v5934_v36, %v7771_v51 }
 0x298   : > { %v2149_v28 = vadd.f32 %v6020_v24, %v2062_v63  ;;  %v2280_v46 = vmax.f32 %v6116_v12, %v2220_v34 }
 0x299   : > { %v2146_v14 = vadd.f32 %v6039_v49, %v2059_v4  ;;  %v2210_v4 = vmax.f32 %v2135_v41, 0.0 }
 0x29a   : > { %v1908_v60 = vpop.f32.mrf.mxu2 }
 0x29b   : > { %v6144_v56 = vpop.f32.mrf.mxu0  ;;  %v1849_v32 = vpop.f32.mrf.mxu1  ;;  %v1977_v11 = vadd.f32 %v1908_v60, %v1467_v21  ;;  %v2221_v0 = vmax.f32 %v2146_v14, 0.0  ;;  %v7772_v60 = vld [vmem:[#allocation72_spill] sm:$0xff] }
 0x29c   : > { %v1476_v63 = vadd.f32 %v5936_v2, %v7772_v60 }
 0x29d   : > { %v2281_v51 = vmax.f32 %v6124_v45, %v2221_v0 }
 0x2a2   : > { %v1911_v7 = vpop.f32.mrf.mxu2 }
 0x2a3   : > { %v6162_v55 = vpop.f32.mrf.mxu0  ;;  %v1852_v42 = vpop.f32.mrf.mxu1 }
 0x2a4   : > { %v1986_v53 = vadd.f32 %v1852_v42, %v1411_v16  ;;  %v1962_v16 = vadd.f32 %v1899_v52, %v1458_v48  ;;  %v7768_v42 = vld [vmem:[#allocation30_spill] sm:$0xff]  ;;  %v2150_v52 = vadd.f32 %v6024_v8, %v2063_v15  ;;  %v2209_v48 = vmax.f32 %v2134_v43, 0.0 }
 0x2a5   : > { %v1408_v22 = vadd.f32 %v5878_v9, %v7768_v42  ;;  %v2064_v15 = vmul.f32 %v6031_v54, %v1977_v11 }
 0x2a6   : > { %v2073_v30 = vmul.f32 %v6010_v3, %v1986_v53  ;;  %v1473_v53 = vadd.f32 %v5906_v5, %v7770_v19  ;;  %v2049_v31 = vmul.f32 %v6031_v54, %v1962_v16  ;;  %v2225_v34 = vmax.f32 %v2150_v52, 0.0  ;;  %v7773_v16 = vld [vmem:[#allocation42_spill] sm:$0xff] }
 0x2a7   : > { %v1981_v18 = vadd.f32 %v1849_v32, %v1408_v22  ;;  %v2224_v32 = vmax.f32 %v2149_v28, 0.0  ;;  %v2269_v2 = vmax.f32 %v6080_v61, %v2209_v48  ;;  %v1982_v28 = vadd.f32 %v1911_v7, %v1470_v37 }
 0x2a8   : > { %v2160_v1 = vadd.f32 %v6024_v8, %v2073_v30  ;;  %v2136_v22 = vadd.f32 %v6039_v49, %v2049_v31  ;;  %v1985_v37 = vadd.f32 %v6162_v55, %v6169_v13  ;;  %v7774_v55 = vld [vmem:[#allocation77_spill] sm:$0xff] }
 0x2a9   : > { %v2068_v21 = vmul.f32 %v6010_v3, %v1981_v18  ;;  %v2284_v52 = vmax.f32 %v2269_v2, %v2224_v32  ;;  %v2069_v7 = vmul.f32 %v6031_v54, %v1982_v28  ;;  %v1479_v13 = vadd.f32 %v5963_v26, %v7774_v55 }
 0x2aa   : > { %v2235_v9 = vmax.f32 %v2160_v1, 0.0  ;;  %v1914_v23 = vpop.f32.mrf.mxu2  ;;  %v2270_v1 = vmax.f32 %v6082_v6, %v2210_v4  ;;  %v2211_v61 = vmax.f32 %v2136_v22, 0.0  ;;  %v1970_v6 = vadd.f32 %v6132_v59, %v1340_v27 }
 0x2ab   : > { %v1987_v58 = vadd.f32 %v1914_v23, %v1473_v53  ;;  %v1793_v30 = vpop.f32.mrf.mxu0  ;;  %v1855_v5 = vpop.f32.mrf.mxu1  ;;  %v2072_v32 = vmul.f32 %v6007_v44, %v1985_v37 }
 0x2ac   : > { %v1990_v42 = vadd.f32 %v1793_v30, %v1352_v20  ;;  %v1991_v36 = vadd.f32 %v1855_v5, %v1414_v50  ;;  %v6196_v10 = vmax.f32 %v2280_v46, %v2235_v9  ;;  %v1417_v20 = vadd.f32 %v5961_v38, %v7773_v16 }
 0x2ad   : > { %v2074_v12 = vmul.f32 %v6031_v54, %v1987_v58  ;;  %v2151_v50 = vadd.f32 %v6039_v49, %v2064_v15  ;;  %v2155_v38 = vadd.f32 %v6024_v8, %v2068_v21  ;;  %v2285_v46 = vmax.f32 %v2270_v1, %v2225_v34 }
 0x2ae   : > { %v2077_v43 = vmul.f32 %v6007_v44, %v1990_v42  ;;  %v2078_v41 = vmul.f32 %v6010_v3, %v1991_v36  ;;  %v2271_v59 = vmax.f32 %v6101_v57, %v2211_v61  ;;  %v2057_v27 = vmul.f32 %v6007_v44, %v1970_v6  ;;  %v3992_v61 = vld [vmem:[%s7587_s4 + $0x700] sm:$0xff] }
 0x2af   : > { %v2161_v14 = vadd.f32 %v6039_v49, %v2074_v12  ;;  %v2226_v5 = vmax.f32 %v2151_v50, 0.0  ;;  %v2230_v42 = vmax.f32 %v2155_v38, 0.0  ;;  %v2159_v26 = vadd.f32 %v6020_v24, %v2072_v32  ;;  %v7778_v38 = vld [vmem:[#allocation80_spill] sm:$0xff]  ;;  %v3966_v32 = vld [vmem:[%s7587_s4 + $0x630] sm:$0xff] }
 0x2b0   : > { %v2165_v19 = vadd.f32 %v6024_v8, %v2078_v41  ;;  %v2164_v53 = vadd.f32 %v6020_v24, %v2077_v43  ;;  %v2144_v43 = vadd.f32 %v6020_v24, %v2057_v27  ;;  %v3972_v27 = vld [vmem:[%s7587_s4 + $0x660] sm:$0xff] }
 0x2b1   : > { %v2236_v11 = vmax.f32 %v2161_v14, 0.0  ;;  %v2286_v12 = vmax.f32 %v2271_v59, %v2226_v5  ;;  %v2290_v21 = vmax.f32 %v6136_v33, %v2230_v42  ;;  %v2234_v33 = vmax.f32 %v2159_v26, 0.0  ;;  %v3990_v5 = vld [vmem:[%s7587_s4 + $0x6f0] sm:$0xff]  ;;  %v3981_v42 = vld [vmem:[%s7587_s4 + $0x6a8] sm:$0xff]  ;;  %v3940_v26 = vld [vmem:[%s7587_s4 + $0x560] sm:$0xff] }
 0x2b2   : > { %v2240_v18 = vmax.f32 %v2165_v19, 0.0  ;;  %v1917_v9 = vpop.f32.mrf.mxu2  ;;  %v2239_v23 = vmax.f32 %v2164_v53, 0.0  ;;  %v2219_v14 = vmax.f32 %v2144_v43, 0.0  ;;  %v3944_v43 = vld [vmem:[%s7587_s4 + $0x580] sm:$0xff] }
 0x2b3   : > { %v1992_v48 = vadd.f32 %v1917_v9, %v1476_v63  ;;  %v1858_v4 = vpop.f32.mrf.mxu1  ;;  %v2296_v31 = vmax.f32 %v2281_v51, %v2236_v11  ;;  %v1796_v11 = vpop.f32.mrf.mxu0 }
 0x2b4   : > { %v1996_v58 = vadd.f32 %v1858_v4, %v1417_v20  ;;  %v2299_v30 = vmax.f32 %v2284_v52, %v2239_v23  ;;  %v2300_v45 = vmax.f32 %v2285_v46, %v2240_v18  ;;  %v2279_v53 = vmax.f32 %v6113_v29, %v2219_v14  ;;  %v7777_v52 = vld [vmem:[#allocation41_spill] sm:$0xff]  ;;  %v4006_v46 = vld [vmem:[%s7587_s4 + $0x770] sm:$0xff]  ;;  %v3997_v4 = vld [vmem:[%s7587_s4 + $0x728] sm:$0xff] }
 0x2b5   : > { %v2079_v0 = vmul.f32 %v6031_v54, %v1992_v48  ;;  %v4004_v23 = vld [vmem:[%s7587_s4 + $0x760] sm:$0xff]  ;;  %2776 = vmatpush.msra.mxu2 %v4006_v46  ;;  %v3942_v14 = vld [vmem:[%s7587_s4 + $0x570] sm:$0xff] }
 0x2b6   : > { %v2083_v36 = vmul.f32 %v6010_v3, %v1996_v58  ;;  %2367 = vrot.lane.b32.xlu2 %v2299_v30, %s4216_s12  ;;  %2344 = vrot.lane.b32.xlu1 %v2299_v30, %s4214_s17  ;;  %v2156_v3 = vadd.f32 %v6039_v49, %v2069_v7  ;;  %v2294_v50 = vmax.f32 %v2279_v53, %v2234_v33  ;;  %v3996_v48 = vld [vmem:[%s7587_s4 + $0x720] sm:$0xff]  ;;  %v3989_v30 = vld [vmem:[%s7587_s4 + $0x6e8] sm:$0xff] }
 0x2b7   : > { %v2166_v60 = vadd.f32 %v6039_v49, %v2079_v0  ;;  %2392 = vrot.lane.b32.xlu0 %v2300_v45, %s4217_s30  ;;  %2736 = vmatpush.msra.mxu0 %v4004_v23  ;;  %v3988_v58 = vld [vmem:[%s7587_s4 + $0x6e0] sm:$0xff]  ;;  %v3902_v23 = vld [vmem:[%s7587_s4 + $0x430] sm:$0xff] }
 0x2b8   : > { %v2170_v63 = vadd.f32 %v6024_v8, %v2083_v36  ;;  %v2231_v22 = vmax.f32 %v2156_v3, 0.0  ;;  %v3976_v7 = vld [vmem:[%s7587_s4 + $0x680] sm:$0xff]  ;;  %v3982_v36 = vld [vmem:[%s7587_s4 + $0x6b0] sm:$0xff]  ;;  %v3965_v3 = vld [vmem:[%s7587_s4 + $0x628] sm:$0xff] }
 0x2b9   : > { %v2241_v15 = vmax.f32 %v2166_v60, 0.0  ;;  %2737 = vmatpush.msra.mxu0 %v3996_v48  ;;  %v3980_v0 = vld [vmem:[%s7587_s4 + $0x6a0] sm:$0xff]  ;;  %v3973_v60 = vld [vmem:[%s7587_s4 + $0x668] sm:$0xff] }
 0x2ba   : > { %v2245_v34 = vmax.f32 %v2170_v63, 0.0  ;;  %v1920_v57 = vpop.f32.mrf.mxu2  ;;  %v2291_v19 = vmax.f32 %v6140_v35, %v2231_v22  ;;  %v1355_v35 = vadd.f32 %v7778_v38, %v7777_v52  ;;  %v3964_v63 = vld [vmem:[%s7587_s4 + $0x620] sm:$0xff]  ;;  %v3950_v22 = vld [vmem:[%s7587_s4 + $0x5b0] sm:$0xff]  ;;  %v4001_v48 = vld [vmem:[%s7587_s4 + $0x748] sm:$0xff] }
 0x2bb   : > { %v1997_v41 = vadd.f32 %v1920_v57, %v1479_v13  ;;  %v2301_v16 = vmax.f32 %v2286_v12, %v2241_v15  ;;  %2738 = vmatpush.msra.mxu0 %v3988_v58  ;;  %v3960_v13 = vld [vmem:[%s7587_s4 + $0x600] sm:$0xff]  ;;  %v3918_v52 = vld [vmem:[%s7587_s4 + $0x4b0] sm:$0xff]  ;;  %v3993_v58 = vld [vmem:[%s7587_s4 + $0x708] sm:$0xff] }
 0x2bc   : > { %v6235_v20 = vmax.f32 %v2290_v21, %v2245_v34  ;;  %v1995_v18 = vadd.f32 %v1796_v11, %v1355_v35  ;;  %v3952_v12 = vld [vmem:[%s7587_s4 + $0x5c0] sm:$0xff]  ;;  %v3957_v21 = vld [vmem:[%s7587_s4 + $0x5e8] sm:$0xff] }
 0x2bd   : > { %v2084_v8 = vmul.f32 %v6031_v54, %v1997_v41  ;;  %v7775_v54 = vld [vmem:[#allocation29_spill] sm:$0xff]  ;;  %2739 = vmatpush.msra.mxu0 %v3980_v0  ;;  %v2507_v0 = vld [vmem:[%s7587_s4 + $0x308] sm:$0xff] }
 0x2be   : > { %2369 = vrot.lane.b32.xlu2 %v2300_v45, %s4216_s12  ;;  %2394 = vrot.lane.b32.xlu1 %v2301_v16, %s4217_s30  ;;  %v2082_v6 = vmul.f32 %v6007_v44, %v1995_v18  ;;  %v3956_v34 = vld [vmem:[%s7587_s4 + $0x5e0] sm:$0xff]  ;;  %v3949_v16 = vld [vmem:[%s7587_s4 + $0x5a8] sm:$0xff] }
 0x2bf   : > { %v2171_v2 = vadd.f32 %v6039_v49, %v2084_v8  ;;  %2315 = vrot.lane.b32.xlu0 %v5966_v25, %s4215_s28  ;;  %v7776_v49 = vld [vmem:[#allocation69_spill] sm:$0xff]  ;;  %2740 = vmatpush.msra.mxu0 %v3972_v27  ;;  %v3941_v8 = vld [vmem:[%s7587_s4 + $0x568] sm:$0xff]  ;;  %v2500_v27 = vld [vmem:[%s7587_s4 + $0x2d0] sm:$0xff] }
 0x2c0   : > { %v1346_v28 = vadd.f32 %v7776_v49, %v7775_v54  ;;  %v2169_v37 = vadd.f32 %v6020_v24, %v2082_v6  ;;  %v3948_v41 = vld [vmem:[%s7587_s4 + $0x5a0] sm:$0xff]  ;;  %v3925_v54 = vld [vmem:[%s7587_s4 + $0x4e8] sm:$0xff]  ;;  %v3926_v49 = vld [vmem:[%s7587_s4 + $0x4f0] sm:$0xff] }
 0x2c1   : > { %v2246_v1 = vmax.f32 %v2171_v2, 0.0  ;;  %2741 = vmatpush.msra.mxu0 %v3964_v63  ;;  %v3928_v2 = vld [vmem:[%s7587_s4 + $0x500] sm:$0xff]  ;;  %v3894_v6 = vld [vmem:[%s7587_s4 + $0x3f0] sm:$0xff]  ;;  %v3961_v63 = vld [vmem:[%s7587_s4 + $0x608] sm:$0xff] }
 0x2c2   : > { %v1980_v29 = vadd.f32 %v6144_v56, %v1346_v28  ;;  %v4005_v56 = vld [vmem:[%s7587_s4 + $0x768] sm:$0xff]  ;;  %v2244_v55 = vmax.f32 %v2169_v37, 0.0  ;;  %v3932_v33 = vld [vmem:[%s7587_s4 + $0x520] sm:$0xff] }
 0x2c3   : > { %v6246_v51 = vmax.f32 %v2291_v19, %v2246_v1  ;;  %2756 = vmatpush.msra.mxu1 %v4005_v56  ;;  %2742 = vmatpush.msra.mxu0 %v3956_v34  ;;  %v3933_v1 = vld [vmem:[%s7587_s4 + $0x528] sm:$0xff]  ;;  %v3934_v19 = vld [vmem:[%s7587_s4 + $0x530] sm:$0xff]  ;;  %v3920_v53 = vld [vmem:[%s7587_s4 + $0x4c0] sm:$0xff] }
 0x2c4   : > { %v2067_v9 = vmul.f32 %v6007_v44, %v1980_v29  ;;  %v3984_v44 = vld [vmem:[%s7587_s4 + $0x6c0] sm:$0xff]  ;;  %v3910_v29 = vld [vmem:[%s7587_s4 + $0x470] sm:$0xff] }
 0x2c5   : > { %2757 = vmatpush.msra.mxu1 %v3997_v4  ;;  %2743 = vmatpush.msra.mxu0 %v3948_v41  ;;  %v3912_v28 = vld [vmem:[%s7587_s4 + $0x480] sm:$0xff]  ;;  %v2467_v41 = vld [vmem:[%s7587_s4 + $0x1c8] sm:$0xff] }
 0x2c6   : > { %2338 = vrot.lane.b32.xlu1 %v5966_v25, %s4214_s17  ;;  %2313 = vrot.lane.b32.xlu2 %v5968_v62, %s4215_s28  ;;  %v4000_v25 = vld [vmem:[%s7587_s4 + $0x740] sm:$0xff]  ;;  %v2154_v45 = vadd.f32 %v6020_v24, %v2067_v9 }
 0x2c7   : > { %2363 = vrot.lane.b32.xlu0 %v2294_v50, %s4216_s12  ;;  %2656 = vmatpush.msrb.mxu3 %v4000_v25  ;;  %v3968_v24 = vld [vmem:[%s7587_s4 + $0x640] sm:$0xff]  ;;  %v3901_v25 = vld [vmem:[%s7587_s4 + $0x428] sm:$0xff] }
 0x2c8   : > { %2758 = vmatpush.msra.mxu1 %v3989_v30  ;;  %v2229_v59 = vmax.f32 %v2154_v45, 0.0  ;;  %2744 = vmatpush.msra.mxu0 %v3940_v26  ;;  %v3916_v11 = vld [vmem:[%s7587_s4 + $0x4a0] sm:$0xff]  ;;  %v2515_v45 = vld [vmem:[%s7587_s4 + $0x348] sm:$0xff] }
 0x2c9   : > { %2657 = vmatpush.msrb.mxu3 %v3992_v61  ;;  %v3904_v38 = vld [vmem:[%s7587_s4 + $0x440] sm:$0xff]  ;;  %v3893_v61 = vld [vmem:[%s7587_s4 + $0x3e8] sm:$0xff] }
 0x2ca   : > { %2759 = vmatpush.msra.mxu1 %v3981_v42  ;;  %v2289_v15 = vmax.f32 %v6134_v40, %v2229_v59  ;;  %v3958_v40 = vld [vmem:[%s7587_s4 + $0x5f0] sm:$0xff]  ;;  %2745 = vmatpush.msra.mxu0 %v3932_v33  ;;  %v3908_v35 = vld [vmem:[%s7587_s4 + $0x460] sm:$0xff]  ;;  %v2459_v26 = vld [vmem:[%s7587_s4 + $0x188] sm:$0xff] }
 0x2cb   : > { %2658 = vmatpush.msrb.mxu3 %v3984_v44  ;;  %v3896_v18 = vld [vmem:[%s7587_s4 + $0x400] sm:$0xff]  ;;  %v2524_v44 = vld [vmem:[%s7587_s4 + $0x390] sm:$0xff]  ;;  %v2451_v33 = vld [vmem:[%s7587_s4 + $0x148] sm:$0xff] }
 0x2cc   : > { %2760 = vmatpush.msra.mxu1 %v3973_v60  ;;  %v2304_v57 = vmax.f32 %v2289_v15, %v2244_v55  ;;  %v3900_v9 = vld [vmem:[%s7587_s4 + $0x420] sm:$0xff]  ;;  %v2508_v42 = vld [vmem:[%s7587_s4 + $0x310] sm:$0xff]  ;;  %v3969_v60 = vld [vmem:[%s7587_s4 + $0x648] sm:$0xff] }
 0x2cd   : > { %2659 = vmatpush.msrb.mxu3 %v3976_v7  ;;  %v3888_v56 = vld [vmem:[%s7587_s4 + $0x3c0] sm:$0xff]  ;;  %v3985_v7 = vld [vmem:[%s7587_s4 + $0x6c8] sm:$0xff]  ;;  %v2484_v15 = vld [vmem:[%s7587_s4 + $0x250] sm:$0xff] }
 0x2ce   : > { %2365 = vrot.lane.b32.xlu1 %v6196_v10, %s4216_s12  ;;  %2340 = vrot.lane.b32.xlu2 %v2294_v50, %s4214_s17  ;;  %v3924_v50 = vld [vmem:[%s7587_s4 + $0x4e0] sm:$0xff]  ;;  %v2491_v55 = vld [vmem:[%s7587_s4 + $0x288] sm:$0xff] }
 0x2cf   : > { %2390 = vrot.lane.b32.xlu0 %v2296_v31, %s4217_s30  ;;  %v3998_v31 = vld [vmem:[%s7587_s4 + $0x730] sm:$0xff]  ;;  %2660 = vmatpush.msrb.mxu3 %v3968_v24  ;;  %v3892_v46 = vld [vmem:[%s7587_s4 + $0x3e0] sm:$0xff]  ;;  %v2499_v24 = vld [vmem:[%s7587_s4 + $0x2c8] sm:$0xff] }
 0x2d0   : > { %2777 = vmatpush.msra.mxu2 %v3998_v31  ;;  %2761 = vmatpush.msra.mxu1 %v3965_v3  ;;  %v2522_v4 = vld [vmem:[%s7587_s4 + $0x380] sm:$0xff]  ;;  %v2523_v31 = vld [vmem:[%s7587_s4 + $0x388] sm:$0xff] }
 0x2d1   : > { %2661 = vmatpush.msrb.mxu3 %v3960_v13  ;;  %2746 = vmatpush.msra.mxu0 %v3924_v50  ;;  %v2514_v30 = vld [vmem:[%s7587_s4 + $0x340] sm:$0xff]  ;;  %v2492_v13 = vld [vmem:[%s7587_s4 + $0x290] sm:$0xff]  ;;  %v2443_v50 = vld [vmem:[%s7587_s4 + $0x108] sm:$0xff] }
 0x2d2   : > { %2778 = vmatpush.msra.mxu2 %v3990_v5  ;;  %2762 = vmatpush.msra.mxu1 %v3957_v21  ;;  %v2516_v5 = vld [vmem:[%s7587_s4 + $0x350] sm:$0xff]  ;;  %v2506_v37 = vld [vmem:[%s7587_s4 + $0x300] sm:$0xff] }
 0x2d3   : > { %2662 = vmatpush.msrb.mxu3 %v3952_v12  ;;  %2747 = vmatpush.msra.mxu0 %v3916_v11  ;;  %v2498_v59 = vld [vmem:[%s7587_s4 + $0x2c0] sm:$0xff]  ;;  %v3953_v12 = vld [vmem:[%s7587_s4 + $0x5c8] sm:$0xff]  ;;  %v2476_v21 = vld [vmem:[%s7587_s4 + $0x210] sm:$0xff] }
 0x2d4   : > { %2779 = vmatpush.msra.mxu2 %v3982_v36  ;;  %2763 = vmatpush.msra.mxu1 %v3949_v16  ;;  %v3977_v36 = vld [vmem:[%s7587_s4 + $0x688] sm:$0xff]  ;;  %v2482_v3 = vld [vmem:[%s7587_s4 + $0x240] sm:$0xff]  ;;  %v2468_v16 = vld [vmem:[%s7587_s4 + $0x1d0] sm:$0xff] }
 0x2d5   : > { %2663 = vmatpush.msrb.mxu3 %v3944_v43  ;;  %2748 = vmatpush.msra.mxu0 %v3908_v35  ;;  %v2474_v34 = vld [vmem:[%s7587_s4 + $0x200] sm:$0xff]  ;;  %v2435_v11 = vld [vmem:[%s7587_s4 + $0xc8] sm:$0xff] }
 0x2d6   : > { %2321 = vrot.lane.b32.xlu1 %v5994_v39, %s4215_s28  ;;  %2388 = vrot.lane.b32.xlu2 %v6196_v10, %s4217_s30  ;;  %v3974_v10 = vld [vmem:[%s7587_s4 + $0x670] sm:$0xff]  ;;  %v2466_v43 = vld [vmem:[%s7587_s4 + $0x1c0] sm:$0xff] }
 0x2d7   : > { %2346 = vrot.lane.b32.xlu0 %v5997_v17, %s4214_s17  ;;  %2780 = vmatpush.msra.mxu2 %v3974_v10  ;;  %v2490_v10 = vld [vmem:[%s7587_s4 + $0x280] sm:$0xff]  ;;  %v2427_v35 = vld [vmem:[%s7587_s4 + $0x88] sm:$0xff] }
 0x2d8   : > { %2764 = vmatpush.msra.mxu1 %v3941_v8  ;;  %2749 = vmatpush.msra.mxu0 %v3900_v9  ;;  %v2460_v8 = vld [vmem:[%s7587_s4 + $0x190] sm:$0xff]  ;;  %v2419_v9 = vld [vmem:[%s7587_s4 + $0x48] sm:$0xff] }
 0x2d9   : > { %2781 = vmatpush.msra.mxu2 %v3966_v32  ;;  %v2483_v32 = vld [vmem:[%s7587_s4 + $0x248] sm:$0xff] }
 0x2da   : > { %2765 = vmatpush.msra.mxu1 %v3933_v1  ;;  %2750 = vmatpush.msra.mxu0 %v3892_v46  ;;  %v2452_v1 = vld [vmem:[%s7587_s4 + $0x150] sm:$0xff]  ;;  %v2411_v46 = vld [vmem:[%s7587_s4 + $0x8] sm:$0xff] }
 0x2db   : > { %2782 = vmatpush.msra.mxu2 %v3958_v40  ;;  %v3945_v40 = vld [vmem:[%s7587_s4 + $0x588] sm:$0xff] }
 0x2dc   : > { %2766 = vmatpush.msra.mxu1 %v3925_v54  ;;  %2819 = vmatpush.msrb.mxu0 %v2522_v4  ;;  %v2444_v54 = vld [vmem:[%s7587_s4 + $0x110] sm:$0xff]  ;;  %v2343_v4 = vpop.permute.xlu1 %2342 }
 0x2dd   : > { %2783 = vmatpush.msra.mxu2 %v3950_v22  ;;  %v3937_v22 = vld [vmem:[%s7587_s4 + $0x548] sm:$0xff] }
 0x2de   : > { %2348 = vrot.lane.b32.xlu1 %v2304_v57, %s4214_s17  ;;  %2323 = vrot.lane.b32.xlu2 %v5997_v17, %s4215_s28  ;;  %v3936_v17 = vld [vmem:[%s7587_s4 + $0x540] sm:$0xff] }
 0x2df   : > { %2373 = vrot.lane.b32.xlu0 %v6235_v20, %s4216_s12  ;;  %2664 = vmatpush.msrb.mxu3 %v3936_v17  ;;  %v2458_v17 = vld [vmem:[%s7587_s4 + $0x180] sm:$0xff] }
 0x2e0   : > { %2784 = vmatpush.msra.mxu2 %v3942_v14  ;;  %2820 = vmatpush.msrb.mxu0 %v2514_v30  ;;  %v3929_v14 = vld [vmem:[%s7587_s4 + $0x508] sm:$0xff] }
 0x2e1   : > { %2665 = vmatpush.msrb.mxu3 %v3928_v2  ;;  %v2450_v2 = vld [vmem:[%s7587_s4 + $0x140] sm:$0xff] }
 0x2e2   : > { %2785 = vmatpush.msra.mxu2 %v3934_v19  ;;  %2821 = vmatpush.msrb.mxu0 %v2506_v37  ;;  %v3921_v19 = vld [vmem:[%s7587_s4 + $0x4c8] sm:$0xff] }
 0x2e3   : > { %2666 = vmatpush.msrb.mxu3 %v3920_v53  ;;  %v2442_v53 = vld [vmem:[%s7587_s4 + $0x100] sm:$0xff] }
 0x2e4   : > { %2786 = vmatpush.msra.mxu2 %v3926_v49  ;;  %2822 = vmatpush.msrb.mxu0 %v2498_v59  ;;  %v3913_v49 = vld [vmem:[%s7587_s4 + $0x488] sm:$0xff] }
 0x2e5   : > { %2667 = vmatpush.msrb.mxu3 %v3912_v28  ;;  %v2434_v28 = vld [vmem:[%s7587_s4 + $0xc0] sm:$0xff] }
 0x2e6   : > { %2396 = vrot.lane.b32.xlu1 %v6235_v20, %s4217_s30  ;;  %2371 = vrot.lane.b32.xlu2 %v2304_v57, %s4216_s12  ;;  %v3917_v20 = vld [vmem:[%s7587_s4 + $0x4a8] sm:$0xff] }
 0x2e7   : > { %2767 = vmatpush.msra.mxu1 %v3917_v20  ;;  %2787 = vmatpush.msra.mxu2 %v3918_v52  ;;  %v2475_v57 = vld [vmem:[%s7587_s4 + $0x208] sm:$0xff]  ;;  %v2436_v20 = vld [vmem:[%s7587_s4 + $0xd0] sm:$0xff] }
 0x2e8   : > { %2668 = vmatpush.msrb.mxu3 %v3904_v38  ;;  %2823 = vmatpush.msrb.mxu0 %v2490_v10  ;;  %v3905_v52 = vld [vmem:[%s7587_s4 + $0x448] sm:$0xff]  ;;  %v2426_v38 = vld [vmem:[%s7587_s4 + $0x80] sm:$0xff]  ;;  %v4002_v10 = vld [vmem:[%s7587_s4 + $0x750] sm:$0xff] }
 0x2e9   : > { %2788 = vmatpush.msra.mxu2 %v3910_v29  ;;  %v3897_v29 = vld [vmem:[%s7587_s4 + $0x408] sm:$0xff] }
 0x2ea   : > { %2669 = vmatpush.msrb.mxu3 %v3896_v18  ;;  %2824 = vmatpush.msrb.mxu0 %v2482_v3  ;;  %v2418_v18 = vld [vmem:[%s7587_s4 + $0x40] sm:$0xff]  ;;  %v3994_v3 = vld [vmem:[%s7587_s4 + $0x710] sm:$0xff] }
 0x2eb   : > { %2789 = vmatpush.msra.mxu2 %v3902_v23  ;;  %v3889_v23 = vld [vmem:[%s7587_s4 + $0x3c8] sm:$0xff] }
 0x2ec   : > { %2670 = vmatpush.msrb.mxu3 %v3888_v56  ;;  %2825 = vmatpush.msrb.mxu0 %v2474_v34  ;;  %v2410_v56 = vld [vmem:[%s7587_s4] sm:$0xff]  ;;  %v3986_v34 = vld [vmem:[%s7587_s4 + $0x6d0] sm:$0xff] }
 0x2ed   : > { %2790 = vmatpush.msra.mxu2 %v3894_v6 }
 0x2ee   : > { %2398 = vrot.lane.b32.xlu2 %v6246_v51, %s4217_s30  ;;  %v3909_v51 = vld [vmem:[%s7587_s4 + $0x468] sm:$0xff]  ;;  %2676 = vmatpush.msra.mxu3 %v4001_v48  ;;  %v2318_v48 = vpop.permute.xlu0 %2317 }
 0x2ef   : > { %2768 = vmatpush.msra.mxu1 %v3909_v51  ;;  %2859 = vmatpush.msrb.mxu2 %v2524_v44  ;;  %v2428_v51 = vld [vmem:[%s7587_s4 + $0x90] sm:$0xff] }
 0x2f0   : > { %2677 = vmatpush.msra.mxu3 %v3993_v58  ;;  %2826 = vmatpush.msrb.mxu0 %v2466_v43  ;;  %v2512_v43 = vld [vmem:[%s7587_s4 + $0x330] sm:$0xff] }
 0x2f1   : > { %2769 = vmatpush.msra.mxu1 %v3901_v25  ;;  %2860 = vmatpush.msrb.mxu2 %v2516_v5  ;;  %v2420_v25 = vld [vmem:[%s7587_s4 + $0x50] sm:$0xff] }
 0x2f2   : > { %2678 = vmatpush.msra.mxu3 %v3985_v7  ;;  %2827 = vmatpush.msrb.mxu0 %v2458_v17  ;;  %v2503_v17 = vld [vmem:[%s7587_s4 + $0x2e8] sm:$0xff] }
 0x2f3   : > { %2770 = vmatpush.msra.mxu1 %v3893_v61  ;;  %2861 = vmatpush.msrb.mxu2 %v2508_v42  ;;  %v2412_v61 = vld [vmem:[%s7587_s4 + $0x10] sm:$0xff] }
 0x2f4   : > { %2679 = vmatpush.msra.mxu3 %v3977_v36  ;;  %2828 = vmatpush.msrb.mxu0 %v2450_v2  ;;  %v3970_v2 = vld [vmem:[%s7587_s4 + $0x650] sm:$0xff] }
 0x2f5   : > { %2839 = vmatpush.msrb.mxu1 %v2523_v31  ;;  %2862 = vmatpush.msrb.mxu2 %v2500_v27 }
 0x2f6   : > { %2680 = vmatpush.msra.mxu3 %v3969_v60  ;;  %2829 = vmatpush.msrb.mxu0 %v2442_v53  ;;  %v2320_v44 = vpop.permute.xlu0 %2319  ;;  %v2486_v53 = vld [vmem:[%s7587_s4 + $0x260] sm:$0xff] }
 0x2f7   : > { %2840 = vmatpush.msrb.mxu1 %v2515_v45  ;;  %2863 = vmatpush.msrb.mxu2 %v2492_v13  ;;  %v2327_v58 = vsel %vm2325_vm2, %v2318_v48, %v2320_v44  ;;  %v2527_v13 = vld [vmem:[%s7587_s4 + $0x3a8] sm:$0xff]  ;;  %v2464_v44 = vld [vmem:[%s7587_s4 + $0x1b0] sm:$0xff] }
 0x2f8   : > { %2681 = vmatpush.msra.mxu3 %v3961_v63  ;;  %2830 = vmatpush.msrb.mxu0 %v2434_v28  ;;  %v2333_v7 = vmax.f32 %v5982_v47, %v2327_v58  ;;  %v2526_v47 = vld [vmem:[%s7587_s4 + $0x3a0] sm:$0xff]  ;;  %v2528_v63 = vld [vmem:[%s7587_s4 + $0x3b0] sm:$0xff]  ;;  %v2487_v28 = vld [vmem:[%s7587_s4 + $0x268] sm:$0xff] }
 0x2f9   : > { %2841 = vmatpush.msrb.mxu1 %v2507_v0  ;;  %2864 = vmatpush.msrb.mxu2 %v2484_v15  ;;  %v2519_v15 = vld [vmem:[%s7587_s4 + $0x368] sm:$0xff]  ;;  %v3930_v58 = vld [vmem:[%s7587_s4 + $0x510] sm:$0xff] }
 0x2fa   : > { %2682 = vmatpush.msra.mxu3 %v3953_v12  ;;  %2831 = vmatpush.msrb.mxu0 %v2426_v38  ;;  %v2520_v12 = vld [vmem:[%s7587_s4 + $0x370] sm:$0xff] }
 0x2fb   : > { %2842 = vmatpush.msrb.mxu1 %v2499_v24  ;;  %2865 = vmatpush.msrb.mxu2 %v2476_v21  ;;  %v3954_v38 = vld [vmem:[%s7587_s4 + $0x5d0] sm:$0xff] }
 0x2fc   : > { %2683 = vmatpush.msra.mxu3 %v3945_v40  ;;  %2832 = vmatpush.msrb.mxu0 %v2418_v18  ;;  %v2511_v40 = vld [vmem:[%s7587_s4 + $0x328] sm:$0xff] }
 0x2fd   : > { %2843 = vmatpush.msrb.mxu1 %v2491_v55  ;;  %2866 = vmatpush.msrb.mxu2 %v2468_v16  ;;  %v3978_v16 = vld [vmem:[%s7587_s4 + $0x690] sm:$0xff] }
 0x2fe   : > { %2684 = vmatpush.msra.mxu3 %v3937_v22  ;;  %2833 = vmatpush.msrb.mxu0 %v2410_v56  ;;  %v2502_v22 = vld [vmem:[%s7587_s4 + $0x2e0] sm:$0xff]  ;;  %v2471_v56 = vld [vmem:[%s7587_s4 + $0x1e8] sm:$0xff] }
 0x2ff   : > { %2844 = vmatpush.msrb.mxu1 %v2483_v32  ;;  %2867 = vmatpush.msrb.mxu2 %v2460_v8  ;;  %v2518_v32 = vld [vmem:[%s7587_s4 + $0x360] sm:$0xff] }
 0x300   : > { %2685 = vmatpush.msra.mxu3 %v3929_v14  ;;  %v2494_v14 = vld [vmem:[%s7587_s4 + $0x2a0] sm:$0xff] }
 0x301   : > { %2845 = vmatpush.msrb.mxu1 %v2475_v57  ;;  %2868 = vmatpush.msrb.mxu2 %v2452_v1  ;;  %v2510_v57 = vld [vmem:[%s7587_s4 + $0x320] sm:$0xff] }
 0x302   : > { %2686 = vmatpush.msra.mxu3 %v3921_v19  ;;  %v2496_v19 = vld [vmem:[%s7587_s4 + $0x2b0] sm:$0xff] }
 0x303   : > { %2846 = vmatpush.msrb.mxu1 %v2467_v41  ;;  %2869 = vmatpush.msrb.mxu2 %v2444_v54 }
 0x304   : > { %2687 = vmatpush.msra.mxu3 %v3913_v49  ;;  %v3962_v49 = vld [vmem:[%s7587_s4 + $0x610] sm:$0xff] }
 0x305   : > { %2847 = vmatpush.msrb.mxu1 %v2459_v26  ;;  %2870 = vmatpush.msrb.mxu2 %v2436_v20  ;;  %v2504_v26 = vld [vmem:[%s7587_s4 + $0x2f0] sm:$0xff] }
 0x306   : > { %2688 = vmatpush.msra.mxu3 %v3905_v52 }
 0x307   : > { %2848 = vmatpush.msrb.mxu1 %v2451_v33  ;;  %2871 = vmatpush.msrb.mxu2 %v2428_v51  ;;  %v2495_v33 = vld [vmem:[%s7587_s4 + $0x2a8] sm:$0xff] }
 0x308   : > { %2689 = vmatpush.msra.mxu3 %v3897_v29  ;;  %v2480_v29 = vld [vmem:[%s7587_s4 + $0x230] sm:$0xff] }
 0x309   : > { %2849 = vmatpush.msrb.mxu1 %v2443_v50  ;;  %2872 = vmatpush.msrb.mxu2 %v2420_v25 }
 0x30a   : > { %2690 = vmatpush.msra.mxu3 %v3889_v23  ;;  %v3946_v23 = vld [vmem:[%s7587_s4 + $0x590] sm:$0xff] }
 0x30b   : > { %2850 = vmatpush.msrb.mxu1 %v2435_v11  ;;  %2873 = vmatpush.msrb.mxu2 %v2412_v61  ;;  %v2488_v11 = vld [vmem:[%s7587_s4 + $0x270] sm:$0xff] }
 0x30c   : > { %v2472_v61 = vld [vmem:[%s7587_s4 + $0x1f0] sm:$0xff] }
 0x30d   : > { %2851 = vmatpush.msrb.mxu1 %v2427_v35  ;;  %v2479_v35 = vld [vmem:[%s7587_s4 + $0x228] sm:$0xff] }
 0x30f   : > { %2852 = vmatpush.msrb.mxu1 %v2419_v9  ;;  %v2470_v9 = vld [vmem:[%s7587_s4 + $0x1e0] sm:$0xff] }
 0x310   : > { %v2368_v6 = vpop.permute.xlu2 %2367 }
 0x311   : > { %2853 = vmatpush.msrb.mxu1 %v2411_v46 }
 0x318   : > { %v2370_v31 = vpop.permute.xlu2 %2369 }
 0x319   : > { %v2377_v42 = vsel %vm2375_vm4, %v2368_v6, %v2370_v31  ;;  %v2462_v6 = vld [vmem:[%s7587_s4 + $0x1a0] sm:$0xff]  ;;  %v2463_v31 = vld [vmem:[%s7587_s4 + $0x1a8] sm:$0xff] }
 0x320   : > { %v2314_v37 = vpop.permute.xlu2 %2313 }
 0x328   : > { %v2345_v30 = vpop.permute.xlu1 %2344  ;;  %v2341_v55 = vpop.permute.xlu2 %2340 }
 0x329   : > { %v2352_v45 = vsel %vm2350_vm3, %v2343_v4, %v2345_v30  ;;  %v2393_v5 = vpop.permute.xlu0 %2392  ;;  %v3938_v4 = vld [vmem:[%s7587_s4 + $0x550] sm:$0xff]  ;;  %v2454_v30 = vld [vmem:[%s7587_s4 + $0x160] sm:$0xff] }
 0x32a   : > { %v2358_v0 = vmax.f32 %v2333_v7, %v2352_v45  ;;  %v2456_v7 = vld [vmem:[%s7587_s4 + $0x170] sm:$0xff] }
 0x32c   : > { %v2383_v59 = vmax.f32 %v2358_v0, %v2377_v42  ;;  %v3922_v0 = vld [vmem:[%s7587_s4 + $0x4d0] sm:$0xff]  ;;  %v2446_v42 = vld [vmem:[%s7587_s4 + $0x120] sm:$0xff] }
 0x330   : > { %v2395_v36 = vpop.permute.xlu1 %2394  ;;  %v2389_v54 = vpop.permute.xlu2 %2388 }
 0x331   : > { %v2402_v24 = vsel %vm2400_vm5, %v2393_v5, %v2395_v36  ;;  %v2316_v27 = vpop.permute.xlu0 %2315  ;;  %v2455_v5 = vld [vmem:[%s7587_s4 + $0x168] sm:$0xff] }
 0x332   : > { %v6648_v60 = vmax.f32 %v2383_v59, %v2402_v24  ;;  %v2326_v8 = vsel %vm2325_vm2, %v2314_v37, %v2316_v27  ;;  %v2447_v59 = vld [vmem:[%s7587_s4 + $0x128] sm:$0xff]  ;;  %v2448_v24 = vld [vmem:[%s7587_s4 + $0x130] sm:$0xff] }
 0x333   : > { %v2332_v50 = vmax.f32 %v5968_v62, %v2326_v8  ;;  %v2478_v62 = vld [vmem:[%s7587_s4 + $0x220] sm:$0xff]  ;;  %v3914_v27 = vld [vmem:[%s7587_s4 + $0x490] sm:$0xff]  ;;  %v2415_v8 = vld [vmem:[%s7587_s4 + $0x28] sm:$0xff] }
 0x334   : > { %4008 = vmatmul.msk.f32.vlgmr.msrb.gmra.mxu3 %vm2651_vm6, %v6648_v60  ;;  %4012 = vmatmul.msk.f32.vlgmr.msra.gmra.mxu0 %vm2651_vm6, %v6648_v60 }
 0x335   : > { %2696 = vmatpush.msrb.mxu3 %v4002_v10  ;;  %4013 = vmatmul.msk.f32.vlgmr.msra.gmra.mxu1 %vm2651_vm6, %v6648_v60  ;;  %v2438_v10 = vld [vmem:[%s7587_s4 + $0xe0] sm:$0xff] }
 0x336   : > { %4014 = vmatmul.msk.f32.vlgmr.msra.gmra.mxu2 %vm2651_vm6, %v6648_v60  ;;  %2899 = vmatpush.msra.mxu0 %v2526_v47  ;;  %v2439_v47 = vld [vmem:[%s7587_s4 + $0xe8] sm:$0xff] }
 0x337   : > { %2919 = vmatpush.msra.mxu1 %v2527_v13  ;;  %2939 = vmatpush.msra.mxu2 %v2528_v63  ;;  %v3906_v63 = vld [vmem:[%s7587_s4 + $0x450] sm:$0xff] }
 0x338   : > { %2697 = vmatpush.msrb.mxu3 %v3994_v3  ;;  %2900 = vmatpush.msra.mxu0 %v2518_v32  ;;  %v2339_v21 = vpop.permute.xlu1 %2338  ;;  %v2324_v45 = vpop.permute.xlu2 %2323  ;;  %v2430_v3 = vld [vmem:[%s7587_s4 + $0xa0] sm:$0xff]  ;;  %v2431_v32 = vld [vmem:[%s7587_s4 + $0xa8] sm:$0xff] }
 0x339   : > { %2920 = vmatpush.msra.mxu1 %v2519_v15  ;;  %2940 = vmatpush.msra.mxu2 %v2520_v12  ;;  %v2364_v41 = vpop.permute.xlu0 %2363  ;;  %v2351_v1 = vsel %vm2350_vm3, %v2339_v21, %v2341_v55  ;;  %v2440_v55 = vld [vmem:[%s7587_s4 + $0xf0] sm:$0xff]  ;;  %v2423_v21 = vld [vmem:[%s7587_s4 + $0x68] sm:$0xff] }
 0x33a   : > { %2698 = vmatpush.msrb.mxu3 %v3986_v34  ;;  %2901 = vmatpush.msra.mxu0 %v2510_v57  ;;  %v2357_v20 = vmax.f32 %v2332_v50, %v2351_v1  ;;  %v2432_v15 = vld [vmem:[%s7587_s4 + $0xb0] sm:$0xff]  ;;  %v2422_v34 = vld [vmem:[%s7587_s4 + $0x60] sm:$0xff]  ;;  %v4003_v1 = vld [vmem:[%s7587_s4 + $0x758] sm:$0xff] }
 0x33b   : > { %2921 = vmatpush.msra.mxu1 %v2511_v40  ;;  %2941 = vmatpush.msra.mxu2 %v2512_v43  ;;  %v3898_v12 = vld [vmem:[%s7587_s4 + $0x410] sm:$0xff] }
 0x33c   : > { %2699 = vmatpush.msrb.mxu3 %v3978_v16  ;;  %2902 = vmatpush.msra.mxu0 %v2502_v22  ;;  %v2424_v40 = vld [vmem:[%s7587_s4 + $0x70] sm:$0xff] }
 0x33d   : > { %2922 = vmatpush.msra.mxu1 %v2503_v17  ;;  %2942 = vmatpush.msra.mxu2 %v2504_v26  ;;  %v3890_v16 = vld [vmem:[%s7587_s4 + $0x3d0] sm:$0xff] }
 0x33e   : > { %4009 = vmatmul.msk.f32.vlgmr.msra.gmra.mxu3 %vm2651_vm6, %v6648_v60  ;;  %2903 = vmatpush.msra.mxu0 %v2494_v14  ;;  %v2416_v14 = vld [vmem:[%s7587_s4 + $0x30] sm:$0xff] }
 0x33f   : > { %2700 = vmatpush.msrb.mxu3 %v3970_v2  ;;  %2923 = vmatpush.msra.mxu1 %v2495_v33  ;;  %v4138_v50 = vld [vmem:[%s7587_s4 + $0xb10] sm:$0xff] }
 0x340   : > { %2943 = vmatpush.msra.mxu2 %v2496_v19  ;;  %2904 = vmatpush.msra.mxu0 %v2486_v53  ;;  %v2366_v52 = vpop.permute.xlu1 %2365  ;;  %v2372_v17 = vpop.permute.xlu2 %2371  ;;  %v4136_v19 = vld [vmem:[%s7587_s4 + $0xb00] sm:$0xff]  ;;  %v4137_v53 = vld [vmem:[%s7587_s4 + $0xb08] sm:$0xff] }
 0x341   : > { %2701 = vmatpush.msrb.mxu3 %v3962_v49  ;;  %2924 = vmatpush.msra.mxu1 %v2487_v28  ;;  %v2376_v51 = vsel %vm2375_vm4, %v2364_v41, %v2366_v52  ;;  %v2391_v18 = vpop.permute.xlu0 %2390  ;;  %v4128_v49 = vld [vmem:[%s7587_s4 + $0xac0] sm:$0xff]  ;;  %v4129_v28 = vld [vmem:[%s7587_s4 + $0xac8] sm:$0xff] }
 0x342   : > { %2944 = vmatpush.msra.mxu2 %v2488_v11  ;;  %v2382_v25 = vmax.f32 %v2357_v20, %v2376_v51  ;;  %2905 = vmatpush.msra.mxu0 %v2478_v62  ;;  %v2401_v46 = vsel %vm2400_vm5, %v2389_v54, %v2391_v18  ;;  %v3995_v54 = vld [vmem:[%s7587_s4 + $0x718] sm:$0xff]  ;;  %v4130_v11 = vld [vmem:[%s7587_s4 + $0xad0] sm:$0xff]  ;;  %v4120_v20 = vld [vmem:[%s7587_s4 + $0xa80] sm:$0xff] }
 0x343   : > { %2702 = vmatpush.msrb.mxu3 %v3954_v38  ;;  %2925 = vmatpush.msra.mxu1 %v2479_v35  ;;  %v3987_v62 = vld [vmem:[%s7587_s4 + $0x6d8] sm:$0xff]  ;;  %v4121_v52 = vld [vmem:[%s7587_s4 + $0xa88] sm:$0xff]  ;;  %v4122_v38 = vld [vmem:[%s7587_s4 + $0xa90] sm:$0xff] }
 0x344   : > { %2945 = vmatpush.msra.mxu2 %v2480_v29  ;;  %v6764_v48 = vmax.f32 %v2382_v25, %v2401_v46  ;;  %2906 = vmatpush.msra.mxu0 %v2470_v9  ;;  %v3979_v35 = vld [vmem:[%s7587_s4 + $0x698] sm:$0xff]  ;;  %v4112_v51 = vld [vmem:[%s7587_s4 + $0xa40] sm:$0xff]  ;;  %v4113_v29 = vld [vmem:[%s7587_s4 + $0xa48] sm:$0xff] }
 0x345   : > { %2703 = vmatpush.msrb.mxu3 %v3946_v23  ;;  %2926 = vmatpush.msra.mxu1 %v2471_v56  ;;  %v4114_v18 = vld [vmem:[%s7587_s4 + $0xa50] sm:$0xff]  ;;  %v3971_v9 = vld [vmem:[%s7587_s4 + $0x658] sm:$0xff]  ;;  %v4104_v25 = vld [vmem:[%s7587_s4 + $0xa00] sm:$0xff] }
 0x346   : > { %2946 = vmatpush.msra.mxu2 %v2472_v61  ;;  %2907 = vmatpush.msra.mxu0 %v2462_v6  ;;  %v4105_v23 = vld [vmem:[%s7587_s4 + $0xa08] sm:$0xff]  ;;  %v4106_v56 = vld [vmem:[%s7587_s4 + $0xa10] sm:$0xff]  ;;  %v3963_v46 = vld [vmem:[%s7587_s4 + $0x618] sm:$0xff] }
 0x347   : > { %2704 = vmatpush.msrb.mxu3 %v3938_v4  ;;  %2927 = vmatpush.msra.mxu1 %v2463_v31  ;;  %v4096_v61 = vld [vmem:[%s7587_s4 + $0x9c0] sm:$0xff]  ;;  %v4097_v6 = vld [vmem:[%s7587_s4 + $0x9c8] sm:$0xff]  ;;  %v4098_v4 = vld [vmem:[%s7587_s4 + $0x9d0] sm:$0xff] }
 0x348   : > { %2947 = vmatpush.msra.mxu2 %v2464_v44  ;;  %4016 = vmatmul.msk.f32.vlgmr.msrb.gmra.mxu0 %vm2651_vm6, %v6764_v48  ;;  %v2322_v37 = vpop.permute.xlu1 %2321  ;;  %v3955_v31 = vld [vmem:[%s7587_s4 + $0x5d8] sm:$0xff]  ;;  %v4088_v44 = vld [vmem:[%s7587_s4 + $0x980] sm:$0xff] }
 0x349   : > { %2705 = vmatpush.msrb.mxu3 %v3930_v58  ;;  %4017 = vmatmul.msk.f32.vlgmr.msrb.gmra.mxu1 %vm2651_vm6, %v6764_v48  ;;  %v2347_v36 = vpop.permute.xlu0 %2346  ;;  %v2328_v13 = vsel %vm2325_vm2, %v2322_v37, %v2324_v45  ;;  %v4089_v58 = vld [vmem:[%s7587_s4 + $0x988] sm:$0xff]  ;;  %v3947_v45 = vld [vmem:[%s7587_s4 + $0x598] sm:$0xff]  ;;  %v4082_v37 = vld [vmem:[%s7587_s4 + $0x950] sm:$0xff] }
 0x34a   : > { %4018 = vmatmul.msk.f32.vlgmr.msrb.gmra.mxu2 %vm2651_vm6, %v6764_v48  ;;  %2908 = vmatpush.msra.mxu0 %v2454_v30  ;;  %v2334_v57 = vmax.f32 %v5994_v39, %v2328_v13  ;;  %v2414_v39 = vld [vmem:[%s7587_s4 + $0x20] sm:$0xff]  ;;  %v4090_v30 = vld [vmem:[%s7587_s4 + $0x990] sm:$0xff] }
 0x34b   : > { %2928 = vmatpush.msra.mxu1 %v2455_v5  ;;  %2948 = vmatpush.msra.mxu2 %v2456_v7  ;;  %v4080_v5 = vld [vmem:[%s7587_s4 + $0x940] sm:$0xff]  ;;  %v4081_v7 = vld [vmem:[%s7587_s4 + $0x948] sm:$0xff] }
 0x34c   : > { %2706 = vmatpush.msrb.mxu3 %v3922_v0  ;;  %2909 = vmatpush.msra.mxu0 %v2446_v42  ;;  %v3939_v0 = vld [vmem:[%s7587_s4 + $0x558] sm:$0xff]  ;;  %v4072_v42 = vld [vmem:[%s7587_s4 + $0x900] sm:$0xff] }
 0x34d   : > { %2929 = vmatpush.msra.mxu1 %v2447_v59  ;;  %2949 = vmatpush.msra.mxu2 %v2448_v24  ;;  %v4074_v59 = vld [vmem:[%s7587_s4 + $0x910] sm:$0xff]  ;;  %v3931_v24 = vld [vmem:[%s7587_s4 + $0x518] sm:$0xff]  ;;  %v4056_v13 = vld [vmem:[%s7587_s4 + $0x880] sm:$0xff] }
 0x34e   : > { %2707 = vmatpush.msrb.mxu3 %v3914_v27  ;;  %2910 = vmatpush.msra.mxu0 %v2438_v10  ;;  %v4064_v27 = vld [vmem:[%s7587_s4 + $0x8c0] sm:$0xff]  ;;  %v4065_v10 = vld [vmem:[%s7587_s4 + $0x8c8] sm:$0xff] }
 0x34f   : > { %2930 = vmatpush.msra.mxu1 %v2439_v47  ;;  %2950 = vmatpush.msra.mxu2 %v2440_v55  ;;  %v4066_v47 = vld [vmem:[%s7587_s4 + $0x8d0] sm:$0xff]  ;;  %v3923_v55 = vld [vmem:[%s7587_s4 + $0x4d8] sm:$0xff] }
 0x350   : > { %2708 = vmatpush.msrb.mxu3 %v3906_v63  ;;  %2911 = vmatpush.msra.mxu0 %v2430_v3  ;;  %v2349_v43 = vpop.permute.xlu1 %2348  ;;  %v4057_v63 = vld [vmem:[%s7587_s4 + $0x888] sm:$0xff]  ;;  %v4058_v3 = vld [vmem:[%s7587_s4 + $0x890] sm:$0xff] }
 0x351   : > { %2931 = vmatpush.msra.mxu1 %v2431_v32  ;;  %2951 = vmatpush.msra.mxu2 %v2432_v15  ;;  %v2353_v41 = vsel %vm2350_vm3, %v2347_v36, %v2349_v43  ;;  %v2374_v22 = vpop.permute.xlu0 %2373  ;;  %v4073_v36 = vld [vmem:[%s7587_s4 + $0x908] sm:$0xff]  ;;  %v3915_v32 = vld [vmem:[%s7587_s4 + $0x498] sm:$0xff]  ;;  %v4048_v15 = vld [vmem:[%s7587_s4 + $0x840] sm:$0xff] }
 0x352   : > { %2709 = vmatpush.msrb.mxu3 %v3898_v12  ;;  %2912 = vmatpush.msra.mxu0 %v2422_v34  ;;  %v6850_v26 = vmax.f32 %v2334_v57, %v2353_v41  ;;  %v6859_v2 = vsel %vm2375_vm4, %v2372_v17, %v2374_v22  ;;  %v4049_v12 = vld [vmem:[%s7587_s4 + $0x848] sm:$0xff]  ;;  %v4050_v34 = vld [vmem:[%s7587_s4 + $0x850] sm:$0xff]  ;;  %v3907_v57 = vld [vmem:[%s7587_s4 + $0x458] sm:$0xff]  ;;  %v2399_v22 = vpop.permute.xlu2 %2398 }
 0x353   : > { %2932 = vmatpush.msra.mxu1 %v2423_v21  ;;  %2952 = vmatpush.msra.mxu2 %v2424_v40  ;;  %v4040_v21 = vld [vmem:[%s7587_s4 + $0x800] sm:$0xff]  ;;  %v4041_v43 = vld [vmem:[%s7587_s4 + $0x808] sm:$0xff]  ;;  %v4042_v41 = vld [vmem:[%s7587_s4 + $0x810] sm:$0xff] }
 0x354   : > { %2710 = vmatpush.msrb.mxu3 %v3890_v16  ;;  %2913 = vmatpush.msra.mxu0 %v2414_v39  ;;  %v2384_v33 = vmax.f32 %v6850_v26, %v6859_v2  ;;  %v3899_v16 = vld [vmem:[%s7587_s4 + $0x418] sm:$0xff]  ;;  %v4032_v39 = vld [vmem:[%s7587_s4 + $0x7c0] sm:$0xff]  ;;  %v4033_v17 = vld [vmem:[%s7587_s4 + $0x7c8] sm:$0xff] }
 0x355   : > { %2933 = vmatpush.msra.mxu1 %v2415_v8  ;;  %2953 = vmatpush.msra.mxu2 %v2416_v14  ;;  %v4034_v8 = vld [vmem:[%s7587_s4 + $0x7d0] sm:$0xff]  ;;  %v4141_v26 = vld [vmem:[%s7587_s4 + $0xb28] sm:$0xff] }
 0x356   : > { %4010 = vmatmul.msk.f32.vlgmr.msrb.gmra.mxu3 %vm2651_vm6, %v6648_v60  ;;  %4020 = vmatmul.msk.f32.vlgmr.msra.gmra.mxu0 %vm2651_vm6, %v6764_v48  ;;  %v4142_v2 = vld [vmem:[%s7587_s4 + $0xb30] sm:$0xff] }
 0x357   : > { %2716 = vmatpush.msra.mxu3 %v4003_v1  ;;  %4021 = vmatmul.msk.f32.vlgmr.msra.gmra.mxu1 %vm2651_vm6, %v6764_v48  ;;  %v3891_v1 = vld [vmem:[%s7587_s4 + $0x3d8] sm:$0xff] }
 0x358   : > { %4022 = vmatmul.msk.f32.vlgmr.msra.gmra.mxu2 %vm2651_vm6, %v6764_v48  ;;  %3103 = vmatpush.msrb.mxu0 %v4136_v19  ;;  %v2397_v40 = vpop.permute.xlu1 %2396  ;;  %v4024_v19 = vld [vmem:[%s7587_s4 + $0x780] sm:$0xff] }
 0x359   : > { %3123 = vmatpush.msrb.mxu1 %v4137_v53  ;;  %3143 = vmatpush.msrb.mxu2 %v4138_v50  ;;  %v2403_v14 = vsel %vm2400_vm5, %v2397_v40, %v2399_v22  ;;  %v4025_v53 = vld [vmem:[%s7587_s4 + $0x788] sm:$0xff]  ;;  %v4026_v50 = vld [vmem:[%s7587_s4 + $0x790] sm:$0xff]  ;;  %v3911_v40 = vld [vmem:[%s7587_s4 + $0x478] sm:$0xff] }
 0x35a   : > { %2717 = vmatpush.msra.mxu3 %v3995_v54  ;;  %3104 = vmatpush.msrb.mxu0 %v4128_v49  ;;  %v7055_v54 = vmax.f32 %v2384_v33, %v2403_v14  ;;  %v4007_v49 = vld [vmem:[%s7587_s4 + $0x778] sm:$0xff]  ;;  %v4036_v22 = vld [vmem:[%s7587_s4 + $0x7e0] sm:$0xff] }
 0x35b   : > { %3124 = vmatpush.msrb.mxu1 %v4129_v28  ;;  %3144 = vmatpush.msrb.mxu2 %v4130_v11  ;;  %v4140_v28 = vld [vmem:[%s7587_s4 + $0xb20] sm:$0xff]  ;;  %v3999_v33 = vld [vmem:[%s7587_s4 + $0x738] sm:$0xff] }
 0x35c   : > { %2718 = vmatpush.msra.mxu3 %v3987_v62  ;;  %3105 = vmatpush.msrb.mxu0 %v4120_v20  ;;  %v4132_v11 = vld [vmem:[%s7587_s4 + $0xae0] sm:$0xff]  ;;  %v4133_v62 = vld [vmem:[%s7587_s4 + $0xae8] sm:$0xff]  ;;  %v4134_v20 = vld [vmem:[%s7587_s4 + $0xaf0] sm:$0xff] }
 0x35d   : > { %3125 = vmatpush.msrb.mxu1 %v4121_v52  ;;  %3145 = vmatpush.msrb.mxu2 %v4122_v38  ;;  %v3991_v52 = vld [vmem:[%s7587_s4 + $0x6f8] sm:$0xff]  ;;  %v4124_v38 = vld [vmem:[%s7587_s4 + $0xaa0] sm:$0xff] }
 0x35e   : > { %2719 = vmatpush.msra.mxu3 %v3979_v35  ;;  %3106 = vmatpush.msrb.mxu0 %v4112_v51  ;;  %v4125_v35 = vld [vmem:[%s7587_s4 + $0xaa8] sm:$0xff]  ;;  %v4126_v51 = vld [vmem:[%s7587_s4 + $0xab0] sm:$0xff]  ;;  %v3895_v14 = vld [vmem:[%s7587_s4 + $0x3f8] sm:$0xff] }
 0x35f   : > { %3126 = vmatpush.msrb.mxu1 %v4113_v29  ;;  %3146 = vmatpush.msrb.mxu2 %v4114_v18  ;;  %v3983_v29 = vld [vmem:[%s7587_s4 + $0x6b8] sm:$0xff]  ;;  %v4116_v18 = vld [vmem:[%s7587_s4 + $0xa60] sm:$0xff] }
 0x360   : > { %2720 = vmatpush.msra.mxu3 %v3971_v9  ;;  %3107 = vmatpush.msrb.mxu0 %v4104_v25  ;;  %v4117_v9 = vld [vmem:[%s7587_s4 + $0xa68] sm:$0xff]  ;;  %v4118_v25 = vld [vmem:[%s7587_s4 + $0xa70] sm:$0xff] }
 0x361   : > { %3127 = vmatpush.msrb.mxu1 %v4105_v23  ;;  %3147 = vmatpush.msrb.mxu2 %v4106_v56  ;;  %v3975_v23 = vld [vmem:[%s7587_s4 + $0x678] sm:$0xff]  ;;  %v4108_v56 = vld [vmem:[%s7587_s4 + $0xa20] sm:$0xff] }
 0x362   : > { %2721 = vmatpush.msra.mxu3 %v3963_v46  ;;  %3108 = vmatpush.msrb.mxu0 %v4096_v61  ;;  %v4109_v46 = vld [vmem:[%s7587_s4 + $0xa28] sm:$0xff]  ;;  %v4110_v61 = vld [vmem:[%s7587_s4 + $0xa30] sm:$0xff] }
 0x363   : > { %3128 = vmatpush.msrb.mxu1 %v4097_v6  ;;  %3148 = vmatpush.msrb.mxu2 %v4098_v4  ;;  %v3967_v6 = vld [vmem:[%s7587_s4 + $0x638] sm:$0xff]  ;;  %v4100_v4 = vld [vmem:[%s7587_s4 + $0x9e0] sm:$0xff] }
 0x364   : > { %2722 = vmatpush.msra.mxu3 %v3955_v31  ;;  %3109 = vmatpush.msrb.mxu0 %v4088_v44  ;;  %v4101_v31 = vld [vmem:[%s7587_s4 + $0x9e8] sm:$0xff]  ;;  %v4102_v44 = vld [vmem:[%s7587_s4 + $0x9f0] sm:$0xff] }
 0x365   : > { %3129 = vmatpush.msrb.mxu1 %v4089_v58  ;;  %3149 = vmatpush.msrb.mxu2 %v4090_v30  ;;  %v3959_v58 = vld [vmem:[%s7587_s4 + $0x5f8] sm:$0xff]  ;;  %v4092_v30 = vld [vmem:[%s7587_s4 + $0x9a0] sm:$0xff] }
 0x366   : > { %2723 = vmatpush.msra.mxu3 %v3947_v45  ;;  %3110 = vmatpush.msrb.mxu0 %v4080_v5  ;;  %v4093_v45 = vld [vmem:[%s7587_s4 + $0x9a8] sm:$0xff]  ;;  %v4094_v5 = vld [vmem:[%s7587_s4 + $0x9b0] sm:$0xff] }
 0x367   : > { %3130 = vmatpush.msrb.mxu1 %v4081_v7  ;;  %3150 = vmatpush.msrb.mxu2 %v4082_v37  ;;  %v3951_v7 = vld [vmem:[%s7587_s4 + $0x5b8] sm:$0xff]  ;;  %v4084_v37 = vld [vmem:[%s7587_s4 + $0x960] sm:$0xff] }
 0x368   : > { %2724 = vmatpush.msra.mxu3 %v3939_v0  ;;  %3111 = vmatpush.msrb.mxu0 %v4072_v42  ;;  %v4085_v0 = vld [vmem:[%s7587_s4 + $0x968] sm:$0xff]  ;;  %v4086_v42 = vld [vmem:[%s7587_s4 + $0x970] sm:$0xff] }
 0x369   : > { %3131 = vmatpush.msrb.mxu1 %v4073_v36  ;;  %3151 = vmatpush.msrb.mxu2 %v4074_v59  ;;  %v3943_v36 = vld [vmem:[%s7587_s4 + $0x578] sm:$0xff]  ;;  %v4076_v59 = vld [vmem:[%s7587_s4 + $0x920] sm:$0xff] }
 0x36a   : > { %2725 = vmatpush.msra.mxu3 %v3931_v24  ;;  %3112 = vmatpush.msrb.mxu0 %v4064_v27  ;;  %v4077_v24 = vld [vmem:[%s7587_s4 + $0x928] sm:$0xff]  ;;  %v4078_v27 = vld [vmem:[%s7587_s4 + $0x930] sm:$0xff] }
 0x36b   : > { %3132 = vmatpush.msrb.mxu1 %v4065_v10  ;;  %3152 = vmatpush.msrb.mxu2 %v4066_v47  ;;  %v3935_v10 = vld [vmem:[%s7587_s4 + $0x538] sm:$0xff]  ;;  %v4068_v47 = vld [vmem:[%s7587_s4 + $0x8e0] sm:$0xff] }
 0x36c   : > { %2726 = vmatpush.msra.mxu3 %v3923_v55  ;;  %3113 = vmatpush.msrb.mxu0 %v4056_v13  ;;  %v4069_v55 = vld [vmem:[%s7587_s4 + $0x8e8] sm:$0xff]  ;;  %v4070_v13 = vld [vmem:[%s7587_s4 + $0x8f0] sm:$0xff] }
 0x36d   : > { %3133 = vmatpush.msrb.mxu1 %v4057_v63  ;;  %3153 = vmatpush.msrb.mxu2 %v4058_v3  ;;  %v3927_v63 = vld [vmem:[%s7587_s4 + $0x4f8] sm:$0xff]  ;;  %v4060_v3 = vld [vmem:[%s7587_s4 + $0x8a0] sm:$0xff] }
 0x36e   : > { %2727 = vmatpush.msra.mxu3 %v3915_v32  ;;  %3114 = vmatpush.msrb.mxu0 %v4048_v15  ;;  %v4061_v32 = vld [vmem:[%s7587_s4 + $0x8a8] sm:$0xff]  ;;  %v4062_v15 = vld [vmem:[%s7587_s4 + $0x8b0] sm:$0xff] }
 0x36f   : > { %3134 = vmatpush.msrb.mxu1 %v4049_v12  ;;  %3154 = vmatpush.msrb.mxu2 %v4050_v34  ;;  %v3919_v12 = vld [vmem:[%s7587_s4 + $0x4b8] sm:$0xff]  ;;  %v4052_v34 = vld [vmem:[%s7587_s4 + $0x860] sm:$0xff] }
 0x370   : > { %2728 = vmatpush.msra.mxu3 %v3907_v57  ;;  %3115 = vmatpush.msrb.mxu0 %v4040_v21  ;;  %v4053_v57 = vld [vmem:[%s7587_s4 + $0x868] sm:$0xff]  ;;  %v4054_v21 = vld [vmem:[%s7587_s4 + $0x870] sm:$0xff] }
 0x371   : > { %3135 = vmatpush.msrb.mxu1 %v4041_v43  ;;  %3155 = vmatpush.msrb.mxu2 %v4042_v41  ;;  %v4044_v43 = vld [vmem:[%s7587_s4 + $0x820] sm:$0xff]  ;;  %v4045_v41 = vld [vmem:[%s7587_s4 + $0x828] sm:$0xff] }
 0x372   : > { %2729 = vmatpush.msra.mxu3 %v3899_v16  ;;  %3116 = vmatpush.msrb.mxu0 %v4032_v39  ;;  %v4046_v16 = vld [vmem:[%s7587_s4 + $0x830] sm:$0xff]  ;;  %v3903_v39 = vld [vmem:[%s7587_s4 + $0x438] sm:$0xff] }
 0x373   : > { %3136 = vmatpush.msrb.mxu1 %v4033_v17  ;;  %3156 = vmatpush.msrb.mxu2 %v4034_v8  ;;  %v4037_v17 = vld [vmem:[%s7587_s4 + $0x7e8] sm:$0xff]  ;;  %v4038_v8 = vld [vmem:[%s7587_s4 + $0x7f0] sm:$0xff] }
 0x374   : > { %2730 = vmatpush.msra.mxu3 %v3891_v1  ;;  %3117 = vmatpush.msrb.mxu0 %v4024_v19  ;;  %v4028_v1 = vld [vmem:[%s7587_s4 + $0x7a0] sm:$0xff]  ;;  %v4029_v19 = vld [vmem:[%s7587_s4 + $0x7a8] sm:$0xff] }
 0x375   : > { %3137 = vmatpush.msrb.mxu1 %v4025_v53  ;;  %3157 = vmatpush.msrb.mxu2 %v4026_v50  ;;  %v4030_v53 = vld [vmem:[%s7587_s4 + $0x7b0] sm:$0xff]  ;;  %v2525_v50 = vld [vmem:[%s7587_s4 + $0x398] sm:$0xff] }
 0x376   : > { %4011 = vmatmul.msk.f32.vlgmr.msra.gmra.mxu3 %vm2651_vm6, %v6648_v60  ;;  %4144 = vmatmul.msk.f32.vlgmr.msrb.gmra.mxu0 %vm2651_vm6, %v7055_v54 }
 0x377   : > { %2796 = vmatpush.msrb.mxu3 %v4007_v49  ;;  %4145 = vmatmul.msk.f32.vlgmr.msrb.gmra.mxu1 %vm2651_vm6, %v7055_v54  ;;  %v2517_v49 = vld [vmem:[%s7587_s4 + $0x358] sm:$0xff] }
 0x378   : > { %4146 = vmatmul.msk.f32.vlgmr.msrb.gmra.mxu2 %vm2651_vm6, %v7055_v54  ;;  %3183 = vmatpush.msra.mxu0 %v4140_v28  ;;  %v2509_v28 = vld [vmem:[%s7587_s4 + $0x318] sm:$0xff] }
 0x379   : > { %3203 = vmatpush.msra.mxu1 %v4141_v26  ;;  %3223 = vmatpush.msra.mxu2 %v4142_v2  ;;  %v2493_v26 = vld [vmem:[%s7587_s4 + $0x298] sm:$0xff] }
 0x37a   : > { %2797 = vmatpush.msrb.mxu3 %v3999_v33  ;;  %3184 = vmatpush.msra.mxu0 %v4132_v11  ;;  %v2485_v2 = vld [vmem:[%s7587_s4 + $0x258] sm:$0xff] }
 0x37b   : > { %3204 = vmatpush.msra.mxu1 %v4133_v62  ;;  %3224 = vmatpush.msra.mxu2 %v4134_v20  ;;  %v2477_v33 = vld [vmem:[%s7587_s4 + $0x218] sm:$0xff] }
 0x37c   : > { %2798 = vmatpush.msrb.mxu3 %v3991_v52  ;;  %3185 = vmatpush.msra.mxu0 %v4124_v38  ;;  %v2469_v11 = vld [vmem:[%s7587_s4 + $0x1d8] sm:$0xff] }
 0x37d   : > { %3205 = vmatpush.msra.mxu1 %v4125_v35  ;;  %3225 = vmatpush.msra.mxu2 %v4126_v51  ;;  %v2461_v62 = vld [vmem:[%s7587_s4 + $0x198] sm:$0xff] }
 0x37e   : > { %2799 = vmatpush.msrb.mxu3 %v3983_v29  ;;  %3186 = vmatpush.msra.mxu0 %v4116_v18  ;;  %v2453_v20 = vld [vmem:[%s7587_s4 + $0x158] sm:$0xff] }
 0x37f   : > { %3206 = vmatpush.msra.mxu1 %v4117_v9  ;;  %3226 = vmatpush.msra.mxu2 %v4118_v25  ;;  %v2445_v52 = vld [vmem:[%s7587_s4 + $0x118] sm:$0xff] }
 0x380   : > { %2800 = vmatpush.msrb.mxu3 %v3975_v23  ;;  %3187 = vmatpush.msra.mxu0 %v4108_v56  ;;  %v2437_v38 = vld [vmem:[%s7587_s4 + $0xd8] sm:$0xff] }
 0x381   : > { %3207 = vmatpush.msra.mxu1 %v4109_v46  ;;  %3227 = vmatpush.msra.mxu2 %v4110_v61  ;;  %v2429_v35 = vld [vmem:[%s7587_s4 + $0x98] sm:$0xff] }
 0x382   : > { %2801 = vmatpush.msrb.mxu3 %v3967_v6  ;;  %3188 = vmatpush.msra.mxu0 %v4100_v4  ;;  %v2421_v51 = vld [vmem:[%s7587_s4 + $0x58] sm:$0xff] }
 0x383   : > { %3208 = vmatpush.msra.mxu1 %v4101_v31  ;;  %3228 = vmatpush.msra.mxu2 %v4102_v44  ;;  %v2413_v29 = vld [vmem:[%s7587_s4 + $0x18] sm:$0xff] }
 0x384   : > { %2802 = vmatpush.msrb.mxu3 %v3959_v58  ;;  %3189 = vmatpush.msra.mxu0 %v4092_v30  ;;  %v2529_v18 = vld [vmem:[%s7587_s4 + $0x3b8] sm:$0xff] }
 0x385   : > { %3209 = vmatpush.msra.mxu1 %v4093_v45  ;;  %3229 = vmatpush.msra.mxu2 %v4094_v5  ;;  %v2521_v9 = vld [vmem:[%s7587_s4 + $0x378] sm:$0xff] }
 0x386   : > { %2803 = vmatpush.msrb.mxu3 %v3951_v7  ;;  %3190 = vmatpush.msra.mxu0 %v4084_v37  ;;  %v2513_v25 = vld [vmem:[%s7587_s4 + $0x338] sm:$0xff] }
 0x387   : > { %3210 = vmatpush.msra.mxu1 %v4085_v0  ;;  %3230 = vmatpush.msra.mxu2 %v4086_v42  ;;  %v2505_v23 = vld [vmem:[%s7587_s4 + $0x2f8] sm:$0xff] }
 0x388   : > { %2804 = vmatpush.msrb.mxu3 %v3943_v36  ;;  %3191 = vmatpush.msra.mxu0 %v4076_v59  ;;  %v2497_v56 = vld [vmem:[%s7587_s4 + $0x2b8] sm:$0xff] }
 0x389   : > { %3211 = vmatpush.msra.mxu1 %v4077_v24  ;;  %3231 = vmatpush.msra.mxu2 %v4078_v27  ;;  %v2489_v46 = vld [vmem:[%s7587_s4 + $0x278] sm:$0xff] }
 0x38a   : > { %2805 = vmatpush.msrb.mxu3 %v3935_v10  ;;  %3192 = vmatpush.msra.mxu0 %v4068_v47  ;;  %v2481_v61 = vld [vmem:[%s7587_s4 + $0x238] sm:$0xff] }
 0x38b   : > { %3212 = vmatpush.msra.mxu1 %v4069_v55  ;;  %3232 = vmatpush.msra.mxu2 %v4070_v13  ;;  %v2473_v6 = vld [vmem:[%s7587_s4 + $0x1f8] sm:$0xff] }
 0x38c   : > { %2806 = vmatpush.msrb.mxu3 %v3927_v63  ;;  %3193 = vmatpush.msra.mxu0 %v4060_v3  ;;  %v2465_v4 = vld [vmem:[%s7587_s4 + $0x1b8] sm:$0xff] }
 0x38d   : > { %3213 = vmatpush.msra.mxu1 %v4061_v32  ;;  %3233 = vmatpush.msra.mxu2 %v4062_v15  ;;  %v2457_v31 = vld [vmem:[%s7587_s4 + $0x178] sm:$0xff] }
 0x38e   : > { %2807 = vmatpush.msrb.mxu3 %v3919_v12  ;;  %3194 = vmatpush.msra.mxu0 %v4052_v34  ;;  %v2449_v44 = vld [vmem:[%s7587_s4 + $0x138] sm:$0xff] }
 0x38f   : > { %3214 = vmatpush.msra.mxu1 %v4053_v57  ;;  %3234 = vmatpush.msra.mxu2 %v4054_v21  ;;  %v2441_v58 = vld [vmem:[%s7587_s4 + $0xf8] sm:$0xff] }
 0x390   : > { %2808 = vmatpush.msrb.mxu3 %v3911_v40  ;;  %3195 = vmatpush.msra.mxu0 %v4044_v43  ;;  %v2433_v30 = vld [vmem:[%s7587_s4 + $0xb8] sm:$0xff] }
 0x391   : > { %3215 = vmatpush.msra.mxu1 %v4045_v41  ;;  %3235 = vmatpush.msra.mxu2 %v4046_v16  ;;  %v2425_v5 = vld [vmem:[%s7587_s4 + $0x78] sm:$0xff] }
 0x392   : > { %2809 = vmatpush.msrb.mxu3 %v3903_v39  ;;  %3196 = vmatpush.msra.mxu0 %v4036_v22  ;;  %v2417_v7 = vld [vmem:[%s7587_s4 + $0x38] sm:$0xff] }
 0x393   : > { %3216 = vmatpush.msra.mxu1 %v4037_v17  ;;  %3236 = vmatpush.msra.mxu2 %v4038_v8  ;;  %v4139_v37 = vld [vmem:[%s7587_s4 + $0xb18] sm:$0xff]  ;;  %v7410_v8 = vld [vmem:[%s7588_s5] sm:$0xff] }
 0x394   : > { %2810 = vmatpush.msrb.mxu3 %v3895_v14  ;;  %3197 = vmatpush.msra.mxu0 %v4028_v1  ;;  %v4131_v0 = vld [vmem:[%s7587_s4 + $0xad8] sm:$0xff]  ;;  %v7420_v1 = vld [vmem:[%s7589_s6] sm:$0xff] }
 0x395   : > { %3217 = vmatpush.msra.mxu1 %v4029_v19  ;;  %3237 = vmatpush.msra.mxu2 %v4030_v53  ;;  %v4123_v36 = vld [vmem:[%s7587_s4 + $0xa98] sm:$0xff] }
 0x396   : > { %4015 = vmatmul.msk.f32.vlgmr.msrb.gmra.mxu3 %vm2651_vm6, %v6648_v60  ;;  %4148 = vmatmul.msk.f32.vlgmr.msra.gmra.mxu0 %vm2651_vm6, %v7055_v54  ;;  %v2501_v60 = vld [vmem:[%s7587_s4 + $0x2d8] sm:$0xff] }
 0x397   : > { %2879 = vmatpush.msra.mxu3 %v2525_v50  ;;  %4149 = vmatmul.msk.f32.vlgmr.msra.gmra.mxu1 %vm2651_vm6, %v7055_v54  ;;  %v4115_v59 = vld [vmem:[%s7587_s4 + $0xa58] sm:$0xff]  ;;  %v3272_v50 = vperm.slane %v7410_v8, 0 }
 0x398   : > { %4150 = vmatmul.msk.f32.vlgmr.msra.gmra.mxu2 %vm2651_vm6, %v7055_v54  ;;  %v4099_v24 = vld [vmem:[%s7587_s4 + $0x9d8] sm:$0xff] }
 0x399   : > { %2880 = vmatpush.msra.mxu3 %v2517_v49  ;;  %v4091_v55 = vld [vmem:[%s7587_s4 + $0x998] sm:$0xff] }
 0x39a   : > { %v4083_v63 = vld [vmem:[%s7587_s4 + $0x958] sm:$0xff] }
 0x39b   : > { %2881 = vmatpush.msra.mxu3 %v2509_v28  ;;  %v4075_v3 = vld [vmem:[%s7587_s4 + $0x918] sm:$0xff] }
 0x39c   : > { %v4067_v32 = vld [vmem:[%s7587_s4 + $0x8d8] sm:$0xff] }
 0x39d   : > { %2882 = vmatpush.msra.mxu3 %v2501_v60  ;;  %v4059_v34 = vld [vmem:[%s7587_s4 + $0x898] sm:$0xff]  ;;  %v3273_v60 = vperm.slane %v7410_v8, 1 }
 0x39e   : > { %v4051_v21 = vld [vmem:[%s7587_s4 + $0x858] sm:$0xff] }
 0x39f   : > { %2883 = vmatpush.msra.mxu3 %v2493_v26  ;;  %v4043_v40 = vld [vmem:[%s7587_s4 + $0x818] sm:$0xff] }
 0x3a0   : > { %v4035_v43 = vld [vmem:[%s7587_s4 + $0x7d8] sm:$0xff] }
 0x3a1   : > { %2884 = vmatpush.msra.mxu3 %v2485_v2  ;;  %v4027_v39 = vld [vmem:[%s7587_s4 + $0x798] sm:$0xff] }
 0x3a2   : > { %v4143_v22 = vld [vmem:[%s7587_s4 + $0xb38] sm:$0xff] }
 0x3a3   : > { %2885 = vmatpush.msra.mxu3 %v2477_v33  ;;  %v4135_v14 = vld [vmem:[%s7587_s4 + $0xaf8] sm:$0xff] }
 0x3a4   : > { %v4127_v53 = vld [vmem:[%s7587_s4 + $0xab8] sm:$0xff] }
 0x3a5   : > { %2886 = vmatpush.msra.mxu3 %v2469_v11  ;;  %v4119_v26 = vld [vmem:[%s7587_s4 + $0xa78] sm:$0xff]  ;;  %v3298_v11 = vperm.slane %v7420_v1, 0 }
 0x3a7   : > { %2887 = vmatpush.msra.mxu3 %v2461_v62 }
 0x3a9   : > { %2888 = vmatpush.msra.mxu3 %v2453_v20  ;;  %v3299_v20 = vperm.slane %v7420_v1, 1 }
 0x3ab   : > { %2889 = vmatpush.msra.mxu3 %v2445_v52  ;;  %v4111_v52 = vld [vmem:[%s7587_s4 + $0xa38] sm:$0xff] }
 0x3ad   : > { %2890 = vmatpush.msra.mxu3 %v2437_v38 }
 0x3af   : > { %2891 = vmatpush.msra.mxu3 %v2429_v35 }
 0x3b1   : > { %2892 = vmatpush.msra.mxu3 %v2421_v51  ;;  %v7367_v27 = vpop.f32.mrf.mxu0 }
 0x3b2   : > { %v7369_v47 = vpop.f32.mrf.mxu1 }
 0x3b3   : > { %2893 = vmatpush.msra.mxu3 %v2413_v29  ;;  %v4103_v29 = vld [vmem:[%s7587_s4 + $0x9f8] sm:$0xff] }
 0x3b4   : > { %4019 = vmatmul.msk.f32.vlgmr.msra.gmra.mxu3 %vm2651_vm6, %v6764_v48 }
 0x3b5   : > { %2959 = vmatpush.msrb.mxu3 %v2529_v18 }
 0x3b7   : > { %2960 = vmatpush.msrb.mxu3 %v2521_v9  ;;  %v2672_v57 = vpop.f32.mrf.mxu3 }
 0x3b9   : > { %2961 = vmatpush.msrb.mxu3 %v2513_v25  ;;  %v2792_v45 = vpop.f32.mrf.mxu2 }
 0x3bb   : > { %2962 = vmatpush.msrb.mxu3 %v2505_v23  ;;  %v4095_v23 = vld [vmem:[%s7587_s4 + $0x9b8] sm:$0xff] }
 0x3bd   : > { %2963 = vmatpush.msrb.mxu3 %v2497_v56  ;;  %v3274_v56 = vperm.slane %v7410_v8, 2 }
 0x3bf   : > { %2964 = vmatpush.msrb.mxu3 %v2489_v46 }
 0x3c1   : > { %2965 = vmatpush.msrb.mxu3 %v2481_v61  ;;  %v2692_v17 = vpop.f32.mrf.mxu3 }
 0x3c3   : > { %2966 = vmatpush.msrb.mxu3 %v2473_v6 }
 0x3c5   : > { %2967 = vmatpush.msrb.mxu3 %v2465_v4  ;;  %v2835_v15 = vpop.f32.mrf.mxu0  ;;  %v4087_v4 = vld [vmem:[%s7587_s4 + $0x978] sm:$0xff] }
 0x3c6   : > { %v2855_v12 = vpop.f32.mrf.mxu1  ;;  %v2836_v19 = vadd.f32 %v2835_v15, %v2672_v57  ;;  %v3302_v15 = vperm.slane %v7420_v1, 4 }
 0x3c7   : > { %2968 = vmatpush.msrb.mxu3 %v2457_v31  ;;  %v2856_v49 = vadd.f32 %v2855_v12, %v2692_v17 }
 0x3c9   : > { %2969 = vmatpush.msrb.mxu3 %v2449_v44  ;;  %v3300_v44 = vperm.slane %v7420_v1, 2 }
 0x3cb   : > { %2970 = vmatpush.msrb.mxu3 %v2441_v58 }
 0x3cd   : > { %2971 = vmatpush.msrb.mxu3 %v2433_v30  ;;  %v7353_v42 = vpop.f32.mrf.mxu2  ;;  %v4079_v30 = vld [vmem:[%s7587_s4 + $0x938] sm:$0xff] }
 0x3cf   : > { %2972 = vmatpush.msrb.mxu3 %v2425_v5 }
 0x3d1   : > { %2973 = vmatpush.msrb.mxu3 %v2417_v7  ;;  %v4063_v7 = vld [vmem:[%s7587_s4 + $0x8b8] sm:$0xff] }
 0x3d2   : > { %4023 = vmatmul.msk.f32.vlgmr.msrb.gmra.mxu3 %vm2651_vm6, %v6764_v48  ;;  %v4107_v48 = vld [vmem:[%s7587_s4 + $0xa18] sm:$0xff] }
 0x3d3   : > { %3163 = vmatpush.msra.mxu3 %v4139_v37  ;;  %v7397_v41 = vpop.f32.mrf.mxu0 }
 0x3d4   : > { %v7399_v16 = vpop.f32.mrf.mxu1 }
 0x3d5   : > { %3164 = vmatpush.msra.mxu3 %v4131_v0  ;;  %v4055_v0 = vld [vmem:[%s7587_s4 + $0x878] sm:$0xff] }
 0x3d7   : > { %3165 = vmatpush.msra.mxu3 %v4123_v36  ;;  %v4039_v36 = vld [vmem:[%s7587_s4 + $0x7f8] sm:$0xff] }
 0x3d9   : > { %3166 = vmatpush.msra.mxu3 %v4115_v59  ;;  %v2712_v35 = vpop.f32.mrf.mxu3  ;;  %v4031_v59 = vld [vmem:[%s7587_s4 + $0x7b8] sm:$0xff] }
 0x3da   : > { %v2876_v25 = vadd.f32 %v7353_v42, %v2712_v35  ;;  %v4047_v42 = vld [vmem:[%s7587_s4 + $0x838] sm:$0xff]  ;;  %v3377_v35 = vld [vmem:[%s7590_s7 + $0x28] sm:$0xff] }
 0x3db   : > { %3167 = vmatpush.msra.mxu3 %v4107_v48  ;;  %v2955_v10 = vpop.f32.mrf.mxu2  ;;  %v2916_v48 = vadd.f32 %v7397_v41, %v7367_v27 }
 0x3dc   : > { %v7374_v13 = vadd.f32 %v2955_v10, %v2792_v45  ;;  %v4071_v45 = vld [vmem:[%s7587_s4 + $0x8f8] sm:$0xff]  ;;  %v2936_v10 = vadd.f32 %v7399_v16, %v7369_v47 }
 0x3dd   : > { %3168 = vmatpush.msra.mxu3 %v4099_v24  ;;  %v3276_v24 = vperm.slane %v7410_v8, 4 }
 0x3df   : > { %3169 = vmatpush.msra.mxu3 %v4091_v55 }
 0x3e1   : > { %3170 = vmatpush.msra.mxu3 %v4083_v63  ;;  %v3277_v63 = vperm.slane %v7410_v8, 5 }
 0x3e3   : > { %3171 = vmatpush.msra.mxu3 %v4075_v3 }
 0x3e5   : > { %3172 = vmatpush.msra.mxu3 %v4067_v32 }
 0x3e7   : > { %3173 = vmatpush.msra.mxu3 %v4059_v34  ;;  %v3303_v34 = vperm.slane %v7420_v1, 5 }
 0x3e9   : > { %3174 = vmatpush.msra.mxu3 %v4051_v21 }
 0x3eb   : > { %3175 = vmatpush.msra.mxu3 %v4043_v40 }
 0x3ed   : > { %3176 = vmatpush.msra.mxu3 %v4035_v43 }
 0x3ef   : > { %3177 = vmatpush.msra.mxu3 %v4027_v39 }
 0x3f0   : > { %4147 = vmatmul.msk.f32.vlgmr.msra.gmra.mxu3 %vm2651_vm6, %v7055_v54 }
 0x3f1   : > { %3243 = vmatpush.msrb.mxu3 %v4143_v22 }
 0x3f3   : > { %3244 = vmatpush.msrb.mxu3 %v4135_v14  ;;  %v3119_v28 = vpop.f32.mrf.mxu0  ;;  %v3275_v14 = vperm.slane %v7410_v8, 3 }
 0x3f4   : > { %v3262_v2 = vadd.f32 %v3119_v28, %v2836_v19  ;;  %v3139_v33 = vpop.f32.mrf.mxu1 }
 0x3f5   : > { %3245 = vmatpush.msrb.mxu3 %v4127_v53  ;;  %v3263_v62 = vadd.f32 %v3139_v33, %v2856_v49  ;;  %v3301_v49 = vperm.slane %v7420_v1, 3 }
 0x3f6   : > { %v3288_v38 = vmul.f32 %v3272_v50, %v3262_v2 }
 0x3f7   : > { %3246 = vmatpush.msrb.mxu3 %v4119_v26  ;;  %v3289_v51 = vmul.f32 %v3273_v60, %v3263_v62  ;;  %v3278_v60 = vperm.slane %v7410_v8, 6  ;;  %v3304_v62 = vperm.slane %v7420_v1, 6 }
 0x3f8   : > { %v7438_v18 = vadd.f32 %v3298_v11, %v3288_v38  ;;  %v3379_v38 = vld [vmem:[%s7590_s7 + $0x38] sm:$0xff] }
 0x3f9   : > { %3247 = vmatpush.msrb.mxu3 %v4111_v52  ;;  %v7440_v9 = vadd.f32 %v3299_v20, %v3289_v51  ;;  %v2732_v43 = vpop.f32.mrf.mxu3  ;;  %3396 = vmatpush.msrb.mxu0 %v3379_v38  ;;  %v3376_v51 = vld [vmem:[%s7590_s7 + $0x20] sm:$0xff] }
 0x3fa   : > { %v3322_v46 = vmax.f32 %v7438_v18, 0.0  ;;  %v3412_v18 = vld [vmem:[%s7592_s9 + $0x18] sm:$0xff] }
 0x3fb   : > { %3248 = vmatpush.msrb.mxu3 %v4103_v29  ;;  %v3159_v61 = vpop.f32.mrf.mxu2  ;;  %v3323_v6 = vmax.f32 %v7440_v9, 0.0  ;;  %3432 = vmatpush.msrb.mxu1 %v3412_v18 }
 0x3fc   : > { %v3264_v31 = vadd.f32 %v3159_v61, %v2876_v25  ;;  %3331 = vrot.lane.b32.xlu0 %v3322_v46, %s4218_s26  ;;  %v3375_v25 = vld [vmem:[%s7590_s7 + $0x18] sm:$0xff]  ;;  %v3373_v61 = vld [vmem:[%s7590_s7 + $0x8] sm:$0xff] }
 0x3fd   : > { %3249 = vmatpush.msrb.mxu3 %v4095_v23  ;;  %3337 = vrot.lane.b32.xlu1 %v3323_v6, %s4218_s26 }
 0x3fe   : > { %v3290_v58 = vmul.f32 %v3274_v56, %v3264_v31  ;;  %v3374_v56 = vld [vmem:[%s7590_s7 + $0x10] sm:$0xff]  ;;  %v3372_v31 = vld [vmem:[%s7590_s7] sm:$0xff] }
 0x3ff   : > { %3250 = vmatpush.msrb.mxu3 %v4087_v4 }
 0x400   : > { %v7465_v5 = vadd.f32 %v3300_v44, %v3290_v58 }
 0x401   : > { %3251 = vmatpush.msrb.mxu3 %v4079_v30 }
 0x402   : > { %v3324_v37 = vmax.f32 %v7465_v5, 0.0 }
 0x403   : > { %3252 = vmatpush.msrb.mxu3 %v4071_v45 }
 0x404   : > { %3343 = vrot.lane.b32.xlu2 %v3324_v37, %s4218_s26 }
 0x405   : > { %3253 = vmatpush.msrb.mxu3 %v4063_v7 }
 0x407   : > { %3254 = vmatpush.msrb.mxu3 %v4055_v0 }
 0x409   : > { %3255 = vmatpush.msrb.mxu3 %v4047_v42 }
 0x40b   : > { %3256 = vmatpush.msrb.mxu3 %v4039_v36  ;;  %v3279_v36 = vperm.slane %v7410_v8, 7 }
 0x40d   : > { %3257 = vmatpush.msrb.mxu3 %v4031_v59 }
 0x40e   : > { %4151 = vmatmul.msk.f32.vlgmr.msrb.gmra.mxu3 %vm2651_vm6, %v7055_v54 }
 0x413   : > { %v3199_v55 = vpop.f32.mrf.mxu0 }
 0x414   : > { %v3266_v3 = vadd.f32 %v3199_v55, %v2916_v48  ;;  %v3219_v32 = vpop.f32.mrf.mxu1  ;;  %v3305_v55 = vperm.slane %v7420_v1, 7  ;;  %v3410_v1 = vld [vmem:[%s7592_s9 + $0x8] sm:$0xff] }
 0x415   : > { %v3267_v12 = vadd.f32 %v3219_v32, %v2936_v10 }
 0x416   : > { %v3292_v57 = vmul.f32 %v3276_v24, %v3266_v3 }
 0x417   : > { %v3293_v54 = vmul.f32 %v3277_v63, %v3267_v12 }
 0x418   : > { %v7496_v21 = vadd.f32 %v3302_v15, %v3292_v57 }
 0x419   : > { %v7498_v27 = vadd.f32 %v3303_v34, %v3293_v54  ;;  %v2812_v41 = vpop.f32.mrf.mxu3  ;;  %v3409_v54 = vld [vmem:[%s7592_s9] sm:$0xff] }
 0x41a   : > { %v3326_v40 = vmax.f32 %v7496_v21, 0.0  ;;  %v4188_v21 = vld [vmem:[%s7591_s8] ss:$0 sm:$0xff] }
 0x41b   : > { %v3327_v47 = vmax.f32 %v7498_v27, 0.0  ;;  %v3239_v19 = vpop.f32.mrf.mxu2 }
 0x41c   : > { %3355 = vrot.lane.b32.xlu1 %v3326_v40, %s4218_s26  ;;  %v3268_v28 = vadd.f32 %v3239_v19, %v7374_v13  ;;  %v3378_v13 = vld [vmem:[%s7590_s7 + $0x30] sm:$0xff] }
 0x41d   : > { %3361 = vrot.lane.b32.xlu2 %v3327_v47, %s4218_s26  ;;  %3397 = vmatpush.msrb.mxu0 %v3378_v13 }
 0x41e   : > { %v3294_v33 = vmul.f32 %v3278_v60, %v3268_v28 }
 0x41f   : > { %3398 = vmatpush.msrb.mxu0 %v3377_v35 }
 0x420   : > { %v3320_v20 = vadd.f32 %v3304_v62, %v3294_v33 }
 0x421   : > { %3399 = vmatpush.msrb.mxu0 %v3376_v51 }
 0x422   : > { %v3328_v52 = vmax.f32 %v3320_v20, 0.0 }
 0x423   : > { %3400 = vmatpush.msrb.mxu0 %v3375_v25 }
 0x425   : > { %3401 = vmatpush.msrb.mxu0 %v3374_v56 }
 0x427   : > { %3402 = vmatpush.msrb.mxu0 %v3373_v61 }
 0x429   : > { %3403 = vmatpush.msrb.mxu0 %v3372_v31 }
 0x437   : > { %v2895_v16 = vpop.f32.mrf.mxu3 }
 0x438   : > { %v2896_v17 = vadd.f32 %v2895_v16, %v2732_v43  ;;  %v4189_v43 = vld [vmem:[%s7593_s10] ss:$0 sm:$0xff] }
 0x455   : > { %v2975_v39 = vpop.f32.mrf.mxu3 }
 0x456   : > { %v2976_v22 = vadd.f32 %v2975_v39, %v2812_v41 }
 0x46e   : > { %v3332_v29 = vpop.permute.xlu0 %3331 }
 0x46f   : > { %v3334_v23 = vmax.f32 %v3322_v46, %v3332_v29  ;;  %v3411_v46 = vld [vmem:[%s7592_s9 + $0x10] sm:$0xff]  ;;  %v3338_v44 = vpop.permute.xlu1 %3337 }
 0x470   : > { %3433 = vmatpush.msrb.mxu1 %v3411_v46 }
 0x471   : > { %v3335_v4 = vmax.f32 %v3334_v23, %v3323_v6  ;;  %v3344_v6 = vpop.permute.xlu2 %3343 }
 0x472   : > { %3434 = vmatpush.msrb.mxu1 %v3410_v1 }
 0x473   : > { %v3179_v53 = vpop.f32.mrf.mxu3  ;;  %v3340_v58 = vmax.f32 %v3335_v4, %v3338_v44 }
 0x474   : > { %v3265_v50 = vadd.f32 %v3179_v53, %v2896_v17  ;;  %3435 = vmatpush.msrb.mxu1 %v3409_v54 }
 0x475   : > { %v3341_v9 = vmax.f32 %v3340_v58, %v3324_v37 }
 0x476   : > { %v3291_v26 = vmul.f32 %v3275_v14, %v3265_v50 }
 0x477   : > { %v3346_v30 = vmax.f32 %v3341_v9, %v3344_v6 }
 0x478   : > { %v3317_v2 = vadd.f32 %v3301_v49, %v3291_v26 }
 0x479   : > { %v3362_v5 = vpop.permute.xlu2 %3361 }
 0x47a   : > { %v3325_v11 = vmax.f32 %v3317_v2, 0.0 }
 0x47c   : > { %3349 = vrot.lane.b32.xlu0 %v3325_v11, %s4218_s26  ;;  %v3347_v7 = vmax.f32 %v3346_v30, %v3325_v11 }
 0x484   : > { %3367 = vrot.lane.b32.xlu0 %v3328_v52, %s4218_s26 }
 0x48e   : > { %v3356_v24 = vpop.permute.xlu1 %3355 }
 0x491   : > { %v3259_v45 = vpop.f32.mrf.mxu3 }
 0x492   : > { %v3269_v42 = vadd.f32 %v3259_v45, %v2976_v22 }
 0x494   : > { %v3295_v10 = vmul.f32 %v3279_v36, %v3269_v42 }
 0x496   : > { %v3321_v37 = vadd.f32 %v3305_v55, %v3295_v10 }
 0x498   : > { %v3329_v34 = vmax.f32 %v3321_v37, 0.0 }
 0x4ee   : > { %v3350_v0 = vpop.permute.xlu0 %3349 }
 0x4ef   : > { %v3352_v59 = vmax.f32 %v3347_v7, %v3350_v0 }
 0x4f1   : > { %v3353_v48 = vmax.f32 %v3352_v59, %v3326_v40 }
 0x4f3   : > { %v3358_v63 = vmax.f32 %v3353_v48, %v3356_v24 }
 0x4f5   : > { %v3359_v3 = vmax.f32 %v3358_v63, %v3327_v47 }
 0x4f6   : > { %v3368_v12 = vpop.permute.xlu0 %3367 }
 0x4f7   : > { %v3364_v32 = vmax.f32 %v3359_v3, %v3362_v5 }
 0x4f9   : > { %v3365_v15 = vmax.f32 %v3364_v32, %v3328_v52 }
 0x4fb   : > { %v3370_v57 = vmax.f32 %v3365_v15, %v3368_v12 }
 0x4fd   : > { %v3371_v8 = vmax.f32 %v3370_v57, %v3329_v34 }
 0x4ff   : > { %4152 = vmatmul.msk.f32.vlgmr.msrb.gmra.mxu0 %vm3384_vm7, %v3371_v8 }
 0x57c   : > { %v3405_v27 = vpop.f32.mrf.mxu0 }
 0x57d   : > { %v3406_v40 = vadd.f32 %v4188_v21, %v3405_v27 }
 0x57f   : > { %v3408_v47 = vmax.f32 %v3406_v40, 0.0 }
 0x581   : > { %4153 = vmatmul.msk.f32.vlgmr.msrb.gmra.mxu1 %vm2400_vm5, %v3408_v47 }
 0x5fe   : > { %v3437_v41 = vpop.f32.mrf.mxu1 }
 0x5ff   : > { %v3438_v16 = vadd.f32 %v4189_v43, %v3437_v41 }
 0x601   : > { %v3440_v39 = vmax.f32 %v3438_v16, 0.0 }
 0x603   : > { %3441 = vst [vmem:[%s596_s16] sm:$0xff] %v3440_v39 }
 0x604 PF: > { %p18_p9 = scmp.ge.s32.totalorder %s4296_s21, 4   ;;  %s7779_s17 = smov %s4208_s18 }
 0x605   : > { %s7780_s18 = smov %s4305_s24  ;;  %s7781_s19 = smov %s4296_s21 }
 0x606   :  { %20 = sbr.rel (!%p18_p9) target bundleno = 2 (0x2), region = 143 }

</bundles_post_ra>
